<compile_context>
chip_gen: v7x
topology: tpu7x:2x2x1
jax: 0.10.0
libtpu: 0.0.40
codegen_flags: <defaults>
</compile_context>

<pallas_src>
import math
import functools

import jax
import jax.numpy as jnp
from jax.experimental import pallas as pl
from jax.experimental.pallas import tpu as pltpu

# ----------------------------- model configuration -----------------------------
B = 2
IN_CHANS = 1
IMG_SIZE = (16, 16)
ENC_PATCH_SIZE = (4, 4)
ENC_SCALE_FACTOR = (2, 2)
ENC_CONV_CHANS = []                 # no conv stem -> DownsampleEncoder == patch embed
GRID_SIZE = (IMG_SIZE[0] // ENC_PATCH_SIZE[0], IMG_SIZE[1] // ENC_PATCH_SIZE[1])
N_PATCHES = GRID_SIZE[0] * GRID_SIZE[1]
PATCH_DIM = ENC_PATCH_SIZE[0] * ENC_PATCH_SIZE[1] * IN_CHANS

ENC_DIM, ENC_DEPTH, ENC_HEADS = 32, 2, 4
DEC_DIM, DEC_DEPTH, DEC_HEADS = 16, 1, 2
MLP_RATIO = 4
NORM_EPS = 1e-5
ENC_MASK_RATIO = 0.5


def get_decoder_patch_size(image_size, n_conv_layers, enc_patch_size, enc_scale_factor):
    dec_patch_size = (1,) * len(image_size)
    for i in range(1 + n_conv_layers):
        patch_size = enc_patch_size if i == 0 else enc_scale_factor
        dec_patch_size = tuple(s * p for s, p in zip(dec_patch_size, patch_size))
    return dec_patch_size


DEC_PATCH_SIZE = get_decoder_patch_size(IMG_SIZE, len(ENC_CONV_CHANS), ENC_PATCH_SIZE, ENC_SCALE_FACTOR)
OUT_CHANS = math.prod(DEC_PATCH_SIZE) * IN_CHANS

_PARALLEL = pltpu.CompilerParams(dimension_semantics=("parallel",))

# ----------------------------- in-kernel helpers --------------------------------


def _ln(x, g, b, eps):
    """LayerNorm over the last (lane) axis. x: (L, D); g, b: (1, D)."""
    mu = jnp.mean(x, axis=-1, keepdims=True)
    var = jnp.mean((x - mu) ** 2, axis=-1, keepdims=True)
    return (x - mu) * jax.lax.rsqrt(var + eps) * g + b


def _gelu_erf(x):
    """Exact-erf GELU (torch nn.GELU default), erf via Abramowitz & Stegun 7.1.26.

    Max abs error of the erf polynomial is 1.5e-7, i.e. below f32 noise for this
    workload; exp runs on the EUP slot, so the whole activation is essentially
    free next to the MXU work.
    """
    z = x * (1.0 / math.sqrt(2.0))
    az = jnp.abs(z)
    t = 1.0 / (1.0 + 0.3275911 * az)
    poly = ((((1.061405429 * t - 1.453152027) * t + 1.421413741) * t
             - 0.284496736) * t + 0.254829592) * t
    erf_abs = 1.0 - poly * jnp.exp(-az * az)
    erf_z = jnp.where(z < 0.0, -erf_abs, erf_abs)
    return x * 0.5 * (1.0 + erf_z)


def _heads_attention(q_all, k_all, v_all, pjw_ref, d, n_heads, head_dim):
    """Multi-head attention core on already-projected q/k/v slabs.

    q_all: (Lq, H*Dh); k_all, v_all: (Lk, H*Dh).
    pjw_ref: (depth*H, Dh, Dout) stacked per-head output-projection weights.
    Per-head projections are accumulated (== concat(heads) @ Wproj) to keep the
    output-projection lane-dense without an unaligned in-kernel concat.
    """
    scale = 1.0 / math.sqrt(head_dim)
    out = None
    for i in range(n_heads):
        lo = i * head_dim
        q = q_all[:, lo:lo + head_dim]
        k = k_all[:, lo:lo + head_dim]
        v = v_all[:, lo:lo + head_dim]
        s = jax.lax.dot_general(q, k, (((1,), (1,)), ((), ())),
                                preferred_element_type=jnp.float32) * scale   # (Lq, Lk)
        s = s - jnp.max(s, axis=-1, keepdims=True)
        p = jnp.exp(s)
        p = p / jnp.sum(p, axis=-1, keepdims=True)        # exact divide (parity w/ torch)
        o = jnp.dot(p, v, preferred_element_type=jnp.float32)                # (Lq, Dh)
        c = jnp.dot(o, pjw_ref[d * n_heads + i], preferred_element_type=jnp.float32)
        out = c if out is None else out + c
    return out


# ------------------------------- Pallas kernels --------------------------------


def _encoder_kernel(
    pin_ref, add_ref, pw_ref,
    ln1g_ref, ln1b_ref, qkvw_ref, qkvb_ref, pjw_ref, pjb_ref,
    ln2g_ref, ln2b_ref, f1w_ref, f1b_ref, f2w_ref, f2b_ref,
    ng_ref, nb_ref, fg_ref, fb_ref, dlw_ref, dlb_ref,
    out_ref,
    *, depth, n_heads, head_dim, eps,
):
    """Fused encoder path for one batch element.

    pin_ref[0]: (1+n_keep, PATCH_DIM)  -- row 0 is a zero patch (becomes cls token)
    add_ref[0]: (1+n_keep, E)          -- row 0 = cls_token, rows 1.. = patch_b + pos_embed
    Then ENC_DEPTH pre-norm transformer blocks (fused QKV matmul, all heads, MLP with
    in-kernel exact-erf GELU), encoder final norm, MultiScaleFusion norm (visible
    tokens only, cls skipped), and dec_linear.
    """
    emb = n_heads * head_dim
    # patch embed + bias + pos-embed + cls prepend folded into one matmul + add.
    x = jnp.dot(pin_ref[0], pw_ref[...], preferred_element_type=jnp.float32) + add_ref[0]

    for d in range(depth):                               # unrolled at trace time
        h = _ln(x, ln1g_ref[d], ln1b_ref[d], eps)
        qkv = jnp.dot(h, qkvw_ref[d], preferred_element_type=jnp.float32) + qkvb_ref[d]
        attn = _heads_attention(qkv[:, :emb], qkv[:, emb:2 * emb], qkv[:, 2 * emb:],
                                pjw_ref, d, n_heads, head_dim)
        x = x + attn + pjb_ref[d]
        h2 = _ln(x, ln2g_ref[d], ln2b_ref[d], eps)
        h1 = jnp.dot(h2, f1w_ref[d], preferred_element_type=jnp.float32) + f1b_ref[d]
        x = x + jnp.dot(_gelu_erf(h1), f2w_ref[d],
                        preferred_element_type=jnp.float32) + f2b_ref[d]

    y_norm = _ln(x, ng_ref[...], nb_ref[...], eps)
    y_fused = _ln(y_norm, fg_ref[...], fb_ref[...], eps)
    row = jax.lax.broadcasted_iota(jnp.int32, (x.shape[0], 1), 0)
    h_out = jnp.where(row == 0, y_norm, y_fused)         # cls token skips fusion norm
    out_ref[0] = jnp.dot(h_out, dlw_ref[...], preferred_element_type=jnp.float32) + dlb_ref[...]


def _decoder_kernel(
    xq_ref, xkv_ref, tgt_ref,
    lqg_ref, lqb_ref, lkg_ref, lkb_ref,
    wq_ref, bq_ref, wkv_ref, bkv_ref, pjw_ref, pjb_ref,
    ln2g_ref, ln2b_ref, f1w_ref, f1b_ref, f2w_ref, f2b_ref,
    ng_ref, nb_ref, hw_ref, hb_ref,
    pred_ref, sqerr_ref,
    *, depth, n_heads, head_dim, eps, n_masked,
):
    """Fused decoder path for one batch element.

    DEC_DEPTH pre-norm cross-attention blocks (fused Q and fused KV matmuls,
    in-kernel GELU), decoder final norm, prediction head, and masked-MSE lane
    partial sums (per batch element, summed outside).
    """
    emb = n_heads * head_dim
    xq = xq_ref[0]                                       # (1+n_masked, D)
    xkv = xkv_ref[0]                                     # (n_keep, D)

    for d in range(depth):
        hq = _ln(xq, lqg_ref[d], lqb_ref[d], eps)
        hk = _ln(xkv, lkg_ref[d], lkb_ref[d], eps)
        q_all = jnp.dot(hq, wq_ref[d], preferred_element_type=jnp.float32) + bq_ref[d]
        kv = jnp.dot(hk, wkv_ref[d], preferred_element_type=jnp.float32) + bkv_ref[d]
        attn = _heads_attention(q_all, kv[:, :emb], kv[:, emb:],
                                pjw_ref, d, n_heads, head_dim)
        xq = xq + attn + pjb_ref[d]
        h2 = _ln(xq, ln2g_ref[d], ln2b_ref[d], eps)
        h1 = jnp.dot(h2, f1w_ref[d], preferred_element_type=jnp.float32) + f1b_ref[d]
        xq = xq + jnp.dot(_gelu_erf(h1), f2w_ref[d],
                          preferred_element_type=jnp.float32) + f2b_ref[d]

    h = _ln(xq, ng_ref[...], nb_ref[...], eps)
    pred_all = jnp.dot(h, hw_ref[...], preferred_element_type=jnp.float32) + hb_ref[...]
    pred = pred_all[pred_all.shape[0] - n_masked:, :]    # trailing n_masked query tokens
    pred_ref[0] = pred
    diff = pred - tgt_ref[0]
    sqerr_ref[0] = jnp.sum(diff * diff, axis=0, keepdims=True)   # (1, OUT) lane partials


# ------------------------------ pallas_call wrappers -----------------------------


def _rep_spec(arr):
    """Whole-array block, identical for every grid step (weights / biases)."""
    nd = arr.ndim
    return pl.BlockSpec(arr.shape, lambda *_: (0,) * nd)


def _batch_spec(tail):
    """(1, *tail) block indexed by the batch grid axis."""
    return pl.BlockSpec((1, *tail), lambda b: (b,) + (0,) * len(tail))


def encoder_forward(patches_in, addend, ep):
    """patches_in: (B, 1+n_keep, PATCH_DIM); addend: (B, 1+n_keep, ENC_DIM)
    -> (B, 1+n_keep, DEC_DIM) (dec_linear output for cls + visible tokens)."""
    bsz, seq, _ = patches_in.shape
    kern = functools.partial(_encoder_kernel, depth=ENC_DEPTH, n_heads=ENC_HEADS,
                             head_dim=ENC_DIM // ENC_HEADS, eps=NORM_EPS)
    weights = (ep["patch_w"],
               ep["ln1_g"], ep["ln1_b"], ep["qkv_w"], ep["qkv_b"], ep["proj_w"], ep["proj_b"],
               ep["ln2_g"], ep["ln2_b"], ep["fc1_w"], ep["fc1_b"], ep["fc2_w"], ep["fc2_b"],
               ep["enc_norm_g"], ep["enc_norm_b"], ep["fusion_g"], ep["fusion_b"],
               ep["dec_lin_w"], ep["dec_lin_b"])
    return pl.pallas_call(
        kern,
        grid=(bsz,),
        out_shape=jax.ShapeDtypeStruct((bsz, seq, DEC_DIM), jnp.float32),
        in_specs=[_batch_spec(patches_in.shape[1:]), _batch_spec(addend.shape[1:])]
                 + [_rep_spec(w) for w in weights],
        out_specs=_batch_spec((seq, DEC_DIM)),
        compiler_params=_PARALLEL,
    )(patches_in, addend, *weights)


def decoder_forward(x_q, x_kv, target_masked, dp):
    """x_q: (B, 1+n_masked, DEC_DIM); x_kv: (B, n_keep, DEC_DIM);
    target_masked: (B, n_masked, OUT_CHANS)
    -> pred (B, n_masked, OUT_CHANS), sqerr (B, 1, OUT_CHANS) per-batch partials."""
    bsz = x_q.shape[0]
    n_masked = target_masked.shape[1]
    out_chans = dp["head_w"].shape[-1]
    kern = functools.partial(_decoder_kernel, depth=DEC_DEPTH, n_heads=DEC_HEADS,
                             head_dim=DEC_DIM // DEC_HEADS, eps=NORM_EPS,
                             n_masked=n_masked)
    weights = (dp["lnq_g"], dp["lnq_b"], dp["lnkv_g"], dp["lnkv_b"],
               dp["wq"], dp["bq"], dp["wkv"], dp["bkv"], dp["proj_w"], dp["proj_b"],
               dp["ln2_g"], dp["ln2_b"], dp["fc1_w"], dp["fc1_b"], dp["fc2_w"], dp["fc2_b"],
               dp["dec_norm_g"], dp["dec_norm_b"], dp["head_w"], dp["head_b"])
    pred, sqerr = pl.pallas_call(
        kern,
        grid=(bsz,),
        out_shape=(jax.ShapeDtypeStruct((bsz, n_masked, out_chans), jnp.float32),
                   jax.ShapeDtypeStruct((bsz, 1, out_chans), jnp.float32)),
        in_specs=[_batch_spec(x_q.shape[1:]), _batch_spec(x_kv.shape[1:]),
                  _batch_spec(target_masked.shape[1:])]
                 + [_rep_spec(w) for w in weights],
        out_specs=(_batch_spec((n_masked, out_chans)), _batch_spec((1, out_chans))),
        compiler_params=_PARALLEL,
    )(x_q, x_kv, target_masked, *weights)
    return pred, sqerr


# ------------------------------- plain-JAX glue ---------------------------------


def patchify(image, patch_size):
    """image: (B, C, H, W) NCHW -> (B, n_patches, ph*pw*C)."""
    b, c, h, w = image.shape
    ph, pw = patch_size
    gh, gw = h // ph, w // pw
    x = image.reshape(b, c, gh, ph, gw, pw)
    x = x.transpose(0, 2, 4, 3, 5, 1)  # (B, gh, gw, ph, pw, C)
    return x.reshape(b, gh * gw, ph * pw * c)


def sincos_pos_embed(embed_dim, grid_size):
    gh, gw = grid_size
    gy, gx = jnp.meshgrid(
        jnp.arange(gh, dtype=jnp.float32), jnp.arange(gw, dtype=jnp.float32), indexing="ij"
    )

    def one_axis(dim, pos):
        omega = jnp.arange(dim // 2, dtype=jnp.float32) / (dim / 2.0)
        omega = 1.0 / (10000.0 ** omega)
        out = pos.reshape(-1)[:, None] * omega[None, :]
        return jnp.concatenate([jnp.sin(out), jnp.cos(out)], axis=1)

    emb_h = one_axis(embed_dim // 2, gy)
    emb_w = one_axis(embed_dim // 2, gx)
    return jnp.concatenate([emb_h, emb_w], axis=1)  # (n_patches, embed_dim)


def get_batch_random_patch_mask(key, batch_size, n_patches, mask_ratio):
    """0 = keep / visible, 1 = remove (bool); same semantics as the torch version."""
    if mask_ratio < 0:
        raise ValueError(f"mask_ratio must be positive, got {mask_ratio}.")
    if mask_ratio == 0:
        return jnp.zeros((batch_size, n_patches), dtype=bool)
    noise = jax.random.uniform(key, (batch_size, n_patches))
    ids_shuffle = jnp.argsort(noise, axis=1)
    ids_restore = jnp.argsort(ids_shuffle, axis=1)
    n_keep = int(n_patches * (1 - mask_ratio))
    mask = jnp.ones((batch_size, n_patches), dtype=jnp.int32).at[:, :n_keep].set(0)
    mask = jnp.take_along_axis(mask, ids_restore, axis=1)
    return mask.astype(bool)


def split_indices(mask, n_keep):
    """Stable split of patch indices into (keep, masked), preserving original order
    within each group — matches torch boolean-mask gather order."""
    n_patches = mask.shape[1]
    sort_key = mask.astype(jnp.int32) * n_patches + jnp.arange(n_patches)[None, :]
    order = jnp.argsort(sort_key, axis=1)
    return order[:, :n_keep], order[:, n_keep:]


# ------------------------------ parameter init ----------------------------------


def init_params(key):
    keys = iter(jax.random.split(key, 32))
    enc_dh = ENC_DIM // ENC_HEADS
    dec_dh = DEC_DIM // DEC_HEADS
    enc_hid = MLP_RATIO * ENC_DIM
    dec_hid = MLP_RATIO * DEC_DIM

    def nrm(shape):
        return jax.random.normal(next(keys), shape, dtype=jnp.float32) * 0.02

    # --- encoder (depth-stacked, kernel-ready layouts) ---
    enc = {
        "patch_w": nrm((PATCH_DIM, ENC_DIM)),
        "patch_b": jnp.zeros((1, ENC_DIM), jnp.float32),
        "cls_token": nrm((1, ENC_DIM)),
        "ln1_g": jnp.ones((ENC_DEPTH, 1, ENC_DIM), jnp.float32),
        "ln1_b": jnp.zeros((ENC_DEPTH, 1, ENC_DIM), jnp.float32),
        # fused QKV: columns [0:E]=q heads, [E:2E]=k heads, [2E:3E]=v heads
        "qkv_w": nrm((ENC_DEPTH, ENC_DIM, 3 * ENC_DIM)),
        "qkv_b": jnp.zeros((ENC_DEPTH, 1, 3 * ENC_DIM), jnp.float32),
        # per-head output projection stacked (depth*H, Dh, E)
        "proj_w": nrm((ENC_DEPTH * ENC_HEADS, enc_dh, ENC_DIM)),
        "proj_b": jnp.zeros((ENC_DEPTH, 1, ENC_DIM), jnp.float32),
        "ln2_g": jnp.ones((ENC_DEPTH, 1, ENC_DIM), jnp.float32),
        "ln2_b": jnp.zeros((ENC_DEPTH, 1, ENC_DIM), jnp.float32),
        "fc1_w": nrm((ENC_DEPTH, ENC_DIM, enc_hid)),
        "fc1_b": jnp.zeros((ENC_DEPTH, 1, enc_hid), jnp.float32),
        "fc2_w": nrm((ENC_DEPTH, enc_hid, ENC_DIM)),
        "fc2_b": jnp.zeros((ENC_DEPTH, 1, ENC_DIM), jnp.float32),
        "enc_norm_g": jnp.ones((1, ENC_DIM), jnp.float32),
        "enc_norm_b": jnp.zeros((1, ENC_DIM), jnp.float32),
        "fusion_g": jnp.ones((1, ENC_DIM), jnp.float32),
        "fusion_b": jnp.zeros((1, ENC_DIM), jnp.float32),
        "dec_lin_w": nrm((ENC_DIM, DEC_DIM)),
        "dec_lin_b": jnp.zeros((1, DEC_DIM), jnp.float32),
    }
    # --- decoder (cross attention, depth-stacked) ---
    dec = {
        "lnq_g": jnp.ones((DEC_DEPTH, 1, DEC_DIM), jnp.float32),
        "lnq_b": jnp.zeros((DEC_DEPTH, 1, DEC_DIM), jnp.float32),
        "lnkv_g": jnp.ones((DEC_DEPTH, 1, DEC_DIM), jnp.float32),
        "lnkv_b": jnp.zeros((DEC_DEPTH, 1, DEC_DIM), jnp.float32),
        "wq": nrm((DEC_DEPTH, DEC_DIM, DEC_HEADS * dec_dh)),
        "bq": jnp.zeros((DEC_DEPTH, 1, DEC_HEADS * dec_dh), jnp.float32),
        # fused KV: columns [0:H*Dh]=k heads, [H*Dh:2*H*Dh]=v heads
        "wkv": nrm((DEC_DEPTH, DEC_DIM, 2 * DEC_HEADS * dec_dh)),
        "bkv": jnp.zeros((DEC_DEPTH, 1, 2 * DEC_HEADS * dec_dh), jnp.float32),
        "proj_w": nrm((DEC_DEPTH * DEC_HEADS, dec_dh, DEC_DIM)),
        "proj_b": jnp.zeros((DEC_DEPTH, 1, DEC_DIM), jnp.float32),
        "ln2_g": jnp.ones((DEC_DEPTH, 1, DEC_DIM), jnp.float32),
        "ln2_b": jnp.zeros((DEC_DEPTH, 1, DEC_DIM), jnp.float32),
        "fc1_w": nrm((DEC_DEPTH, DEC_DIM, dec_hid)),
        "fc1_b": jnp.zeros((DEC_DEPTH, 1, dec_hid), jnp.float32),
        "fc2_w": nrm((DEC_DEPTH, dec_hid, DEC_DIM)),
        "fc2_b": jnp.zeros((DEC_DEPTH, 1, DEC_DIM), jnp.float32),
        "dec_norm_g": jnp.ones((1, DEC_DIM), jnp.float32),
        "dec_norm_b": jnp.zeros((1, DEC_DIM), jnp.float32),
        "head_w": nrm((DEC_DIM, OUT_CHANS)),
        "head_b": jnp.zeros((1, OUT_CHANS), jnp.float32),
    }
    return {
        "enc": enc,
        "dec": dec,
        "enc_pos_embed": sincos_pos_embed(ENC_DIM, GRID_SIZE),
        "dec_pos_embed": sincos_pos_embed(DEC_DIM, GRID_SIZE),
        "mask_token": nrm((1, 1, DEC_DIM)),
    }


# ---------------------------------- forward --------------------------------------


@functools.partial(jax.jit, static_argnames=("enc_mask_ratio",))
def cinema_forward(params, image_dict, mask_key, enc_mask_ratio):
    """CineMA.forward for a single 'sax' view (norm_target=False, cross_attn=True).

    Exactly two pallas_calls: the fused encoder path and the fused decoder path.
    """
    view = "sax"
    image = image_dict[view]                                         # (B, C, H, W) NCHW
    batch = image.shape[0]
    n_keep = int(N_PATCHES * (1 - enc_mask_ratio))
    n_masked = N_PATCHES - n_keep

    enc_mask = get_batch_random_patch_mask(mask_key, batch, N_PATCHES, enc_mask_ratio)
    keep_idx, mask_idx = split_indices(enc_mask, n_keep)

    # --- DownsampleEncoder input prep ---
    # TODO(synk): DownsampleEncoder conv-stem/skip internals are not in the provided source;
    # with enc_conv_chans=[] it reduces to a strided-conv patch embedding; the linear embed
    # itself runs inside the fused encoder kernel (gathering visible patches first is exact
    # since the embedding is linear).
    patches = patchify(image, ENC_PATCH_SIZE)                        # (B, N, PATCH_DIM)
    vis_patches = jnp.take_along_axis(patches, keep_idx[:, :, None], axis=1)  # (B, n_keep, PD)
    vis_pos = params["enc_pos_embed"][keep_idx]                      # (B, n_keep, E)

    ep = params["enc"]
    # Row 0 of the kernel input is a zero patch; the matching addend row is the cls token,
    # so the kernel's single matmul+add yields [cls ; vis_patches@W + b + pos].
    patches_in = jnp.concatenate(
        [jnp.zeros((batch, 1, PATCH_DIM), jnp.float32), vis_patches], axis=1)
    addend = jnp.concatenate(
        [jnp.broadcast_to(ep["cls_token"][None], (batch, 1, ENC_DIM)),
         vis_pos + ep["patch_b"][None]], axis=1)

    # --- fused encoder pallas_call (patch embed -> ViT blocks -> norms -> dec_linear) ---
    # TODO(synk): MultiScaleFusion source not provided; with empty conv_chans (no skips) it is
    # approximated by a LayerNorm on the visible tokens (cls skipped).
    x_enc = encoder_forward(patches_in, addend, ep)                  # (B, 1+n_keep, DEC_DIM)
    x_cls, x_vis = x_enc[:, :1], x_enc[:, 1:]

    # --- DecoderEmbedding (add_pos_embed_and_append_mask_token, concat=False) ---
    dec_pe = params["dec_pos_embed"]
    x_kv = x_vis + dec_pe[keep_idx]                                  # (B, n_keep, D)
    x_mask = params["mask_token"] + dec_pe[mask_idx]                 # (B, n_masked, D)
    x_q = jnp.concatenate([x_cls, x_mask], axis=1)                   # (B, 1+n_masked, D)

    # --- target & metrics ---
    target = patchify(image, DEC_PATCH_SIZE)                         # (B, N, OUT_CHANS)
    mean = jnp.mean(target, axis=-1, keepdims=True)
    std = jnp.sqrt(jnp.var(target, axis=-1, keepdims=True, ddof=1))
    target_masked = jnp.take_along_axis(target, mask_idx[:, :, None], axis=1)

    # --- fused decoder pallas_call (cross blocks -> norm -> head -> masked MSE partials) ---
    # TODO(synk): ViTDecoder source not provided; implemented as pre-norm cross-attention + MLP
    # blocks with a final LayerNorm, returning only the trailing n_enc_masked tokens.
    pred, sqerr = decoder_forward(x_q, x_kv, target_masked, params["dec"])
    loss_view = jnp.sum(sqerr) / float(batch * n_masked * OUT_CHANS)

    metrics = {
        f"{view}_target_mean": jnp.mean(mean),
        f"{view}_target_std": jnp.mean(std),
        f"{view}_mse_loss": loss_view,
    }
    # torch: loss = mean of finite per-view losses, nan if none (single view here).
    loss = jnp.where(jnp.isfinite(loss_view), loss_view, jnp.nan).astype(jnp.float32)
    metrics["loss"] = loss

    return loss, {view: pred}, {view: enc_mask}, metrics


# ------------------------------------ main ----------------------------------------

if __name__ == "__main__":
    root = jax.random.PRNGKey(0)
    k_param, k_img, k_mask = jax.random.split(root, 3)

    image = jax.random.normal(k_img, (B, IN_CHANS, *IMG_SIZE), dtype=jnp.float32)
    params = init_params(k_param)

    loss, pred_dict, enc_mask_dict, metrics = cinema_forward(
        params, {"sax": image}, k_mask, enc_mask_ratio=ENC_MASK_RATIO
    )
    jax.block_until_ready((loss, pred_dict, enc_mask_dict, metrics))

    n_keep = int(N_PATCHES * (1 - ENC_MASK_RATIO))
    assert pred_dict["sax"].shape == (B, N_PATCHES - n_keep, OUT_CHANS)
    assert enc_mask_dict["sax"].shape == (B, N_PATCHES)
    assert bool(jnp.isfinite(loss))
    print("KERNEL_OK")
</pallas_src>

<mosaic_0001>
module attributes {stable_mosaic.version = 11 : i64} {
  func.func @_encoder_kernel(%arg0: i32, %arg1: memref<1x9x16xf32, #tpu.memory_space<vmem>>, %arg2: memref<1x9x32xf32, #tpu.memory_space<vmem>>, %arg3: memref<16x32xf32, #tpu.memory_space<vmem>>, %arg4: memref<2x1x32xf32, #tpu.memory_space<vmem>>, %arg5: memref<2x1x32xf32, #tpu.memory_space<vmem>>, %arg6: memref<2x32x96xf32, #tpu.memory_space<vmem>>, %arg7: memref<2x1x96xf32, #tpu.memory_space<vmem>>, %arg8: memref<8x8x32xf32, #tpu.memory_space<vmem>>, %arg9: memref<2x1x32xf32, #tpu.memory_space<vmem>>, %arg10: memref<2x1x32xf32, #tpu.memory_space<vmem>>, %arg11: memref<2x1x32xf32, #tpu.memory_space<vmem>>, %arg12: memref<2x32x128xf32, #tpu.memory_space<vmem>>, %arg13: memref<2x1x128xf32, #tpu.memory_space<vmem>>, %arg14: memref<2x128x32xf32, #tpu.memory_space<vmem>>, %arg15: memref<2x1x32xf32, #tpu.memory_space<vmem>>, %arg16: memref<1x32xf32, #tpu.memory_space<vmem>>, %arg17: memref<1x32xf32, #tpu.memory_space<vmem>>, %arg18: memref<1x32xf32, #tpu.memory_space<vmem>>, %arg19: memref<1x32xf32, #tpu.memory_space<vmem>>, %arg20: memref<32x16xf32, #tpu.memory_space<vmem>>, %arg21: memref<1x16xf32, #tpu.memory_space<vmem>>, %arg22: memref<1x9x16xf32, #tpu.memory_space<vmem>>) attributes {dimension_semantics = [#tpu.dimension_semantics<parallel>], iteration_bounds = array<i64: 2>, scalar_prefetch = 0 : i64, scratch_operands = 0 : i64, tpu.core_type = #tpu.core_type<tc>, window_params = [{transform_indices = @transform_0, window_bounds = array<i64: 1, 9, 16>}, {transform_indices = @transform_1, window_bounds = array<i64: 1, 9, 32>}, {pipeline_mode = #tpu.pipeline_mode<synchronous>, transform_indices = @transform_2, window_bounds = array<i64: 16, 32>}, {pipeline_mode = #tpu.pipeline_mode<synchronous>, transform_indices = @transform_3, window_bounds = array<i64: 2, 1, 32>}, {pipeline_mode = #tpu.pipeline_mode<synchronous>, transform_indices = @transform_4, window_bounds = array<i64: 2, 1, 32>}, {pipeline_mode = #tpu.pipeline_mode<synchronous>, transform_indices = @transform_5, window_bounds = array<i64: 2, 32, 96>}, {pipeline_mode = #tpu.pipeline_mode<synchronous>, transform_indices = @transform_6, window_bounds = array<i64: 2, 1, 96>}, {pipeline_mode = #tpu.pipeline_mode<synchronous>, transform_indices = @transform_7, window_bounds = array<i64: 8, 8, 32>}, {pipeline_mode = #tpu.pipeline_mode<synchronous>, transform_indices = @transform_8, window_bounds = array<i64: 2, 1, 32>}, {pipeline_mode = #tpu.pipeline_mode<synchronous>, transform_indices = @transform_9, window_bounds = array<i64: 2, 1, 32>}, {pipeline_mode = #tpu.pipeline_mode<synchronous>, transform_indices = @transform_10, window_bounds = array<i64: 2, 1, 32>}, {pipeline_mode = #tpu.pipeline_mode<synchronous>, transform_indices = @transform_11, window_bounds = array<i64: 2, 32, 128>}, {pipeline_mode = #tpu.pipeline_mode<synchronous>, transform_indices = @transform_12, window_bounds = array<i64: 2, 1, 128>}, {pipeline_mode = #tpu.pipeline_mode<synchronous>, transform_indices = @transform_13, window_bounds = array<i64: 2, 128, 32>}, {pipeline_mode = #tpu.pipeline_mode<synchronous>, transform_indices = @transform_14, window_bounds = array<i64: 2, 1, 32>}, {pipeline_mode = #tpu.pipeline_mode<synchronous>, transform_indices = @transform_15, window_bounds = array<i64: 1, 32>}, {pipeline_mode = #tpu.pipeline_mode<synchronous>, transform_indices = @transform_16, window_bounds = array<i64: 1, 32>}, {pipeline_mode = #tpu.pipeline_mode<synchronous>, transform_indices = @transform_17, window_bounds = array<i64: 1, 32>}, {pipeline_mode = #tpu.pipeline_mode<synchronous>, transform_indices = @transform_18, window_bounds = array<i64: 1, 32>}, {pipeline_mode = #tpu.pipeline_mode<synchronous>, transform_indices = @transform_19, window_bounds = array<i64: 32, 16>}, {pipeline_mode = #tpu.pipeline_mode<synchronous>, transform_indices = @transform_20, window_bounds = array<i64: 1, 16>}, {transform_indices = @transform_21, window_bounds = array<i64: 1, 9, 16>}]} {
    %c0 = arith.constant 0 : index
    %c0_0 = arith.constant 0 : index
    %c0_1 = arith.constant 0 : index
    %0 = vector.load %arg1[%c0, %c0_0, %c0_1] : memref<1x9x16xf32, #tpu.memory_space<vmem>>, vector<1x9x16xf32>
    %1 = vector.shape_cast %0 : vector<1x9x16xf32> to vector<9x16xf32>
    %c0_2 = arith.constant 0 : index
    %c0_3 = arith.constant 0 : index
    %2 = vector.load %arg3[%c0_2, %c0_3] : memref<16x32xf32, #tpu.memory_space<vmem>>, vector<16x32xf32>
    %cst = arith.constant dense<0.000000e+00> : vector<9x32xf32>
    %3 = tpu.matmul %1, %2, %cst {dimension_numbers = #tpu.dot_dimension_numbers<[1], [0], [0], [1], [0, 0, 1, 1], [], []>} : vector<9x16xf32>, vector<16x32xf32>, vector<9x32xf32> -> vector<9x32xf32>
    %c0_4 = arith.constant 0 : index
    %c0_5 = arith.constant 0 : index
    %c0_6 = arith.constant 0 : index
    %4 = vector.load %arg2[%c0_4, %c0_5, %c0_6] : memref<1x9x32xf32, #tpu.memory_space<vmem>>, vector<1x9x32xf32>
    %5 = vector.shape_cast %4 : vector<1x9x32xf32> to vector<9x32xf32>
    %6 = arith.addf %3, %5 : vector<9x32xf32>
    %c0_7 = arith.constant 0 : index
    %c0_8 = arith.constant 0 : index
    %c0_9 = arith.constant 0 : index
    %7 = vector.load %arg4[%c0_7, %c0_8, %c0_9] : memref<2x1x32xf32, #tpu.memory_space<vmem>>, vector<1x1x32xf32>
    %8 = vector.shape_cast %7 : vector<1x1x32xf32> to vector<1x32xf32>
    %c0_10 = arith.constant 0 : index
    %c0_11 = arith.constant 0 : index
    %c0_12 = arith.constant 0 : index
    %9 = vector.load %arg5[%c0_10, %c0_11, %c0_12] : memref<2x1x32xf32, #tpu.memory_space<vmem>>, vector<1x1x32xf32>
    %10 = vector.shape_cast %9 : vector<1x1x32xf32> to vector<1x32xf32>
    %cst_13 = arith.constant dense<0.000000e+00> : vector<9xf32>
    %11 = vector.multi_reduction <add>, %6, %cst_13 [1] : vector<9x32xf32> to vector<9xf32>
    %12 = vector.shape_cast %11 : vector<9xf32> to vector<9x1xf32>
    %cst_14 = arith.constant 3.200000e+01 : f32
    %13 = vector.broadcast %cst_14 : f32 to vector<9x1xf32>
    %14 = arith.divf %12, %13 : vector<9x1xf32>
    %15 = vector.broadcast %14 : vector<9x1xf32> to vector<9x32xf32>
    %16 = arith.subf %6, %15 : vector<9x32xf32>
    %17 = arith.mulf %16, %16 : vector<9x32xf32>
    %cst_15 = arith.constant dense<0.000000e+00> : vector<9xf32>
    %18 = vector.multi_reduction <add>, %17, %cst_15 [1] : vector<9x32xf32> to vector<9xf32>
    %19 = vector.shape_cast %18 : vector<9xf32> to vector<9x1xf32>
    %cst_16 = arith.constant 3.200000e+01 : f32
    %20 = vector.broadcast %cst_16 : f32 to vector<9x1xf32>
    %21 = arith.divf %19, %20 : vector<9x1xf32>
    %22 = vector.broadcast %14 : vector<9x1xf32> to vector<9x32xf32>
    %23 = arith.subf %6, %22 : vector<9x32xf32>
    %cst_17 = arith.constant 9.99999974E-6 : f32
    %24 = vector.broadcast %cst_17 : f32 to vector<9x1xf32>
    %25 = arith.addf %21, %24 : vector<9x1xf32>
    %26 = math.rsqrt %25 : vector<9x1xf32>
    %27 = vector.broadcast %26 : vector<9x1xf32> to vector<9x32xf32>
    %28 = arith.mulf %23, %27 : vector<9x32xf32>
    %29 = vector.broadcast %8 : vector<1x32xf32> to vector<9x32xf32>
    %30 = arith.mulf %28, %29 : vector<9x32xf32>
    %31 = vector.broadcast %10 : vector<1x32xf32> to vector<9x32xf32>
    %32 = arith.addf %30, %31 : vector<9x32xf32>
    %c0_18 = arith.constant 0 : index
    %c0_19 = arith.constant 0 : index
    %c0_20 = arith.constant 0 : index
    %33 = vector.load %arg6[%c0_18, %c0_19, %c0_20] : memref<2x32x96xf32, #tpu.memory_space<vmem>>, vector<1x32x96xf32>
    %34 = vector.shape_cast %33 : vector<1x32x96xf32> to vector<32x96xf32>
    %cst_21 = arith.constant dense<0.000000e+00> : vector<9x96xf32>
    %35 = tpu.matmul %32, %34, %cst_21 {dimension_numbers = #tpu.dot_dimension_numbers<[1], [0], [0], [1], [0, 0, 1, 1], [], []>} : vector<9x32xf32>, vector<32x96xf32>, vector<9x96xf32> -> vector<9x96xf32>
    %c0_22 = arith.constant 0 : index
    %c0_23 = arith.constant 0 : index
    %c0_24 = arith.constant 0 : index
    %36 = vector.load %arg7[%c0_22, %c0_23, %c0_24] : memref<2x1x96xf32, #tpu.memory_space<vmem>>, vector<1x1x96xf32>
    %37 = vector.shape_cast %36 : vector<1x1x96xf32> to vector<1x96xf32>
    %38 = vector.broadcast %37 : vector<1x96xf32> to vector<9x96xf32>
    %39 = arith.addf %35, %38 : vector<9x96xf32>
    %40 = vector.extract_strided_slice %39 {offsets = [0, 0], sizes = [9, 32], strides = [1, 1]} : vector<9x96xf32> to vector<9x32xf32>
    %41 = vector.extract_strided_slice %39 {offsets = [0, 32], sizes = [9, 32], strides = [1, 1]} : vector<9x96xf32> to vector<9x32xf32>
    %42 = vector.extract_strided_slice %39 {offsets = [0, 64], sizes = [9, 32], strides = [1, 1]} : vector<9x96xf32> to vector<9x32xf32>
    %43 = vector.extract_strided_slice %40 {offsets = [0, 0], sizes = [9, 8], strides = [1, 1]} : vector<9x32xf32> to vector<9x8xf32>
    %44 = vector.extract_strided_slice %41 {offsets = [0, 0], sizes = [9, 8], strides = [1, 1]} : vector<9x32xf32> to vector<9x8xf32>
    %45 = vector.extract_strided_slice %42 {offsets = [0, 0], sizes = [9, 8], strides = [1, 1]} : vector<9x32xf32> to vector<9x8xf32>
    %cst_25 = arith.constant dense<0.000000e+00> : vector<9x9xf32>
    %46 = tpu.matmul %43, %44, %cst_25 {dimension_numbers = #tpu.dot_dimension_numbers<[1], [1], [0], [0], [0, 0, 1, 0], [], []>} : vector<9x8xf32>, vector<9x8xf32>, vector<9x9xf32> -> vector<9x9xf32>
    %cst_26 = arith.constant 0.353553385 : f32
    %47 = vector.broadcast %cst_26 : f32 to vector<9x9xf32>
    %48 = arith.mulf %46, %47 : vector<9x9xf32>
    %cst_27 = arith.constant dense<0xFF800000> : vector<9xf32>
    %49 = vector.multi_reduction <maximumf>, %48, %cst_27 [1] : vector<9x9xf32> to vector<9xf32>
    %50 = vector.shape_cast %49 : vector<9xf32> to vector<9x1xf32>
    %51 = vector.broadcast %50 : vector<9x1xf32> to vector<9x9xf32>
    %52 = arith.subf %48, %51 : vector<9x9xf32>
    %53 = math.exp %52 : vector<9x9xf32>
    %cst_28 = arith.constant dense<0.000000e+00> : vector<9xf32>
    %54 = vector.multi_reduction <add>, %53, %cst_28 [1] : vector<9x9xf32> to vector<9xf32>
    %55 = vector.shape_cast %54 : vector<9xf32> to vector<9x1xf32>
    %56 = vector.broadcast %55 : vector<9x1xf32> to vector<9x9xf32>
    %57 = arith.divf %53, %56 : vector<9x9xf32>
    %cst_29 = arith.constant dense<0.000000e+00> : vector<9x8xf32>
    %58 = tpu.matmul %57, %45, %cst_29 {dimension_numbers = #tpu.dot_dimension_numbers<[1], [0], [0], [1], [0, 0, 1, 1], [], []>} : vector<9x9xf32>, vector<9x8xf32>, vector<9x8xf32> -> vector<9x8xf32>
    %c0_30 = arith.constant 0 : index
    %c0_31 = arith.constant 0 : index
    %c0_32 = arith.constant 0 : index
    %59 = vector.load %arg8[%c0_30, %c0_31, %c0_32] : memref<8x8x32xf32, #tpu.memory_space<vmem>>, vector<1x8x32xf32>
    %60 = vector.shape_cast %59 : vector<1x8x32xf32> to vector<8x32xf32>
    %cst_33 = arith.constant dense<0.000000e+00> : vector<9x32xf32>
    %61 = tpu.matmul %58, %60, %cst_33 {dimension_numbers = #tpu.dot_dimension_numbers<[1], [0], [0], [1], [0, 0, 1, 1], [], []>} : vector<9x8xf32>, vector<8x32xf32>, vector<9x32xf32> -> vector<9x32xf32>
    %62 = vector.extract_strided_slice %40 {offsets = [0, 8], sizes = [9, 8], strides = [1, 1]} : vector<9x32xf32> to vector<9x8xf32>
    %63 = vector.extract_strided_slice %41 {offsets = [0, 8], sizes = [9, 8], strides = [1, 1]} : vector<9x32xf32> to vector<9x8xf32>
    %64 = vector.extract_strided_slice %42 {offsets = [0, 8], sizes = [9, 8], strides = [1, 1]} : vector<9x32xf32> to vector<9x8xf32>
    %cst_34 = arith.constant dense<0.000000e+00> : vector<9x9xf32>
    %65 = tpu.matmul %62, %63, %cst_34 {dimension_numbers = #tpu.dot_dimension_numbers<[1], [1], [0], [0], [0, 0, 1, 0], [], []>} : vector<9x8xf32>, vector<9x8xf32>, vector<9x9xf32> -> vector<9x9xf32>
    %cst_35 = arith.constant 0.353553385 : f32
    %66 = vector.broadcast %cst_35 : f32 to vector<9x9xf32>
    %67 = arith.mulf %65, %66 : vector<9x9xf32>
    %cst_36 = arith.constant dense<0xFF800000> : vector<9xf32>
    %68 = vector.multi_reduction <maximumf>, %67, %cst_36 [1] : vector<9x9xf32> to vector<9xf32>
    %69 = vector.shape_cast %68 : vector<9xf32> to vector<9x1xf32>
    %70 = vector.broadcast %69 : vector<9x1xf32> to vector<9x9xf32>
    %71 = arith.subf %67, %70 : vector<9x9xf32>
    %72 = math.exp %71 : vector<9x9xf32>
    %cst_37 = arith.constant dense<0.000000e+00> : vector<9xf32>
    %73 = vector.multi_reduction <add>, %72, %cst_37 [1] : vector<9x9xf32> to vector<9xf32>
    %74 = vector.shape_cast %73 : vector<9xf32> to vector<9x1xf32>
    %75 = vector.broadcast %74 : vector<9x1xf32> to vector<9x9xf32>
    %76 = arith.divf %72, %75 : vector<9x9xf32>
    %cst_38 = arith.constant dense<0.000000e+00> : vector<9x8xf32>
    %77 = tpu.matmul %76, %64, %cst_38 {dimension_numbers = #tpu.dot_dimension_numbers<[1], [0], [0], [1], [0, 0, 1, 1], [], []>} : vector<9x9xf32>, vector<9x8xf32>, vector<9x8xf32> -> vector<9x8xf32>
    %c1 = arith.constant 1 : index
    %c0_39 = arith.constant 0 : index
    %c0_40 = arith.constant 0 : index
    %78 = vector.load %arg8[%c1, %c0_39, %c0_40] : memref<8x8x32xf32, #tpu.memory_space<vmem>>, vector<1x8x32xf32>
    %79 = vector.shape_cast %78 : vector<1x8x32xf32> to vector<8x32xf32>
    %cst_41 = arith.constant dense<0.000000e+00> : vector<9x32xf32>
    %80 = tpu.matmul %77, %79, %cst_41 {dimension_numbers = #tpu.dot_dimension_numbers<[1], [0], [0], [1], [0, 0, 1, 1], [], []>} : vector<9x8xf32>, vector<8x32xf32>, vector<9x32xf32> -> vector<9x32xf32>
    %81 = arith.addf %61, %80 : vector<9x32xf32>
    %82 = vector.extract_strided_slice %40 {offsets = [0, 16], sizes = [9, 8], strides = [1, 1]} : vector<9x32xf32> to vector<9x8xf32>
    %83 = vector.extract_strided_slice %41 {offsets = [0, 16], sizes = [9, 8], strides = [1, 1]} : vector<9x32xf32> to vector<9x8xf32>
    %84 = vector.extract_strided_slice %42 {offsets = [0, 16], sizes = [9, 8], strides = [1, 1]} : vector<9x32xf32> to vector<9x8xf32>
    %cst_42 = arith.constant dense<0.000000e+00> : vector<9x9xf32>
    %85 = tpu.matmul %82, %83, %cst_42 {dimension_numbers = #tpu.dot_dimension_numbers<[1], [1], [0], [0], [0, 0, 1, 0], [], []>} : vector<9x8xf32>, vector<9x8xf32>, vector<9x9xf32> -> vector<9x9xf32>
    %cst_43 = arith.constant 0.353553385 : f32
    %86 = vector.broadcast %cst_43 : f32 to vector<9x9xf32>
    %87 = arith.mulf %85, %86 : vector<9x9xf32>
    %cst_44 = arith.constant dense<0xFF800000> : vector<9xf32>
    %88 = vector.multi_reduction <maximumf>, %87, %cst_44 [1] : vector<9x9xf32> to vector<9xf32>
    %89 = vector.shape_cast %88 : vector<9xf32> to vector<9x1xf32>
    %90 = vector.broadcast %89 : vector<9x1xf32> to vector<9x9xf32>
    %91 = arith.subf %87, %90 : vector<9x9xf32>
    %92 = math.exp %91 : vector<9x9xf32>
    %cst_45 = arith.constant dense<0.000000e+00> : vector<9xf32>
    %93 = vector.multi_reduction <add>, %92, %cst_45 [1] : vector<9x9xf32> to vector<9xf32>
    %94 = vector.shape_cast %93 : vector<9xf32> to vector<9x1xf32>
    %95 = vector.broadcast %94 : vector<9x1xf32> to vector<9x9xf32>
    %96 = arith.divf %92, %95 : vector<9x9xf32>
    %cst_46 = arith.constant dense<0.000000e+00> : vector<9x8xf32>
    %97 = tpu.matmul %96, %84, %cst_46 {dimension_numbers = #tpu.dot_dimension_numbers<[1], [0], [0], [1], [0, 0, 1, 1], [], []>} : vector<9x9xf32>, vector<9x8xf32>, vector<9x8xf32> -> vector<9x8xf32>
    %c2 = arith.constant 2 : index
    %c0_47 = arith.constant 0 : index
    %c0_48 = arith.constant 0 : index
    %98 = vector.load %arg8[%c2, %c0_47, %c0_48] : memref<8x8x32xf32, #tpu.memory_space<vmem>>, vector<1x8x32xf32>
    %99 = vector.shape_cast %98 : vector<1x8x32xf32> to vector<8x32xf32>
    %cst_49 = arith.constant dense<0.000000e+00> : vector<9x32xf32>
    %100 = tpu.matmul %97, %99, %cst_49 {dimension_numbers = #tpu.dot_dimension_numbers<[1], [0], [0], [1], [0, 0, 1, 1], [], []>} : vector<9x8xf32>, vector<8x32xf32>, vector<9x32xf32> -> vector<9x32xf32>
    %101 = arith.addf %81, %100 : vector<9x32xf32>
    %102 = vector.extract_strided_slice %40 {offsets = [0, 24], sizes = [9, 8], strides = [1, 1]} : vector<9x32xf32> to vector<9x8xf32>
    %103 = vector.extract_strided_slice %41 {offsets = [0, 24], sizes = [9, 8], strides = [1, 1]} : vector<9x32xf32> to vector<9x8xf32>
    %104 = vector.extract_strided_slice %42 {offsets = [0, 24], sizes = [9, 8], strides = [1, 1]} : vector<9x32xf32> to vector<9x8xf32>
    %cst_50 = arith.constant dense<0.000000e+00> : vector<9x9xf32>
    %105 = tpu.matmul %102, %103, %cst_50 {dimension_numbers = #tpu.dot_dimension_numbers<[1], [1], [0], [0], [0, 0, 1, 0], [], []>} : vector<9x8xf32>, vector<9x8xf32>, vector<9x9xf32> -> vector<9x9xf32>
    %cst_51 = arith.constant 0.353553385 : f32
    %106 = vector.broadcast %cst_51 : f32 to vector<9x9xf32>
    %107 = arith.mulf %105, %106 : vector<9x9xf32>
    %cst_52 = arith.constant dense<0xFF800000> : vector<9xf32>
    %108 = vector.multi_reduction <maximumf>, %107, %cst_52 [1] : vector<9x9xf32> to vector<9xf32>
    %109 = vector.shape_cast %108 : vector<9xf32> to vector<9x1xf32>
    %110 = vector.broadcast %109 : vector<9x1xf32> to vector<9x9xf32>
    %111 = arith.subf %107, %110 : vector<9x9xf32>
    %112 = math.exp %111 : vector<9x9xf32>
    %cst_53 = arith.constant dense<0.000000e+00> : vector<9xf32>
    %113 = vector.multi_reduction <add>, %112, %cst_53 [1] : vector<9x9xf32> to vector<9xf32>
    %114 = vector.shape_cast %113 : vector<9xf32> to vector<9x1xf32>
    %115 = vector.broadcast %114 : vector<9x1xf32> to vector<9x9xf32>
    %116 = arith.divf %112, %115 : vector<9x9xf32>
    %cst_54 = arith.constant dense<0.000000e+00> : vector<9x8xf32>
    %117 = tpu.matmul %116, %104, %cst_54 {dimension_numbers = #tpu.dot_dimension_numbers<[1], [0], [0], [1], [0, 0, 1, 1], [], []>} : vector<9x9xf32>, vector<9x8xf32>, vector<9x8xf32> -> vector<9x8xf32>
    %c3 = arith.constant 3 : index
    %c0_55 = arith.constant 0 : index
    %c0_56 = arith.constant 0 : index
    %118 = vector.load %arg8[%c3, %c0_55, %c0_56] : memref<8x8x32xf32, #tpu.memory_space<vmem>>, vector<1x8x32xf32>
    %119 = vector.shape_cast %118 : vector<1x8x32xf32> to vector<8x32xf32>
    %cst_57 = arith.constant dense<0.000000e+00> : vector<9x32xf32>
    %120 = tpu.matmul %117, %119, %cst_57 {dimension_numbers = #tpu.dot_dimension_numbers<[1], [0], [0], [1], [0, 0, 1, 1], [], []>} : vector<9x8xf32>, vector<8x32xf32>, vector<9x32xf32> -> vector<9x32xf32>
    %121 = arith.addf %101, %120 : vector<9x32xf32>
    %122 = arith.addf %6, %121 : vector<9x32xf32>
    %c0_58 = arith.constant 0 : index
    %c0_59 = arith.constant 0 : index
    %c0_60 = arith.constant 0 : index
    %123 = vector.load %arg9[%c0_58, %c0_59, %c0_60] : memref<2x1x32xf32, #tpu.memory_space<vmem>>, vector<1x1x32xf32>
    %124 = vector.shape_cast %123 : vector<1x1x32xf32> to vector<1x32xf32>
    %125 = vector.broadcast %124 : vector<1x32xf32> to vector<9x32xf32>
    %126 = arith.addf %122, %125 : vector<9x32xf32>
    %c0_61 = arith.constant 0 : index
    %c0_62 = arith.constant 0 : index
    %c0_63 = arith.constant 0 : index
    %127 = vector.load %arg10[%c0_61, %c0_62, %c0_63] : memref<2x1x32xf32, #tpu.memory_space<vmem>>, vector<1x1x32xf32>
    %128 = vector.shape_cast %127 : vector<1x1x32xf32> to vector<1x32xf32>
    %c0_64 = arith.constant 0 : index
    %c0_65 = arith.constant 0 : index
    %c0_66 = arith.constant 0 : index
    %129 = vector.load %arg11[%c0_64, %c0_65, %c0_66] : memref<2x1x32xf32, #tpu.memory_space<vmem>>, vector<1x1x32xf32>
    %130 = vector.shape_cast %129 : vector<1x1x32xf32> to vector<1x32xf32>
    %cst_67 = arith.constant dense<0.000000e+00> : vector<9xf32>
    %131 = vector.multi_reduction <add>, %126, %cst_67 [1] : vector<9x32xf32> to vector<9xf32>
    %132 = vector.shape_cast %131 : vector<9xf32> to vector<9x1xf32>
    %cst_68 = arith.constant 3.200000e+01 : f32
    %133 = vector.broadcast %cst_68 : f32 to vector<9x1xf32>
    %134 = arith.divf %132, %133 : vector<9x1xf32>
    %135 = vector.broadcast %134 : vector<9x1xf32> to vector<9x32xf32>
    %136 = arith.subf %126, %135 : vector<9x32xf32>
    %137 = arith.mulf %136, %136 : vector<9x32xf32>
    %cst_69 = arith.constant dense<0.000000e+00> : vector<9xf32>
    %138 = vector.multi_reduction <add>, %137, %cst_69 [1] : vector<9x32xf32> to vector<9xf32>
    %139 = vector.shape_cast %138 : vector<9xf32> to vector<9x1xf32>
    %cst_70 = arith.constant 3.200000e+01 : f32
    %140 = vector.broadcast %cst_70 : f32 to vector<9x1xf32>
    %141 = arith.divf %139, %140 : vector<9x1xf32>
    %142 = vector.broadcast %134 : vector<9x1xf32> to vector<9x32xf32>
    %143 = arith.subf %126, %142 : vector<9x32xf32>
    %cst_71 = arith.constant 9.99999974E-6 : f32
    %144 = vector.broadcast %cst_71 : f32 to vector<9x1xf32>
    %145 = arith.addf %141, %144 : vector<9x1xf32>
    %146 = math.rsqrt %145 : vector<9x1xf32>
    %147 = vector.broadcast %146 : vector<9x1xf32> to vector<9x32xf32>
    %148 = arith.mulf %143, %147 : vector<9x32xf32>
    %149 = vector.broadcast %128 : vector<1x32xf32> to vector<9x32xf32>
    %150 = arith.mulf %148, %149 : vector<9x32xf32>
    %151 = vector.broadcast %130 : vector<1x32xf32> to vector<9x32xf32>
    %152 = arith.addf %150, %151 : vector<9x32xf32>
    %c0_72 = arith.constant 0 : index
    %c0_73 = arith.constant 0 : index
    %c0_74 = arith.constant 0 : index
    %153 = vector.load %arg12[%c0_72, %c0_73, %c0_74] : memref<2x32x128xf32, #tpu.memory_space<vmem>>, vector<1x32x128xf32>
    %154 = vector.shape_cast %153 : vector<1x32x128xf32> to vector<32x128xf32>
    %cst_75 = arith.constant dense<0.000000e+00> : vector<9x128xf32>
    %155 = tpu.matmul %152, %154, %cst_75 {dimension_numbers = #tpu.dot_dimension_numbers<[1], [0], [0], [1], [0, 0, 1, 1], [], []>} : vector<9x32xf32>, vector<32x128xf32>, vector<9x128xf32> -> vector<9x128xf32>
    %c0_76 = arith.constant 0 : index
    %c0_77 = arith.constant 0 : index
    %c0_78 = arith.constant 0 : index
    %156 = vector.load %arg13[%c0_76, %c0_77, %c0_78] : memref<2x1x128xf32, #tpu.memory_space<vmem>>, vector<1x1x128xf32>
    %157 = vector.shape_cast %156 : vector<1x1x128xf32> to vector<1x128xf32>
    %158 = vector.broadcast %157 : vector<1x128xf32> to vector<9x128xf32>
    %159 = arith.addf %155, %158 : vector<9x128xf32>
    %cst_79 = arith.constant 0.707106769 : f32
    %160 = vector.broadcast %cst_79 : f32 to vector<9x128xf32>
    %161 = arith.mulf %159, %160 : vector<9x128xf32>
    %162 = math.absf %161 : vector<9x128xf32>
    %cst_80 = arith.constant 0.327591091 : f32
    %163 = vector.broadcast %cst_80 : f32 to vector<9x128xf32>
    %164 = arith.mulf %163, %162 : vector<9x128xf32>
    %cst_81 = arith.constant 1.000000e+00 : f32
    %165 = vector.broadcast %cst_81 : f32 to vector<9x128xf32>
    %166 = arith.addf %165, %164 : vector<9x128xf32>
    %cst_82 = arith.constant 1.000000e+00 : f32
    %167 = vector.broadcast %cst_82 : f32 to vector<9x128xf32>
    %168 = arith.divf %167, %166 : vector<9x128xf32>
    %cst_83 = arith.constant 1.06140542 : f32
    %169 = vector.broadcast %cst_83 : f32 to vector<9x128xf32>
    %170 = arith.mulf %169, %168 : vector<9x128xf32>
    %cst_84 = arith.constant 1.45315206 : f32
    %171 = vector.broadcast %cst_84 : f32 to vector<9x128xf32>
    %172 = arith.subf %170, %171 : vector<9x128xf32>
    %173 = arith.mulf %172, %168 : vector<9x128xf32>
    %cst_85 = arith.constant 1.42141378 : f32
    %174 = vector.broadcast %cst_85 : f32 to vector<9x128xf32>
    %175 = arith.addf %173, %174 : vector<9x128xf32>
    %176 = arith.mulf %175, %168 : vector<9x128xf32>
    %cst_86 = arith.constant 0.284496725 : f32
    %177 = vector.broadcast %cst_86 : f32 to vector<9x128xf32>
    %178 = arith.subf %176, %177 : vector<9x128xf32>
    %179 = arith.mulf %178, %168 : vector<9x128xf32>
    %cst_87 = arith.constant 0.254829586 : f32
    %180 = vector.broadcast %cst_87 : f32 to vector<9x128xf32>
    %181 = arith.addf %179, %180 : vector<9x128xf32>
    %182 = arith.mulf %181, %168 : vector<9x128xf32>
    %cst_88 = arith.constant 0.000000e+00 : f32
    %183 = vector.broadcast %cst_88 : f32 to vector<9x128xf32>
    %184 = arith.subf %183, %162 : vector<9x128xf32>
    %185 = arith.mulf %184, %162 : vector<9x128xf32>
    %186 = math.exp %185 : vector<9x128xf32>
    %187 = arith.mulf %182, %186 : vector<9x128xf32>
    %cst_89 = arith.constant 1.000000e+00 : f32
    %188 = vector.broadcast %cst_89 : f32 to vector<9x128xf32>
    %189 = arith.subf %188, %187 : vector<9x128xf32>
    %cst_90 = arith.constant 0.000000e+00 : f32
    %190 = vector.broadcast %cst_90 : f32 to vector<9x128xf32>
    %191 = arith.cmpf olt, %161, %190 : vector<9x128xf32>
    %cst_91 = arith.constant 0.000000e+00 : f32
    %192 = vector.broadcast %cst_91 : f32 to vector<9x128xf32>
    %193 = arith.subf %192, %189 : vector<9x128xf32>
    %194 = arith.select %191, %193, %189 : vector<9x128xi1>, vector<9x128xf32>
    %cst_92 = arith.constant 5.000000e-01 : f32
    %195 = vector.broadcast %cst_92 : f32 to vector<9x128xf32>
    %196 = arith.mulf %159, %195 : vector<9x128xf32>
    %cst_93 = arith.constant 1.000000e+00 : f32
    %197 = vector.broadcast %cst_93 : f32 to vector<9x128xf32>
    %198 = arith.addf %197, %194 : vector<9x128xf32>
    %199 = arith.mulf %196, %198 : vector<9x128xf32>
    %c0_94 = arith.constant 0 : index
    %c0_95 = arith.constant 0 : index
    %c0_96 = arith.constant 0 : index
    %200 = vector.load %arg14[%c0_94, %c0_95, %c0_96] : memref<2x128x32xf32, #tpu.memory_space<vmem>>, vector<1x128x32xf32>
    %201 = vector.shape_cast %200 : vector<1x128x32xf32> to vector<128x32xf32>
    %cst_97 = arith.constant dense<0.000000e+00> : vector<9x32xf32>
    %202 = tpu.matmul %199, %201, %cst_97 {dimension_numbers = #tpu.dot_dimension_numbers<[1], [0], [0], [1], [0, 0, 1, 1], [], []>} : vector<9x128xf32>, vector<128x32xf32>, vector<9x32xf32> -> vector<9x32xf32>
    %203 = arith.addf %126, %202 : vector<9x32xf32>
    %c0_98 = arith.constant 0 : index
    %c0_99 = arith.constant 0 : index
    %c0_100 = arith.constant 0 : index
    %204 = vector.load %arg15[%c0_98, %c0_99, %c0_100] : memref<2x1x32xf32, #tpu.memory_space<vmem>>, vector<1x1x32xf32>
    %205 = vector.shape_cast %204 : vector<1x1x32xf32> to vector<1x32xf32>
    %206 = vector.broadcast %205 : vector<1x32xf32> to vector<9x32xf32>
    %207 = arith.addf %203, %206 : vector<9x32xf32>
    %c1_101 = arith.constant 1 : index
    %c0_102 = arith.constant 0 : index
    %c0_103 = arith.constant 0 : index
    %208 = vector.load %arg4[%c1_101, %c0_102, %c0_103] : memref<2x1x32xf32, #tpu.memory_space<vmem>>, vector<1x1x32xf32>
    %209 = vector.shape_cast %208 : vector<1x1x32xf32> to vector<1x32xf32>
    %c1_104 = arith.constant 1 : index
    %c0_105 = arith.constant 0 : index
    %c0_106 = arith.constant 0 : index
    %210 = vector.load %arg5[%c1_104, %c0_105, %c0_106] : memref<2x1x32xf32, #tpu.memory_space<vmem>>, vector<1x1x32xf32>
    %211 = vector.shape_cast %210 : vector<1x1x32xf32> to vector<1x32xf32>
    %cst_107 = arith.constant dense<0.000000e+00> : vector<9xf32>
    %212 = vector.multi_reduction <add>, %207, %cst_107 [1] : vector<9x32xf32> to vector<9xf32>
    %213 = vector.shape_cast %212 : vector<9xf32> to vector<9x1xf32>
    %cst_108 = arith.constant 3.200000e+01 : f32
    %214 = vector.broadcast %cst_108 : f32 to vector<9x1xf32>
    %215 = arith.divf %213, %214 : vector<9x1xf32>
    %216 = vector.broadcast %215 : vector<9x1xf32> to vector<9x32xf32>
    %217 = arith.subf %207, %216 : vector<9x32xf32>
    %218 = arith.mulf %217, %217 : vector<9x32xf32>
    %cst_109 = arith.constant dense<0.000000e+00> : vector<9xf32>
    %219 = vector.multi_reduction <add>, %218, %cst_109 [1] : vector<9x32xf32> to vector<9xf32>
    %220 = vector.shape_cast %219 : vector<9xf32> to vector<9x1xf32>
    %cst_110 = arith.constant 3.200000e+01 : f32
    %221 = vector.broadcast %cst_110 : f32 to vector<9x1xf32>
    %222 = arith.divf %220, %221 : vector<9x1xf32>
    %223 = vector.broadcast %215 : vector<9x1xf32> to vector<9x32xf32>
    %224 = arith.subf %207, %223 : vector<9x32xf32>
    %cst_111 = arith.constant 9.99999974E-6 : f32
    %225 = vector.broadcast %cst_111 : f32 to vector<9x1xf32>
    %226 = arith.addf %222, %225 : vector<9x1xf32>
    %227 = math.rsqrt %226 : vector<9x1xf32>
    %228 = vector.broadcast %227 : vector<9x1xf32> to vector<9x32xf32>
    %229 = arith.mulf %224, %228 : vector<9x32xf32>
    %230 = vector.broadcast %209 : vector<1x32xf32> to vector<9x32xf32>
    %231 = arith.mulf %229, %230 : vector<9x32xf32>
    %232 = vector.broadcast %211 : vector<1x32xf32> to vector<9x32xf32>
    %233 = arith.addf %231, %232 : vector<9x32xf32>
    %c1_112 = arith.constant 1 : index
    %c0_113 = arith.constant 0 : index
    %c0_114 = arith.constant 0 : index
    %234 = vector.load %arg6[%c1_112, %c0_113, %c0_114] : memref<2x32x96xf32, #tpu.memory_space<vmem>>, vector<1x32x96xf32>
    %235 = vector.shape_cast %234 : vector<1x32x96xf32> to vector<32x96xf32>
    %cst_115 = arith.constant dense<0.000000e+00> : vector<9x96xf32>
    %236 = tpu.matmul %233, %235, %cst_115 {dimension_numbers = #tpu.dot_dimension_numbers<[1], [0], [0], [1], [0, 0, 1, 1], [], []>} : vector<9x32xf32>, vector<32x96xf32>, vector<9x96xf32> -> vector<9x96xf32>
    %c1_116 = arith.constant 1 : index
    %c0_117 = arith.constant 0 : index
    %c0_118 = arith.constant 0 : index
    %237 = vector.load %arg7[%c1_116, %c0_117, %c0_118] : memref<2x1x96xf32, #tpu.memory_space<vmem>>, vector<1x1x96xf32>
    %238 = vector.shape_cast %237 : vector<1x1x96xf32> to vector<1x96xf32>
    %239 = vector.broadcast %238 : vector<1x96xf32> to vector<9x96xf32>
    %240 = arith.addf %236, %239 : vector<9x96xf32>
    %241 = vector.extract_strided_slice %240 {offsets = [0, 0], sizes = [9, 32], strides = [1, 1]} : vector<9x96xf32> to vector<9x32xf32>
    %242 = vector.extract_strided_slice %240 {offsets = [0, 32], sizes = [9, 32], strides = [1, 1]} : vector<9x96xf32> to vector<9x32xf32>
    %243 = vector.extract_strided_slice %240 {offsets = [0, 64], sizes = [9, 32], strides = [1, 1]} : vector<9x96xf32> to vector<9x32xf32>
    %244 = vector.extract_strided_slice %241 {offsets = [0, 0], sizes = [9, 8], strides = [1, 1]} : vector<9x32xf32> to vector<9x8xf32>
    %245 = vector.extract_strided_slice %242 {offsets = [0, 0], sizes = [9, 8], strides = [1, 1]} : vector<9x32xf32> to vector<9x8xf32>
    %246 = vector.extract_strided_slice %243 {offsets = [0, 0], sizes = [9, 8], strides = [1, 1]} : vector<9x32xf32> to vector<9x8xf32>
    %cst_119 = arith.constant dense<0.000000e+00> : vector<9x9xf32>
    %247 = tpu.matmul %244, %245, %cst_119 {dimension_numbers = #tpu.dot_dimension_numbers<[1], [1], [0], [0], [0, 0, 1, 0], [], []>} : vector<9x8xf32>, vector<9x8xf32>, vector<9x9xf32> -> vector<9x9xf32>
    %cst_120 = arith.constant 0.353553385 : f32
    %248 = vector.broadcast %cst_120 : f32 to vector<9x9xf32>
    %249 = arith.mulf %247, %248 : vector<9x9xf32>
    %cst_121 = arith.constant dense<0xFF800000> : vector<9xf32>
    %250 = vector.multi_reduction <maximumf>, %249, %cst_121 [1] : vector<9x9xf32> to vector<9xf32>
    %251 = vector.shape_cast %250 : vector<9xf32> to vector<9x1xf32>
    %252 = vector.broadcast %251 : vector<9x1xf32> to vector<9x9xf32>
    %253 = arith.subf %249, %252 : vector<9x9xf32>
    %254 = math.exp %253 : vector<9x9xf32>
    %cst_122 = arith.constant dense<0.000000e+00> : vector<9xf32>
    %255 = vector.multi_reduction <add>, %254, %cst_122 [1] : vector<9x9xf32> to vector<9xf32>
    %256 = vector.shape_cast %255 : vector<9xf32> to vector<9x1xf32>
    %257 = vector.broadcast %256 : vector<9x1xf32> to vector<9x9xf32>
    %258 = arith.divf %254, %257 : vector<9x9xf32>
    %cst_123 = arith.constant dense<0.000000e+00> : vector<9x8xf32>
    %259 = tpu.matmul %258, %246, %cst_123 {dimension_numbers = #tpu.dot_dimension_numbers<[1], [0], [0], [1], [0, 0, 1, 1], [], []>} : vector<9x9xf32>, vector<9x8xf32>, vector<9x8xf32> -> vector<9x8xf32>
    %c4 = arith.constant 4 : index
    %c0_124 = arith.constant 0 : index
    %c0_125 = arith.constant 0 : index
    %260 = vector.load %arg8[%c4, %c0_124, %c0_125] : memref<8x8x32xf32, #tpu.memory_space<vmem>>, vector<1x8x32xf32>
    %261 = vector.shape_cast %260 : vector<1x8x32xf32> to vector<8x32xf32>
    %cst_126 = arith.constant dense<0.000000e+00> : vector<9x32xf32>
    %262 = tpu.matmul %259, %261, %cst_126 {dimension_numbers = #tpu.dot_dimension_numbers<[1], [0], [0], [1], [0, 0, 1, 1], [], []>} : vector<9x8xf32>, vector<8x32xf32>, vector<9x32xf32> -> vector<9x32xf32>
    %263 = vector.extract_strided_slice %241 {offsets = [0, 8], sizes = [9, 8], strides = [1, 1]} : vector<9x32xf32> to vector<9x8xf32>
    %264 = vector.extract_strided_slice %242 {offsets = [0, 8], sizes = [9, 8], strides = [1, 1]} : vector<9x32xf32> to vector<9x8xf32>
    %265 = vector.extract_strided_slice %243 {offsets = [0, 8], sizes = [9, 8], strides = [1, 1]} : vector<9x32xf32> to vector<9x8xf32>
    %cst_127 = arith.constant dense<0.000000e+00> : vector<9x9xf32>
    %266 = tpu.matmul %263, %264, %cst_127 {dimension_numbers = #tpu.dot_dimension_numbers<[1], [1], [0], [0], [0, 0, 1, 0], [], []>} : vector<9x8xf32>, vector<9x8xf32>, vector<9x9xf32> -> vector<9x9xf32>
    %cst_128 = arith.constant 0.353553385 : f32
    %267 = vector.broadcast %cst_128 : f32 to vector<9x9xf32>
    %268 = arith.mulf %266, %267 : vector<9x9xf32>
    %cst_129 = arith.constant dense<0xFF800000> : vector<9xf32>
    %269 = vector.multi_reduction <maximumf>, %268, %cst_129 [1] : vector<9x9xf32> to vector<9xf32>
    %270 = vector.shape_cast %269 : vector<9xf32> to vector<9x1xf32>
    %271 = vector.broadcast %270 : vector<9x1xf32> to vector<9x9xf32>
    %272 = arith.subf %268, %271 : vector<9x9xf32>
    %273 = math.exp %272 : vector<9x9xf32>
    %cst_130 = arith.constant dense<0.000000e+00> : vector<9xf32>
    %274 = vector.multi_reduction <add>, %273, %cst_130 [1] : vector<9x9xf32> to vector<9xf32>
    %275 = vector.shape_cast %274 : vector<9xf32> to vector<9x1xf32>
    %276 = vector.broadcast %275 : vector<9x1xf32> to vector<9x9xf32>
    %277 = arith.divf %273, %276 : vector<9x9xf32>
    %cst_131 = arith.constant dense<0.000000e+00> : vector<9x8xf32>
    %278 = tpu.matmul %277, %265, %cst_131 {dimension_numbers = #tpu.dot_dimension_numbers<[1], [0], [0], [1], [0, 0, 1, 1], [], []>} : vector<9x9xf32>, vector<9x8xf32>, vector<9x8xf32> -> vector<9x8xf32>
    %c5 = arith.constant 5 : index
    %c0_132 = arith.constant 0 : index
    %c0_133 = arith.constant 0 : index
    %279 = vector.load %arg8[%c5, %c0_132, %c0_133] : memref<8x8x32xf32, #tpu.memory_space<vmem>>, vector<1x8x32xf32>
    %280 = vector.shape_cast %279 : vector<1x8x32xf32> to vector<8x32xf32>
    %cst_134 = arith.constant dense<0.000000e+00> : vector<9x32xf32>
    %281 = tpu.matmul %278, %280, %cst_134 {dimension_numbers = #tpu.dot_dimension_numbers<[1], [0], [0], [1], [0, 0, 1, 1], [], []>} : vector<9x8xf32>, vector<8x32xf32>, vector<9x32xf32> -> vector<9x32xf32>
    %282 = arith.addf %262, %281 : vector<9x32xf32>
    %283 = vector.extract_strided_slice %241 {offsets = [0, 16], sizes = [9, 8], strides = [1, 1]} : vector<9x32xf32> to vector<9x8xf32>
    %284 = vector.extract_strided_slice %242 {offsets = [0, 16], sizes = [9, 8], strides = [1, 1]} : vector<9x32xf32> to vector<9x8xf32>
    %285 = vector.extract_strided_slice %243 {offsets = [0, 16], sizes = [9, 8], strides = [1, 1]} : vector<9x32xf32> to vector<9x8xf32>
    %cst_135 = arith.constant dense<0.000000e+00> : vector<9x9xf32>
    %286 = tpu.matmul %283, %284, %cst_135 {dimension_numbers = #tpu.dot_dimension_numbers<[1], [1], [0], [0], [0, 0, 1, 0], [], []>} : vector<9x8xf32>, vector<9x8xf32>, vector<9x9xf32> -> vector<9x9xf32>
    %cst_136 = arith.constant 0.353553385 : f32
    %287 = vector.broadcast %cst_136 : f32 to vector<9x9xf32>
    %288 = arith.mulf %286, %287 : vector<9x9xf32>
    %cst_137 = arith.constant dense<0xFF800000> : vector<9xf32>
    %289 = vector.multi_reduction <maximumf>, %288, %cst_137 [1] : vector<9x9xf32> to vector<9xf32>
    %290 = vector.shape_cast %289 : vector<9xf32> to vector<9x1xf32>
    %291 = vector.broadcast %290 : vector<9x1xf32> to vector<9x9xf32>
    %292 = arith.subf %288, %291 : vector<9x9xf32>
    %293 = math.exp %292 : vector<9x9xf32>
    %cst_138 = arith.constant dense<0.000000e+00> : vector<9xf32>
    %294 = vector.multi_reduction <add>, %293, %cst_138 [1] : vector<9x9xf32> to vector<9xf32>
    %295 = vector.shape_cast %294 : vector<9xf32> to vector<9x1xf32>
    %296 = vector.broadcast %295 : vector<9x1xf32> to vector<9x9xf32>
    %297 = arith.divf %293, %296 : vector<9x9xf32>
    %cst_139 = arith.constant dense<0.000000e+00> : vector<9x8xf32>
    %298 = tpu.matmul %297, %285, %cst_139 {dimension_numbers = #tpu.dot_dimension_numbers<[1], [0], [0], [1], [0, 0, 1, 1], [], []>} : vector<9x9xf32>, vector<9x8xf32>, vector<9x8xf32> -> vector<9x8xf32>
    %c6 = arith.constant 6 : index
    %c0_140 = arith.constant 0 : index
    %c0_141 = arith.constant 0 : index
    %299 = vector.load %arg8[%c6, %c0_140, %c0_141] : memref<8x8x32xf32, #tpu.memory_space<vmem>>, vector<1x8x32xf32>
    %300 = vector.shape_cast %299 : vector<1x8x32xf32> to vector<8x32xf32>
    %cst_142 = arith.constant dense<0.000000e+00> : vector<9x32xf32>
    %301 = tpu.matmul %298, %300, %cst_142 {dimension_numbers = #tpu.dot_dimension_numbers<[1], [0], [0], [1], [0, 0, 1, 1], [], []>} : vector<9x8xf32>, vector<8x32xf32>, vector<9x32xf32> -> vector<9x32xf32>
    %302 = arith.addf %282, %301 : vector<9x32xf32>
    %303 = vector.extract_strided_slice %241 {offsets = [0, 24], sizes = [9, 8], strides = [1, 1]} : vector<9x32xf32> to vector<9x8xf32>
    %304 = vector.extract_strided_slice %242 {offsets = [0, 24], sizes = [9, 8], strides = [1, 1]} : vector<9x32xf32> to vector<9x8xf32>
    %305 = vector.extract_strided_slice %243 {offsets = [0, 24], sizes = [9, 8], strides = [1, 1]} : vector<9x32xf32> to vector<9x8xf32>
    %cst_143 = arith.constant dense<0.000000e+00> : vector<9x9xf32>
    %306 = tpu.matmul %303, %304, %cst_143 {dimension_numbers = #tpu.dot_dimension_numbers<[1], [1], [0], [0], [0, 0, 1, 0], [], []>} : vector<9x8xf32>, vector<9x8xf32>, vector<9x9xf32> -> vector<9x9xf32>
    %cst_144 = arith.constant 0.353553385 : f32
    %307 = vector.broadcast %cst_144 : f32 to vector<9x9xf32>
    %308 = arith.mulf %306, %307 : vector<9x9xf32>
    %cst_145 = arith.constant dense<0xFF800000> : vector<9xf32>
    %309 = vector.multi_reduction <maximumf>, %308, %cst_145 [1] : vector<9x9xf32> to vector<9xf32>
    %310 = vector.shape_cast %309 : vector<9xf32> to vector<9x1xf32>
    %311 = vector.broadcast %310 : vector<9x1xf32> to vector<9x9xf32>
    %312 = arith.subf %308, %311 : vector<9x9xf32>
    %313 = math.exp %312 : vector<9x9xf32>
    %cst_146 = arith.constant dense<0.000000e+00> : vector<9xf32>
    %314 = vector.multi_reduction <add>, %313, %cst_146 [1] : vector<9x9xf32> to vector<9xf32>
    %315 = vector.shape_cast %314 : vector<9xf32> to vector<9x1xf32>
    %316 = vector.broadcast %315 : vector<9x1xf32> to vector<9x9xf32>
    %317 = arith.divf %313, %316 : vector<9x9xf32>
    %cst_147 = arith.constant dense<0.000000e+00> : vector<9x8xf32>
    %318 = tpu.matmul %317, %305, %cst_147 {dimension_numbers = #tpu.dot_dimension_numbers<[1], [0], [0], [1], [0, 0, 1, 1], [], []>} : vector<9x9xf32>, vector<9x8xf32>, vector<9x8xf32> -> vector<9x8xf32>
    %c7 = arith.constant 7 : index
    %c0_148 = arith.constant 0 : index
    %c0_149 = arith.constant 0 : index
    %319 = vector.load %arg8[%c7, %c0_148, %c0_149] : memref<8x8x32xf32, #tpu.memory_space<vmem>>, vector<1x8x32xf32>
    %320 = vector.shape_cast %319 : vector<1x8x32xf32> to vector<8x32xf32>
    %cst_150 = arith.constant dense<0.000000e+00> : vector<9x32xf32>
    %321 = tpu.matmul %318, %320, %cst_150 {dimension_numbers = #tpu.dot_dimension_numbers<[1], [0], [0], [1], [0, 0, 1, 1], [], []>} : vector<9x8xf32>, vector<8x32xf32>, vector<9x32xf32> -> vector<9x32xf32>
    %322 = arith.addf %302, %321 : vector<9x32xf32>
    %323 = arith.addf %207, %322 : vector<9x32xf32>
    %c1_151 = arith.constant 1 : index
    %c0_152 = arith.constant 0 : index
    %c0_153 = arith.constant 0 : index
    %324 = vector.load %arg9[%c1_151, %c0_152, %c0_153] : memref<2x1x32xf32, #tpu.memory_space<vmem>>, vector<1x1x32xf32>
    %325 = vector.shape_cast %324 : vector<1x1x32xf32> to vector<1x32xf32>
    %326 = vector.broadcast %325 : vector<1x32xf32> to vector<9x32xf32>
    %327 = arith.addf %323, %326 : vector<9x32xf32>
    %c1_154 = arith.constant 1 : index
    %c0_155 = arith.constant 0 : index
    %c0_156 = arith.constant 0 : index
    %328 = vector.load %arg10[%c1_154, %c0_155, %c0_156] : memref<2x1x32xf32, #tpu.memory_space<vmem>>, vector<1x1x32xf32>
    %329 = vector.shape_cast %328 : vector<1x1x32xf32> to vector<1x32xf32>
    %c1_157 = arith.constant 1 : index
    %c0_158 = arith.constant 0 : index
    %c0_159 = arith.constant 0 : index
    %330 = vector.load %arg11[%c1_157, %c0_158, %c0_159] : memref<2x1x32xf32, #tpu.memory_space<vmem>>, vector<1x1x32xf32>
    %331 = vector.shape_cast %330 : vector<1x1x32xf32> to vector<1x32xf32>
    %cst_160 = arith.constant dense<0.000000e+00> : vector<9xf32>
    %332 = vector.multi_reduction <add>, %327, %cst_160 [1] : vector<9x32xf32> to vector<9xf32>
    %333 = vector.shape_cast %332 : vector<9xf32> to vector<9x1xf32>
    %cst_161 = arith.constant 3.200000e+01 : f32
    %334 = vector.broadcast %cst_161 : f32 to vector<9x1xf32>
    %335 = arith.divf %333, %334 : vector<9x1xf32>
    %336 = vector.broadcast %335 : vector<9x1xf32> to vector<9x32xf32>
    %337 = arith.subf %327, %336 : vector<9x32xf32>
    %338 = arith.mulf %337, %337 : vector<9x32xf32>
    %cst_162 = arith.constant dense<0.000000e+00> : vector<9xf32>
    %339 = vector.multi_reduction <add>, %338, %cst_162 [1] : vector<9x32xf32> to vector<9xf32>
    %340 = vector.shape_cast %339 : vector<9xf32> to vector<9x1xf32>
    %cst_163 = arith.constant 3.200000e+01 : f32
    %341 = vector.broadcast %cst_163 : f32 to vector<9x1xf32>
    %342 = arith.divf %340, %341 : vector<9x1xf32>
    %343 = vector.broadcast %335 : vector<9x1xf32> to vector<9x32xf32>
    %344 = arith.subf %327, %343 : vector<9x32xf32>
    %cst_164 = arith.constant 9.99999974E-6 : f32
    %345 = vector.broadcast %cst_164 : f32 to vector<9x1xf32>
    %346 = arith.addf %342, %345 : vector<9x1xf32>
    %347 = math.rsqrt %346 : vector<9x1xf32>
    %348 = vector.broadcast %347 : vector<9x1xf32> to vector<9x32xf32>
    %349 = arith.mulf %344, %348 : vector<9x32xf32>
    %350 = vector.broadcast %329 : vector<1x32xf32> to vector<9x32xf32>
    %351 = arith.mulf %349, %350 : vector<9x32xf32>
    %352 = vector.broadcast %331 : vector<1x32xf32> to vector<9x32xf32>
    %353 = arith.addf %351, %352 : vector<9x32xf32>
    %c1_165 = arith.constant 1 : index
    %c0_166 = arith.constant 0 : index
    %c0_167 = arith.constant 0 : index
    %354 = vector.load %arg12[%c1_165, %c0_166, %c0_167] : memref<2x32x128xf32, #tpu.memory_space<vmem>>, vector<1x32x128xf32>
    %355 = vector.shape_cast %354 : vector<1x32x128xf32> to vector<32x128xf32>
    %cst_168 = arith.constant dense<0.000000e+00> : vector<9x128xf32>
    %356 = tpu.matmul %353, %355, %cst_168 {dimension_numbers = #tpu.dot_dimension_numbers<[1], [0], [0], [1], [0, 0, 1, 1], [], []>} : vector<9x32xf32>, vector<32x128xf32>, vector<9x128xf32> -> vector<9x128xf32>
    %c1_169 = arith.constant 1 : index
    %c0_170 = arith.constant 0 : index
    %c0_171 = arith.constant 0 : index
    %357 = vector.load %arg13[%c1_169, %c0_170, %c0_171] : memref<2x1x128xf32, #tpu.memory_space<vmem>>, vector<1x1x128xf32>
    %358 = vector.shape_cast %357 : vector<1x1x128xf32> to vector<1x128xf32>
    %359 = vector.broadcast %358 : vector<1x128xf32> to vector<9x128xf32>
    %360 = arith.addf %356, %359 : vector<9x128xf32>
    %cst_172 = arith.constant 0.707106769 : f32
    %361 = vector.broadcast %cst_172 : f32 to vector<9x128xf32>
    %362 = arith.mulf %360, %361 : vector<9x128xf32>
    %363 = math.absf %362 : vector<9x128xf32>
    %cst_173 = arith.constant 0.327591091 : f32
    %364 = vector.broadcast %cst_173 : f32 to vector<9x128xf32>
    %365 = arith.mulf %364, %363 : vector<9x128xf32>
    %cst_174 = arith.constant 1.000000e+00 : f32
    %366 = vector.broadcast %cst_174 : f32 to vector<9x128xf32>
    %367 = arith.addf %366, %365 : vector<9x128xf32>
    %cst_175 = arith.constant 1.000000e+00 : f32
    %368 = vector.broadcast %cst_175 : f32 to vector<9x128xf32>
    %369 = arith.divf %368, %367 : vector<9x128xf32>
    %cst_176 = arith.constant 1.06140542 : f32
    %370 = vector.broadcast %cst_176 : f32 to vector<9x128xf32>
    %371 = arith.mulf %370, %369 : vector<9x128xf32>
    %cst_177 = arith.constant 1.45315206 : f32
    %372 = vector.broadcast %cst_177 : f32 to vector<9x128xf32>
    %373 = arith.subf %371, %372 : vector<9x128xf32>
    %374 = arith.mulf %373, %369 : vector<9x128xf32>
    %cst_178 = arith.constant 1.42141378 : f32
    %375 = vector.broadcast %cst_178 : f32 to vector<9x128xf32>
    %376 = arith.addf %374, %375 : vector<9x128xf32>
    %377 = arith.mulf %376, %369 : vector<9x128xf32>
    %cst_179 = arith.constant 0.284496725 : f32
    %378 = vector.broadcast %cst_179 : f32 to vector<9x128xf32>
    %379 = arith.subf %377, %378 : vector<9x128xf32>
    %380 = arith.mulf %379, %369 : vector<9x128xf32>
    %cst_180 = arith.constant 0.254829586 : f32
    %381 = vector.broadcast %cst_180 : f32 to vector<9x128xf32>
    %382 = arith.addf %380, %381 : vector<9x128xf32>
    %383 = arith.mulf %382, %369 : vector<9x128xf32>
    %cst_181 = arith.constant 0.000000e+00 : f32
    %384 = vector.broadcast %cst_181 : f32 to vector<9x128xf32>
    %385 = arith.subf %384, %363 : vector<9x128xf32>
    %386 = arith.mulf %385, %363 : vector<9x128xf32>
    %387 = math.exp %386 : vector<9x128xf32>
    %388 = arith.mulf %383, %387 : vector<9x128xf32>
    %cst_182 = arith.constant 1.000000e+00 : f32
    %389 = vector.broadcast %cst_182 : f32 to vector<9x128xf32>
    %390 = arith.subf %389, %388 : vector<9x128xf32>
    %cst_183 = arith.constant 0.000000e+00 : f32
    %391 = vector.broadcast %cst_183 : f32 to vector<9x128xf32>
    %392 = arith.cmpf olt, %362, %391 : vector<9x128xf32>
    %cst_184 = arith.constant 0.000000e+00 : f32
    %393 = vector.broadcast %cst_184 : f32 to vector<9x128xf32>
    %394 = arith.subf %393, %390 : vector<9x128xf32>
    %395 = arith.select %392, %394, %390 : vector<9x128xi1>, vector<9x128xf32>
    %cst_185 = arith.constant 5.000000e-01 : f32
    %396 = vector.broadcast %cst_185 : f32 to vector<9x128xf32>
    %397 = arith.mulf %360, %396 : vector<9x128xf32>
    %cst_186 = arith.constant 1.000000e+00 : f32
    %398 = vector.broadcast %cst_186 : f32 to vector<9x128xf32>
    %399 = arith.addf %398, %395 : vector<9x128xf32>
    %400 = arith.mulf %397, %399 : vector<9x128xf32>
    %c1_187 = arith.constant 1 : index
    %c0_188 = arith.constant 0 : index
    %c0_189 = arith.constant 0 : index
    %401 = vector.load %arg14[%c1_187, %c0_188, %c0_189] : memref<2x128x32xf32, #tpu.memory_space<vmem>>, vector<1x128x32xf32>
    %402 = vector.shape_cast %401 : vector<1x128x32xf32> to vector<128x32xf32>
    %cst_190 = arith.constant dense<0.000000e+00> : vector<9x32xf32>
    %403 = tpu.matmul %400, %402, %cst_190 {dimension_numbers = #tpu.dot_dimension_numbers<[1], [0], [0], [1], [0, 0, 1, 1], [], []>} : vector<9x128xf32>, vector<128x32xf32>, vector<9x32xf32> -> vector<9x32xf32>
    %404 = arith.addf %327, %403 : vector<9x32xf32>
    %c1_191 = arith.constant 1 : index
    %c0_192 = arith.constant 0 : index
    %c0_193 = arith.constant 0 : index
    %405 = vector.load %arg15[%c1_191, %c0_192, %c0_193] : memref<2x1x32xf32, #tpu.memory_space<vmem>>, vector<1x1x32xf32>
    %406 = vector.shape_cast %405 : vector<1x1x32xf32> to vector<1x32xf32>
    %407 = vector.broadcast %406 : vector<1x32xf32> to vector<9x32xf32>
    %408 = arith.addf %404, %407 : vector<9x32xf32>
    %c0_194 = arith.constant 0 : index
    %c0_195 = arith.constant 0 : index
    %409 = vector.load %arg16[%c0_194, %c0_195] : memref<1x32xf32, #tpu.memory_space<vmem>>, vector<1x32xf32>
    %c0_196 = arith.constant 0 : index
    %c0_197 = arith.constant 0 : index
    %410 = vector.load %arg17[%c0_196, %c0_197] : memref<1x32xf32, #tpu.memory_space<vmem>>, vector<1x32xf32>
    %cst_198 = arith.constant dense<0.000000e+00> : vector<9xf32>
    %411 = vector.multi_reduction <add>, %408, %cst_198 [1] : vector<9x32xf32> to vector<9xf32>
    %412 = vector.shape_cast %411 : vector<9xf32> to vector<9x1xf32>
    %cst_199 = arith.constant 3.200000e+01 : f32
    %413 = vector.broadcast %cst_199 : f32 to vector<9x1xf32>
    %414 = arith.divf %412, %413 : vector<9x1xf32>
    %415 = vector.broadcast %414 : vector<9x1xf32> to vector<9x32xf32>
    %416 = arith.subf %408, %415 : vector<9x32xf32>
    %417 = arith.mulf %416, %416 : vector<9x32xf32>
    %cst_200 = arith.constant dense<0.000000e+00> : vector<9xf32>
    %418 = vector.multi_reduction <add>, %417, %cst_200 [1] : vector<9x32xf32> to vector<9xf32>
    %419 = vector.shape_cast %418 : vector<9xf32> to vector<9x1xf32>
    %cst_201 = arith.constant 3.200000e+01 : f32
    %420 = vector.broadcast %cst_201 : f32 to vector<9x1xf32>
    %421 = arith.divf %419, %420 : vector<9x1xf32>
    %422 = vector.broadcast %414 : vector<9x1xf32> to vector<9x32xf32>
    %423 = arith.subf %408, %422 : vector<9x32xf32>
    %cst_202 = arith.constant 9.99999974E-6 : f32
    %424 = vector.broadcast %cst_202 : f32 to vector<9x1xf32>
    %425 = arith.addf %421, %424 : vector<9x1xf32>
    %426 = math.rsqrt %425 : vector<9x1xf32>
    %427 = vector.broadcast %426 : vector<9x1xf32> to vector<9x32xf32>
    %428 = arith.mulf %423, %427 : vector<9x32xf32>
    %429 = vector.broadcast %409 : vector<1x32xf32> to vector<9x32xf32>
    %430 = arith.mulf %428, %429 : vector<9x32xf32>
    %431 = vector.broadcast %410 : vector<1x32xf32> to vector<9x32xf32>
    %432 = arith.addf %430, %431 : vector<9x32xf32>
    %c0_203 = arith.constant 0 : index
    %c0_204 = arith.constant 0 : index
    %433 = vector.load %arg18[%c0_203, %c0_204] : memref<1x32xf32, #tpu.memory_space<vmem>>, vector<1x32xf32>
    %c0_205 = arith.constant 0 : index
    %c0_206 = arith.constant 0 : index
    %434 = vector.load %arg19[%c0_205, %c0_206] : memref<1x32xf32, #tpu.memory_space<vmem>>, vector<1x32xf32>
    %cst_207 = arith.constant dense<0.000000e+00> : vector<9xf32>
    %435 = vector.multi_reduction <add>, %432, %cst_207 [1] : vector<9x32xf32> to vector<9xf32>
    %436 = vector.shape_cast %435 : vector<9xf32> to vector<9x1xf32>
    %cst_208 = arith.constant 3.200000e+01 : f32
    %437 = vector.broadcast %cst_208 : f32 to vector<9x1xf32>
    %438 = arith.divf %436, %437 : vector<9x1xf32>
    %439 = vector.broadcast %438 : vector<9x1xf32> to vector<9x32xf32>
    %440 = arith.subf %432, %439 : vector<9x32xf32>
    %441 = arith.mulf %440, %440 : vector<9x32xf32>
    %cst_209 = arith.constant dense<0.000000e+00> : vector<9xf32>
    %442 = vector.multi_reduction <add>, %441, %cst_209 [1] : vector<9x32xf32> to vector<9xf32>
    %443 = vector.shape_cast %442 : vector<9xf32> to vector<9x1xf32>
    %cst_210 = arith.constant 3.200000e+01 : f32
    %444 = vector.broadcast %cst_210 : f32 to vector<9x1xf32>
    %445 = arith.divf %443, %444 : vector<9x1xf32>
    %446 = vector.broadcast %438 : vector<9x1xf32> to vector<9x32xf32>
    %447 = arith.subf %432, %446 : vector<9x32xf32>
    %cst_211 = arith.constant 9.99999974E-6 : f32
    %448 = vector.broadcast %cst_211 : f32 to vector<9x1xf32>
    %449 = arith.addf %445, %448 : vector<9x1xf32>
    %450 = math.rsqrt %449 : vector<9x1xf32>
    %451 = vector.broadcast %450 : vector<9x1xf32> to vector<9x32xf32>
    %452 = arith.mulf %447, %451 : vector<9x32xf32>
    %453 = vector.broadcast %433 : vector<1x32xf32> to vector<9x32xf32>
    %454 = arith.mulf %452, %453 : vector<9x32xf32>
    %455 = vector.broadcast %434 : vector<1x32xf32> to vector<9x32xf32>
    %456 = arith.addf %454, %455 : vector<9x32xf32>
    %457 = tpu.iota {dimensions = array<i32: 0>} : vector<9x1xi32>
    %c0_i32 = arith.constant 0 : i32
    %458 = vector.broadcast %c0_i32 : i32 to vector<9x1xi32>
    %459 = arith.cmpi eq, %457, %458 : vector<9x1xi32>
    %460 = vector.shape_cast %459 : vector<9x1xi1> to vector<9x1xi1>
    %461 = vector.broadcast %460 : vector<9x1xi1> to vector<9x32xi1>
    %462 = arith.select %461, %432, %456 : vector<9x32xi1>, vector<9x32xf32>
    %c0_212 = arith.constant 0 : index
    %c0_213 = arith.constant 0 : index
    %463 = vector.load %arg20[%c0_212, %c0_213] : memref<32x16xf32, #tpu.memory_space<vmem>>, vector<32x16xf32>
    %cst_214 = arith.constant dense<0.000000e+00> : vector<9x16xf32>
    %464 = tpu.matmul %462, %463, %cst_214 {dimension_numbers = #tpu.dot_dimension_numbers<[1], [0], [0], [1], [0, 0, 1, 1], [], []>} : vector<9x32xf32>, vector<32x16xf32>, vector<9x16xf32> -> vector<9x16xf32>
    %c0_215 = arith.constant 0 : index
    %c0_216 = arith.constant 0 : index
    %465 = vector.load %arg21[%c0_215, %c0_216] : memref<1x16xf32, #tpu.memory_space<vmem>>, vector<1x16xf32>
    %466 = vector.broadcast %465 : vector<1x16xf32> to vector<9x16xf32>
    %467 = arith.addf %464, %466 : vector<9x16xf32>
    %c0_217 = arith.constant 0 : index
    %c0_218 = arith.constant 0 : index
    %c0_219 = arith.constant 0 : index
    %468 = vector.load %arg22[%c0_217, %c0_218, %c0_219] : memref<1x9x16xf32, #tpu.memory_space<vmem>>, vector<1x9x16xf32>
    %469 = vector.shape_cast %468 : vector<1x9x16xf32> to vector<9x16xf32>
    %470 = vector.shape_cast %467 : vector<9x16xf32> to vector<1x9x16xf32>
    tpu.vector_store %arg22[%c0_217, %c0_218, %c0_219], %470 {strides = array<i32>} : memref<1x9x16xf32, #tpu.memory_space<vmem>>, vector<1x9x16xf32>,
    return
  }
  func.func @transform_0(%arg0: i32) -> (i32, i32, i32) {
    %c0_i32 = arith.constant 0 : i32
    %c0_i32_0 = arith.constant 0 : i32
    %c0_i32_1 = arith.constant 0 : i32
    return %arg0, %c0_i32, %c0_i32_0 : i32, i32, i32
  }
  func.func @transform_1(%arg0: i32) -> (i32, i32, i32) {
    %c0_i32 = arith.constant 0 : i32
    %c0_i32_0 = arith.constant 0 : i32
    %c0_i32_1 = arith.constant 0 : i32
    return %arg0, %c0_i32, %c0_i32_0 : i32, i32, i32
  }
  func.func @transform_2(%arg0: i32) -> (i32, i32) {
    %c0_i32 = arith.constant 0 : i32
    %c0_i32_0 = arith.constant 0 : i32
    %c0_i32_1 = arith.constant 0 : i32
    return %c0_i32, %c0_i32_0 : i32, i32
  }
  func.func @transform_3(%arg0: i32) -> (i32, i32, i32) {
    %c0_i32 = arith.constant 0 : i32
    %c0_i32_0 = arith.constant 0 : i32
    %c0_i32_1 = arith.constant 0 : i32
    %c0_i32_2 = arith.constant 0 : i32
    return %c0_i32, %c0_i32_0, %c0_i32_1 : i32, i32, i32
  }
  func.func @transform_4(%arg0: i32) -> (i32, i32, i32) {
    %c0_i32 = arith.constant 0 : i32
    %c0_i32_0 = arith.constant 0 : i32
    %c0_i32_1 = arith.constant 0 : i32
    %c0_i32_2 = arith.constant 0 : i32
    return %c0_i32, %c0_i32_0, %c0_i32_1 : i32, i32, i32
  }
  func.func @transform_5(%arg0: i32) -> (i32, i32, i32) {
    %c0_i32 = arith.constant 0 : i32
    %c0_i32_0 = arith.constant 0 : i32
    %c0_i32_1 = arith.constant 0 : i32
    %c0_i32_2 = arith.constant 0 : i32
    return %c0_i32, %c0_i32_0, %c0_i32_1 : i32, i32, i32
  }
  func.func @transform_6(%arg0: i32) -> (i32, i32, i32) {
    %c0_i32 = arith.constant 0 : i32
    %c0_i32_0 = arith.constant 0 : i32
    %c0_i32_1 = arith.constant 0 : i32
    %c0_i32_2 = arith.constant 0 : i32
    return %c0_i32, %c0_i32_0, %c0_i32_1 : i32, i32, i32
  }
  func.func @transform_7(%arg0: i32) -> (i32, i32, i32) {
    %c0_i32 = arith.constant 0 : i32
    %c0_i32_0 = arith.constant 0 : i32
    %c0_i32_1 = arith.constant 0 : i32
    %c0_i32_2 = arith.constant 0 : i32
    return %c0_i32, %c0_i32_0, %c0_i32_1 : i32, i32, i32
  }
  func.func @transform_8(%arg0: i32) -> (i32, i32, i32) {
    %c0_i32 = arith.constant 0 : i32
    %c0_i32_0 = arith.constant 0 : i32
    %c0_i32_1 = arith.constant 0 : i32
    %c0_i32_2 = arith.constant 0 : i32
    return %c0_i32, %c0_i32_0, %c0_i32_1 : i32, i32, i32
  }
  func.func @transform_9(%arg0: i32) -> (i32, i32, i32) {
    %c0_i32 = arith.constant 0 : i32
    %c0_i32_0 = arith.constant 0 : i32
    %c0_i32_1 = arith.constant 0 : i32
    %c0_i32_2 = arith.constant 0 : i32
    return %c0_i32, %c0_i32_0, %c0_i32_1 : i32, i32, i32
  }
  func.func @transform_10(%arg0: i32) -> (i32, i32, i32) {
    %c0_i32 = arith.constant 0 : i32
    %c0_i32_0 = arith.constant 0 : i32
    %c0_i32_1 = arith.constant 0 : i32
    %c0_i32_2 = arith.constant 0 : i32
    return %c0_i32, %c0_i32_0, %c0_i32_1 : i32, i32, i32
  }
  func.func @transform_11(%arg0: i32) -> (i32, i32, i32) {
    %c0_i32 = arith.constant 0 : i32
    %c0_i32_0 = arith.constant 0 : i32
    %c0_i32_1 = arith.constant 0 : i32
    %c0_i32_2 = arith.constant 0 : i32
    return %c0_i32, %c0_i32_0, %c0_i32_1 : i32, i32, i32
  }
  func.func @transform_12(%arg0: i32) -> (i32, i32, i32) {
    %c0_i32 = arith.constant 0 : i32
    %c0_i32_0 = arith.constant 0 : i32
    %c0_i32_1 = arith.constant 0 : i32
    %c0_i32_2 = arith.constant 0 : i32
    return %c0_i32, %c0_i32_0, %c0_i32_1 : i32, i32, i32
  }
  func.func @transform_13(%arg0: i32) -> (i32, i32, i32) {
    %c0_i32 = arith.constant 0 : i32
    %c0_i32_0 = arith.constant 0 : i32
    %c0_i32_1 = arith.constant 0 : i32
    %c0_i32_2 = arith.constant 0 : i32
    return %c0_i32, %c0_i32_0, %c0_i32_1 : i32, i32, i32
  }
  func.func @transform_14(%arg0: i32) -> (i32, i32, i32) {
    %c0_i32 = arith.constant 0 : i32
    %c0_i32_0 = arith.constant 0 : i32
    %c0_i32_1 = arith.constant 0 : i32
    %c0_i32_2 = arith.constant 0 : i32
    return %c0_i32, %c0_i32_0, %c0_i32_1 : i32, i32, i32
  }
  func.func @transform_15(%arg0: i32) -> (i32, i32) {
    %c0_i32 = arith.constant 0 : i32
    %c0_i32_0 = arith.constant 0 : i32
    %c0_i32_1 = arith.constant 0 : i32
    return %c0_i32, %c0_i32_0 : i32, i32
  }
  func.func @transform_16(%arg0: i32) -> (i32, i32) {
    %c0_i32 = arith.constant 0 : i32
    %c0_i32_0 = arith.constant 0 : i32
    %c0_i32_1 = arith.constant 0 : i32
    return %c0_i32, %c0_i32_0 : i32, i32
  }
  func.func @transform_17(%arg0: i32) -> (i32, i32) {
    %c0_i32 = arith.constant 0 : i32
    %c0_i32_0 = arith.constant 0 : i32
    %c0_i32_1 = arith.constant 0 : i32
    return %c0_i32, %c0_i32_0 : i32, i32
  }
  func.func @transform_18(%arg0: i32) -> (i32, i32) {
    %c0_i32 = arith.constant 0 : i32
    %c0_i32_0 = arith.constant 0 : i32
    %c0_i32_1 = arith.constant 0 : i32
    return %c0_i32, %c0_i32_0 : i32, i32
  }
  func.func @transform_19(%arg0: i32) -> (i32, i32) {
    %c0_i32 = arith.constant 0 : i32
    %c0_i32_0 = arith.constant 0 : i32
    %c0_i32_1 = arith.constant 0 : i32
    return %c0_i32, %c0_i32_0 : i32, i32
  }
  func.func @transform_20(%arg0: i32) -> (i32, i32) {
    %c0_i32 = arith.constant 0 : i32
    %c0_i32_0 = arith.constant 0 : i32
    %c0_i32_1 = arith.constant 0 : i32
    return %c0_i32, %c0_i32_0 : i32, i32
  }
  func.func @transform_21(%arg0: i32) -> (i32, i32, i32) {
    %c0_i32 = arith.constant 0 : i32
    %c0_i32_0 = arith.constant 0 : i32
    %c0_i32_1 = arith.constant 0 : i32
    return %arg0, %c0_i32, %c0_i32_0 : i32, i32, i32
  }
}

module attributes {stable_mosaic.version = 11 : i64} {
  func.func @_decoder_kernel(%arg0: i32, %arg1: memref<1x9x16xf32, #tpu.memory_space<vmem>>, %arg2: memref<1x8x16xf32, #tpu.memory_space<vmem>>, %arg3: memref<1x8x16xf32, #tpu.memory_space<vmem>>, %arg4: memref<1x1x16xf32, #tpu.memory_space<vmem>>, %arg5: memref<1x1x16xf32, #tpu.memory_space<vmem>>, %arg6: memref<1x1x16xf32, #tpu.memory_space<vmem>>, %arg7: memref<1x1x16xf32, #tpu.memory_space<vmem>>, %arg8: memref<1x16x16xf32, #tpu.memory_space<vmem>>, %arg9: memref<1x1x16xf32, #tpu.memory_space<vmem>>, %arg10: memref<1x16x32xf32, #tpu.memory_space<vmem>>, %arg11: memref<1x1x32xf32, #tpu.memory_space<vmem>>, %arg12: memref<2x8x16xf32, #tpu.memory_space<vmem>>, %arg13: memref<1x1x16xf32, #tpu.memory_space<vmem>>, %arg14: memref<1x1x16xf32, #tpu.memory_space<vmem>>, %arg15: memref<1x1x16xf32, #tpu.memory_space<vmem>>, %arg16: memref<1x16x64xf32, #tpu.memory_space<vmem>>, %arg17: memref<1x1x64xf32, #tpu.memory_space<vmem>>, %arg18: memref<1x64x16xf32, #tpu.memory_space<vmem>>, %arg19: memref<1x1x16xf32, #tpu.memory_space<vmem>>, %arg20: memref<1x16xf32, #tpu.memory_space<vmem>>, %arg21: memref<1x16xf32, #tpu.memory_space<vmem>>, %arg22: memref<16x16xf32, #tpu.memory_space<vmem>>, %arg23: memref<1x16xf32, #tpu.memory_space<vmem>>, %arg24: memref<1x8x16xf32, #tpu.memory_space<vmem>>, %arg25: memref<1x1x16xf32, #tpu.memory_space<vmem>>) attributes {dimension_semantics = [#tpu.dimension_semantics<parallel>], iteration_bounds = array<i64: 2>, scalar_prefetch = 0 : i64, scratch_operands = 0 : i64, tpu.core_type = #tpu.core_type<tc>, window_params = [{transform_indices = @transform_0, window_bounds = array<i64: 1, 9, 16>}, {transform_indices = @transform_1, window_bounds = array<i64: 1, 8, 16>}, {transform_indices = @transform_2, window_bounds = array<i64: 1, 8, 16>}, {pipeline_mode = #tpu.pipeline_mode<synchronous>, transform_indices = @transform_3, window_bounds = array<i64: 1, 1, 16>}, {pipeline_mode = #tpu.pipeline_mode<synchronous>, transform_indices = @transform_4, window_bounds = array<i64: 1, 1, 16>}, {pipeline_mode = #tpu.pipeline_mode<synchronous>, transform_indices = @transform_5, window_bounds = array<i64: 1, 1, 16>}, {pipeline_mode = #tpu.pipeline_mode<synchronous>, transform_indices = @transform_6, window_bounds = array<i64: 1, 1, 16>}, {pipeline_mode = #tpu.pipeline_mode<synchronous>, transform_indices = @transform_7, window_bounds = array<i64: 1, 16, 16>}, {pipeline_mode = #tpu.pipeline_mode<synchronous>, transform_indices = @transform_8, window_bounds = array<i64: 1, 1, 16>}, {pipeline_mode = #tpu.pipeline_mode<synchronous>, transform_indices = @transform_9, window_bounds = array<i64: 1, 16, 32>}, {pipeline_mode = #tpu.pipeline_mode<synchronous>, transform_indices = @transform_10, window_bounds = array<i64: 1, 1, 32>}, {pipeline_mode = #tpu.pipeline_mode<synchronous>, transform_indices = @transform_11, window_bounds = array<i64: 2, 8, 16>}, {pipeline_mode = #tpu.pipeline_mode<synchronous>, transform_indices = @transform_12, window_bounds = array<i64: 1, 1, 16>}, {pipeline_mode = #tpu.pipeline_mode<synchronous>, transform_indices = @transform_13, window_bounds = array<i64: 1, 1, 16>}, {pipeline_mode = #tpu.pipeline_mode<synchronous>, transform_indices = @transform_14, window_bounds = array<i64: 1, 1, 16>}, {pipeline_mode = #tpu.pipeline_mode<synchronous>, transform_indices = @transform_15, window_bounds = array<i64: 1, 16, 64>}, {pipeline_mode = #tpu.pipeline_mode<synchronous>, transform_indices = @transform_16, window_bounds = array<i64: 1, 1, 64>}, {pipeline_mode = #tpu.pipeline_mode<synchronous>, transform_indices = @transform_17, window_bounds = array<i64: 1, 64, 16>}, {pipeline_mode = #tpu.pipeline_mode<synchronous>, transform_indices = @transform_18, window_bounds = array<i64: 1, 1, 16>}, {pipeline_mode = #tpu.pipeline_mode<synchronous>, transform_indices = @transform_19, window_bounds = array<i64: 1, 16>}, {pipeline_mode = #tpu.pipeline_mode<synchronous>, transform_indices = @transform_20, window_bounds = array<i64: 1, 16>}, {pipeline_mode = #tpu.pipeline_mode<synchronous>, transform_indices = @transform_21, window_bounds = array<i64: 16, 16>}, {pipeline_mode = #tpu.pipeline_mode<synchronous>, transform_indices = @transform_22, window_bounds = array<i64: 1, 16>}, {transform_indices = @transform_23, window_bounds = array<i64: 1, 8, 16>}, {transform_indices = @transform_24, window_bounds = array<i64: 1, 1, 16>}]} {
    %c0 = arith.constant 0 : index
    %c0_0 = arith.constant 0 : index
    %c0_1 = arith.constant 0 : index
    %0 = vector.load %arg1[%c0, %c0_0, %c0_1] : memref<1x9x16xf32, #tpu.memory_space<vmem>>, vector<1x9x16xf32>
    %1 = vector.shape_cast %0 : vector<1x9x16xf32> to vector<9x16xf32>
    %c0_2 = arith.constant 0 : index
    %c0_3 = arith.constant 0 : index
    %c0_4 = arith.constant 0 : index
    %2 = vector.load %arg2[%c0_2, %c0_3, %c0_4] : memref<1x8x16xf32, #tpu.memory_space<vmem>>, vector<1x8x16xf32>
    %3 = vector.shape_cast %2 : vector<1x8x16xf32> to vector<8x16xf32>
    %c0_5 = arith.constant 0 : index
    %c0_6 = arith.constant 0 : index
    %c0_7 = arith.constant 0 : index
    %4 = vector.load %arg4[%c0_5, %c0_6, %c0_7] : memref<1x1x16xf32, #tpu.memory_space<vmem>>, vector<1x1x16xf32>
    %5 = vector.shape_cast %4 : vector<1x1x16xf32> to vector<1x16xf32>
    %c0_8 = arith.constant 0 : index
    %c0_9 = arith.constant 0 : index
    %c0_10 = arith.constant 0 : index
    %6 = vector.load %arg5[%c0_8, %c0_9, %c0_10] : memref<1x1x16xf32, #tpu.memory_space<vmem>>, vector<1x1x16xf32>
    %7 = vector.shape_cast %6 : vector<1x1x16xf32> to vector<1x16xf32>
    %cst = arith.constant dense<0.000000e+00> : vector<9xf32>
    %8 = vector.multi_reduction <add>, %1, %cst [1] : vector<9x16xf32> to vector<9xf32>
    %9 = vector.shape_cast %8 : vector<9xf32> to vector<9x1xf32>
    %cst_11 = arith.constant 1.600000e+01 : f32
    %10 = vector.broadcast %cst_11 : f32 to vector<9x1xf32>
    %11 = arith.divf %9, %10 : vector<9x1xf32>
    %12 = vector.broadcast %11 : vector<9x1xf32> to vector<9x16xf32>
    %13 = arith.subf %1, %12 : vector<9x16xf32>
    %14 = arith.mulf %13, %13 : vector<9x16xf32>
    %cst_12 = arith.constant dense<0.000000e+00> : vector<9xf32>
    %15 = vector.multi_reduction <add>, %14, %cst_12 [1] : vector<9x16xf32> to vector<9xf32>
    %16 = vector.shape_cast %15 : vector<9xf32> to vector<9x1xf32>
    %cst_13 = arith.constant 1.600000e+01 : f32
    %17 = vector.broadcast %cst_13 : f32 to vector<9x1xf32>
    %18 = arith.divf %16, %17 : vector<9x1xf32>
    %19 = vector.broadcast %11 : vector<9x1xf32> to vector<9x16xf32>
    %20 = arith.subf %1, %19 : vector<9x16xf32>
    %cst_14 = arith.constant 9.99999974E-6 : f32
    %21 = vector.broadcast %cst_14 : f32 to vector<9x1xf32>
    %22 = arith.addf %18, %21 : vector<9x1xf32>
    %23 = math.rsqrt %22 : vector<9x1xf32>
    %24 = vector.broadcast %23 : vector<9x1xf32> to vector<9x16xf32>
    %25 = arith.mulf %20, %24 : vector<9x16xf32>
    %26 = vector.broadcast %5 : vector<1x16xf32> to vector<9x16xf32>
    %27 = arith.mulf %25, %26 : vector<9x16xf32>
    %28 = vector.broadcast %7 : vector<1x16xf32> to vector<9x16xf32>
    %29 = arith.addf %27, %28 : vector<9x16xf32>
    %c0_15 = arith.constant 0 : index
    %c0_16 = arith.constant 0 : index
    %c0_17 = arith.constant 0 : index
    %30 = vector.load %arg6[%c0_15, %c0_16, %c0_17] : memref<1x1x16xf32, #tpu.memory_space<vmem>>, vector<1x1x16xf32>
    %31 = vector.shape_cast %30 : vector<1x1x16xf32> to vector<1x16xf32>
    %c0_18 = arith.constant 0 : index
    %c0_19 = arith.constant 0 : index
    %c0_20 = arith.constant 0 : index
    %32 = vector.load %arg7[%c0_18, %c0_19, %c0_20] : memref<1x1x16xf32, #tpu.memory_space<vmem>>, vector<1x1x16xf32>
    %33 = vector.shape_cast %32 : vector<1x1x16xf32> to vector<1x16xf32>
    %cst_21 = arith.constant dense<0.000000e+00> : vector<8xf32>
    %34 = vector.multi_reduction <add>, %3, %cst_21 [1] : vector<8x16xf32> to vector<8xf32>
    %35 = vector.shape_cast %34 : vector<8xf32> to vector<8x1xf32>
    %cst_22 = arith.constant 1.600000e+01 : f32
    %36 = vector.broadcast %cst_22 : f32 to vector<8x1xf32>
    %37 = arith.divf %35, %36 : vector<8x1xf32>
    %38 = vector.broadcast %37 : vector<8x1xf32> to vector<8x16xf32>
    %39 = arith.subf %3, %38 : vector<8x16xf32>
    %40 = arith.mulf %39, %39 : vector<8x16xf32>
    %cst_23 = arith.constant dense<0.000000e+00> : vector<8xf32>
    %41 = vector.multi_reduction <add>, %40, %cst_23 [1] : vector<8x16xf32> to vector<8xf32>
    %42 = vector.shape_cast %41 : vector<8xf32> to vector<8x1xf32>
    %cst_24 = arith.constant 1.600000e+01 : f32
    %43 = vector.broadcast %cst_24 : f32 to vector<8x1xf32>
    %44 = arith.divf %42, %43 : vector<8x1xf32>
    %45 = vector.broadcast %37 : vector<8x1xf32> to vector<8x16xf32>
    %46 = arith.subf %3, %45 : vector<8x16xf32>
    %cst_25 = arith.constant 9.99999974E-6 : f32
    %47 = vector.broadcast %cst_25 : f32 to vector<8x1xf32>
    %48 = arith.addf %44, %47 : vector<8x1xf32>
    %49 = math.rsqrt %48 : vector<8x1xf32>
    %50 = vector.broadcast %49 : vector<8x1xf32> to vector<8x16xf32>
    %51 = arith.mulf %46, %50 : vector<8x16xf32>
    %52 = vector.broadcast %31 : vector<1x16xf32> to vector<8x16xf32>
    %53 = arith.mulf %51, %52 : vector<8x16xf32>
    %54 = vector.broadcast %33 : vector<1x16xf32> to vector<8x16xf32>
    %55 = arith.addf %53, %54 : vector<8x16xf32>
    %c0_26 = arith.constant 0 : index
    %c0_27 = arith.constant 0 : index
    %c0_28 = arith.constant 0 : index
    %56 = vector.load %arg8[%c0_26, %c0_27, %c0_28] : memref<1x16x16xf32, #tpu.memory_space<vmem>>, vector<1x16x16xf32>
    %57 = vector.shape_cast %56 : vector<1x16x16xf32> to vector<16x16xf32>
    %cst_29 = arith.constant dense<0.000000e+00> : vector<9x16xf32>
    %58 = tpu.matmul %29, %57, %cst_29 {dimension_numbers = #tpu.dot_dimension_numbers<[1], [0], [0], [1], [0, 0, 1, 1], [], []>} : vector<9x16xf32>, vector<16x16xf32>, vector<9x16xf32> -> vector<9x16xf32>
    %c0_30 = arith.constant 0 : index
    %c0_31 = arith.constant 0 : index
    %c0_32 = arith.constant 0 : index
    %59 = vector.load %arg9[%c0_30, %c0_31, %c0_32] : memref<1x1x16xf32, #tpu.memory_space<vmem>>, vector<1x1x16xf32>
    %60 = vector.shape_cast %59 : vector<1x1x16xf32> to vector<1x16xf32>
    %61 = vector.broadcast %60 : vector<1x16xf32> to vector<9x16xf32>
    %62 = arith.addf %58, %61 : vector<9x16xf32>
    %c0_33 = arith.constant 0 : index
    %c0_34 = arith.constant 0 : index
    %c0_35 = arith.constant 0 : index
    %63 = vector.load %arg10[%c0_33, %c0_34, %c0_35] : memref<1x16x32xf32, #tpu.memory_space<vmem>>, vector<1x16x32xf32>
    %64 = vector.shape_cast %63 : vector<1x16x32xf32> to vector<16x32xf32>
    %cst_36 = arith.constant dense<0.000000e+00> : vector<8x32xf32>
    %65 = tpu.matmul %55, %64, %cst_36 {dimension_numbers = #tpu.dot_dimension_numbers<[1], [0], [0], [1], [0, 0, 1, 1], [], []>} : vector<8x16xf32>, vector<16x32xf32>, vector<8x32xf32> -> vector<8x32xf32>
    %c0_37 = arith.constant 0 : index
    %c0_38 = arith.constant 0 : index
    %c0_39 = arith.constant 0 : index
    %66 = vector.load %arg11[%c0_37, %c0_38, %c0_39] : memref<1x1x32xf32, #tpu.memory_space<vmem>>, vector<1x1x32xf32>
    %67 = vector.shape_cast %66 : vector<1x1x32xf32> to vector<1x32xf32>
    %68 = vector.broadcast %67 : vector<1x32xf32> to vector<8x32xf32>
    %69 = arith.addf %65, %68 : vector<8x32xf32>
    %70 = vector.extract_strided_slice %69 {offsets = [0, 0], sizes = [8, 16], strides = [1, 1]} : vector<8x32xf32> to vector<8x16xf32>
    %71 = vector.extract_strided_slice %69 {offsets = [0, 16], sizes = [8, 16], strides = [1, 1]} : vector<8x32xf32> to vector<8x16xf32>
    %72 = vector.extract_strided_slice %62 {offsets = [0, 0], sizes = [9, 8], strides = [1, 1]} : vector<9x16xf32> to vector<9x8xf32>
    %73 = vector.extract_strided_slice %70 {offsets = [0, 0], sizes = [8, 8], strides = [1, 1]} : vector<8x16xf32> to vector<8x8xf32>
    %74 = vector.extract_strided_slice %71 {offsets = [0, 0], sizes = [8, 8], strides = [1, 1]} : vector<8x16xf32> to vector<8x8xf32>
    %cst_40 = arith.constant dense<0.000000e+00> : vector<9x8xf32>
    %75 = tpu.matmul %72, %73, %cst_40 {dimension_numbers = #tpu.dot_dimension_numbers<[1], [1], [0], [0], [0, 0, 1, 0], [], []>} : vector<9x8xf32>, vector<8x8xf32>, vector<9x8xf32> -> vector<9x8xf32>
    %cst_41 = arith.constant 0.353553385 : f32
    %76 = vector.broadcast %cst_41 : f32 to vector<9x8xf32>
    %77 = arith.mulf %75, %76 : vector<9x8xf32>
    %cst_42 = arith.constant dense<0xFF800000> : vector<9xf32>
    %78 = vector.multi_reduction <maximumf>, %77, %cst_42 [1] : vector<9x8xf32> to vector<9xf32>
    %79 = vector.shape_cast %78 : vector<9xf32> to vector<9x1xf32>
    %80 = vector.broadcast %79 : vector<9x1xf32> to vector<9x8xf32>
    %81 = arith.subf %77, %80 : vector<9x8xf32>
    %82 = math.exp %81 : vector<9x8xf32>
    %cst_43 = arith.constant dense<0.000000e+00> : vector<9xf32>
    %83 = vector.multi_reduction <add>, %82, %cst_43 [1] : vector<9x8xf32> to vector<9xf32>
    %84 = vector.shape_cast %83 : vector<9xf32> to vector<9x1xf32>
    %85 = vector.broadcast %84 : vector<9x1xf32> to vector<9x8xf32>
    %86 = arith.divf %82, %85 : vector<9x8xf32>
    %cst_44 = arith.constant dense<0.000000e+00> : vector<9x8xf32>
    %87 = tpu.matmul %86, %74, %cst_44 {dimension_numbers = #tpu.dot_dimension_numbers<[1], [0], [0], [1], [0, 0, 1, 1], [], []>} : vector<9x8xf32>, vector<8x8xf32>, vector<9x8xf32> -> vector<9x8xf32>
    %c0_45 = arith.constant 0 : index
    %c0_46 = arith.constant 0 : index
    %c0_47 = arith.constant 0 : index
    %88 = vector.load %arg12[%c0_45, %c0_46, %c0_47] : memref<2x8x16xf32, #tpu.memory_space<vmem>>, vector<1x8x16xf32>
    %89 = vector.shape_cast %88 : vector<1x8x16xf32> to vector<8x16xf32>
    %cst_48 = arith.constant dense<0.000000e+00> : vector<9x16xf32>
    %90 = tpu.matmul %87, %89, %cst_48 {dimension_numbers = #tpu.dot_dimension_numbers<[1], [0], [0], [1], [0, 0, 1, 1], [], []>} : vector<9x8xf32>, vector<8x16xf32>, vector<9x16xf32> -> vector<9x16xf32>
    %91 = vector.extract_strided_slice %62 {offsets = [0, 8], sizes = [9, 8], strides = [1, 1]} : vector<9x16xf32> to vector<9x8xf32>
    %92 = vector.extract_strided_slice %70 {offsets = [0, 8], sizes = [8, 8], strides = [1, 1]} : vector<8x16xf32> to vector<8x8xf32>
    %93 = vector.extract_strided_slice %71 {offsets = [0, 8], sizes = [8, 8], strides = [1, 1]} : vector<8x16xf32> to vector<8x8xf32>
    %cst_49 = arith.constant dense<0.000000e+00> : vector<9x8xf32>
    %94 = tpu.matmul %91, %92, %cst_49 {dimension_numbers = #tpu.dot_dimension_numbers<[1], [1], [0], [0], [0, 0, 1, 0], [], []>} : vector<9x8xf32>, vector<8x8xf32>, vector<9x8xf32> -> vector<9x8xf32>
    %cst_50 = arith.constant 0.353553385 : f32
    %95 = vector.broadcast %cst_50 : f32 to vector<9x8xf32>
    %96 = arith.mulf %94, %95 : vector<9x8xf32>
    %cst_51 = arith.constant dense<0xFF800000> : vector<9xf32>
    %97 = vector.multi_reduction <maximumf>, %96, %cst_51 [1] : vector<9x8xf32> to vector<9xf32>
    %98 = vector.shape_cast %97 : vector<9xf32> to vector<9x1xf32>
    %99 = vector.broadcast %98 : vector<9x1xf32> to vector<9x8xf32>
    %100 = arith.subf %96, %99 : vector<9x8xf32>
    %101 = math.exp %100 : vector<9x8xf32>
    %cst_52 = arith.constant dense<0.000000e+00> : vector<9xf32>
    %102 = vector.multi_reduction <add>, %101, %cst_52 [1] : vector<9x8xf32> to vector<9xf32>
    %103 = vector.shape_cast %102 : vector<9xf32> to vector<9x1xf32>
    %104 = vector.broadcast %103 : vector<9x1xf32> to vector<9x8xf32>
    %105 = arith.divf %101, %104 : vector<9x8xf32>
    %cst_53 = arith.constant dense<0.000000e+00> : vector<9x8xf32>
    %106 = tpu.matmul %105, %93, %cst_53 {dimension_numbers = #tpu.dot_dimension_numbers<[1], [0], [0], [1], [0, 0, 1, 1], [], []>} : vector<9x8xf32>, vector<8x8xf32>, vector<9x8xf32> -> vector<9x8xf32>
    %c1 = arith.constant 1 : index
    %c0_54 = arith.constant 0 : index
    %c0_55 = arith.constant 0 : index
    %107 = vector.load %arg12[%c1, %c0_54, %c0_55] : memref<2x8x16xf32, #tpu.memory_space<vmem>>, vector<1x8x16xf32>
    %108 = vector.shape_cast %107 : vector<1x8x16xf32> to vector<8x16xf32>
    %cst_56 = arith.constant dense<0.000000e+00> : vector<9x16xf32>
    %109 = tpu.matmul %106, %108, %cst_56 {dimension_numbers = #tpu.dot_dimension_numbers<[1], [0], [0], [1], [0, 0, 1, 1], [], []>} : vector<9x8xf32>, vector<8x16xf32>, vector<9x16xf32> -> vector<9x16xf32>
    %110 = arith.addf %90, %109 : vector<9x16xf32>
    %111 = arith.addf %1, %110 : vector<9x16xf32>
    %c0_57 = arith.constant 0 : index
    %c0_58 = arith.constant 0 : index
    %c0_59 = arith.constant 0 : index
    %112 = vector.load %arg13[%c0_57, %c0_58, %c0_59] : memref<1x1x16xf32, #tpu.memory_space<vmem>>, vector<1x1x16xf32>
    %113 = vector.shape_cast %112 : vector<1x1x16xf32> to vector<1x16xf32>
    %114 = vector.broadcast %113 : vector<1x16xf32> to vector<9x16xf32>
    %115 = arith.addf %111, %114 : vector<9x16xf32>
    %c0_60 = arith.constant 0 : index
    %c0_61 = arith.constant 0 : index
    %c0_62 = arith.constant 0 : index
    %116 = vector.load %arg14[%c0_60, %c0_61, %c0_62] : memref<1x1x16xf32, #tpu.memory_space<vmem>>, vector<1x1x16xf32>
    %117 = vector.shape_cast %116 : vector<1x1x16xf32> to vector<1x16xf32>
    %c0_63 = arith.constant 0 : index
    %c0_64 = arith.constant 0 : index
    %c0_65 = arith.constant 0 : index
    %118 = vector.load %arg15[%c0_63, %c0_64, %c0_65] : memref<1x1x16xf32, #tpu.memory_space<vmem>>, vector<1x1x16xf32>
    %119 = vector.shape_cast %118 : vector<1x1x16xf32> to vector<1x16xf32>
    %cst_66 = arith.constant dense<0.000000e+00> : vector<9xf32>
    %120 = vector.multi_reduction <add>, %115, %cst_66 [1] : vector<9x16xf32> to vector<9xf32>
    %121 = vector.shape_cast %120 : vector<9xf32> to vector<9x1xf32>
    %cst_67 = arith.constant 1.600000e+01 : f32
    %122 = vector.broadcast %cst_67 : f32 to vector<9x1xf32>
    %123 = arith.divf %121, %122 : vector<9x1xf32>
    %124 = vector.broadcast %123 : vector<9x1xf32> to vector<9x16xf32>
    %125 = arith.subf %115, %124 : vector<9x16xf32>
    %126 = arith.mulf %125, %125 : vector<9x16xf32>
    %cst_68 = arith.constant dense<0.000000e+00> : vector<9xf32>
    %127 = vector.multi_reduction <add>, %126, %cst_68 [1] : vector<9x16xf32> to vector<9xf32>
    %128 = vector.shape_cast %127 : vector<9xf32> to vector<9x1xf32>
    %cst_69 = arith.constant 1.600000e+01 : f32
    %129 = vector.broadcast %cst_69 : f32 to vector<9x1xf32>
    %130 = arith.divf %128, %129 : vector<9x1xf32>
    %131 = vector.broadcast %123 : vector<9x1xf32> to vector<9x16xf32>
    %132 = arith.subf %115, %131 : vector<9x16xf32>
    %cst_70 = arith.constant 9.99999974E-6 : f32
    %133 = vector.broadcast %cst_70 : f32 to vector<9x1xf32>
    %134 = arith.addf %130, %133 : vector<9x1xf32>
    %135 = math.rsqrt %134 : vector<9x1xf32>
    %136 = vector.broadcast %135 : vector<9x1xf32> to vector<9x16xf32>
    %137 = arith.mulf %132, %136 : vector<9x16xf32>
    %138 = vector.broadcast %117 : vector<1x16xf32> to vector<9x16xf32>
    %139 = arith.mulf %137, %138 : vector<9x16xf32>
    %140 = vector.broadcast %119 : vector<1x16xf32> to vector<9x16xf32>
    %141 = arith.addf %139, %140 : vector<9x16xf32>
    %c0_71 = arith.constant 0 : index
    %c0_72 = arith.constant 0 : index
    %c0_73 = arith.constant 0 : index
    %142 = vector.load %arg16[%c0_71, %c0_72, %c0_73] : memref<1x16x64xf32, #tpu.memory_space<vmem>>, vector<1x16x64xf32>
    %143 = vector.shape_cast %142 : vector<1x16x64xf32> to vector<16x64xf32>
    %cst_74 = arith.constant dense<0.000000e+00> : vector<9x64xf32>
    %144 = tpu.matmul %141, %143, %cst_74 {dimension_numbers = #tpu.dot_dimension_numbers<[1], [0], [0], [1], [0, 0, 1, 1], [], []>} : vector<9x16xf32>, vector<16x64xf32>, vector<9x64xf32> -> vector<9x64xf32>
    %c0_75 = arith.constant 0 : index
    %c0_76 = arith.constant 0 : index
    %c0_77 = arith.constant 0 : index
    %145 = vector.load %arg17[%c0_75, %c0_76, %c0_77] : memref<1x1x64xf32, #tpu.memory_space<vmem>>, vector<1x1x64xf32>
    %146 = vector.shape_cast %145 : vector<1x1x64xf32> to vector<1x64xf32>
    %147 = vector.broadcast %146 : vector<1x64xf32> to vector<9x64xf32>
    %148 = arith.addf %144, %147 : vector<9x64xf32>
    %cst_78 = arith.constant 0.707106769 : f32
    %149 = vector.broadcast %cst_78 : f32 to vector<9x64xf32>
    %150 = arith.mulf %148, %149 : vector<9x64xf32>
    %151 = math.absf %150 : vector<9x64xf32>
    %cst_79 = arith.constant 0.327591091 : f32
    %152 = vector.broadcast %cst_79 : f32 to vector<9x64xf32>
    %153 = arith.mulf %152, %151 : vector<9x64xf32>
    %cst_80 = arith.constant 1.000000e+00 : f32
    %154 = vector.broadcast %cst_80 : f32 to vector<9x64xf32>
    %155 = arith.addf %154, %153 : vector<9x64xf32>
    %cst_81 = arith.constant 1.000000e+00 : f32
    %156 = vector.broadcast %cst_81 : f32 to vector<9x64xf32>
    %157 = arith.divf %156, %155 : vector<9x64xf32>
    %cst_82 = arith.constant 1.06140542 : f32
    %158 = vector.broadcast %cst_82 : f32 to vector<9x64xf32>
    %159 = arith.mulf %158, %157 : vector<9x64xf32>
    %cst_83 = arith.constant 1.45315206 : f32
    %160 = vector.broadcast %cst_83 : f32 to vector<9x64xf32>
    %161 = arith.subf %159, %160 : vector<9x64xf32>
    %162 = arith.mulf %161, %157 : vector<9x64xf32>
    %cst_84 = arith.constant 1.42141378 : f32
    %163 = vector.broadcast %cst_84 : f32 to vector<9x64xf32>
    %164 = arith.addf %162, %163 : vector<9x64xf32>
    %165 = arith.mulf %164, %157 : vector<9x64xf32>
    %cst_85 = arith.constant 0.284496725 : f32
    %166 = vector.broadcast %cst_85 : f32 to vector<9x64xf32>
    %167 = arith.subf %165, %166 : vector<9x64xf32>
    %168 = arith.mulf %167, %157 : vector<9x64xf32>
    %cst_86 = arith.constant 0.254829586 : f32
    %169 = vector.broadcast %cst_86 : f32 to vector<9x64xf32>
    %170 = arith.addf %168, %169 : vector<9x64xf32>
    %171 = arith.mulf %170, %157 : vector<9x64xf32>
    %cst_87 = arith.constant 0.000000e+00 : f32
    %172 = vector.broadcast %cst_87 : f32 to vector<9x64xf32>
    %173 = arith.subf %172, %151 : vector<9x64xf32>
    %174 = arith.mulf %173, %151 : vector<9x64xf32>
    %175 = math.exp %174 : vector<9x64xf32>
    %176 = arith.mulf %171, %175 : vector<9x64xf32>
    %cst_88 = arith.constant 1.000000e+00 : f32
    %177 = vector.broadcast %cst_88 : f32 to vector<9x64xf32>
    %178 = arith.subf %177, %176 : vector<9x64xf32>
    %cst_89 = arith.constant 0.000000e+00 : f32
    %179 = vector.broadcast %cst_89 : f32 to vector<9x64xf32>
    %180 = arith.cmpf olt, %150, %179 : vector<9x64xf32>
    %cst_90 = arith.constant 0.000000e+00 : f32
    %181 = vector.broadcast %cst_90 : f32 to vector<9x64xf32>
    %182 = arith.subf %181, %178 : vector<9x64xf32>
    %183 = arith.select %180, %182, %178 : vector<9x64xi1>, vector<9x64xf32>
    %cst_91 = arith.constant 5.000000e-01 : f32
    %184 = vector.broadcast %cst_91 : f32 to vector<9x64xf32>
    %185 = arith.mulf %148, %184 : vector<9x64xf32>
    %cst_92 = arith.constant 1.000000e+00 : f32
    %186 = vector.broadcast %cst_92 : f32 to vector<9x64xf32>
    %187 = arith.addf %186, %183 : vector<9x64xf32>
    %188 = arith.mulf %185, %187 : vector<9x64xf32>
    %c0_93 = arith.constant 0 : index
    %c0_94 = arith.constant 0 : index
    %c0_95 = arith.constant 0 : index
    %189 = vector.load %arg18[%c0_93, %c0_94, %c0_95] : memref<1x64x16xf32, #tpu.memory_space<vmem>>, vector<1x64x16xf32>
    %190 = vector.shape_cast %189 : vector<1x64x16xf32> to vector<64x16xf32>
    %cst_96 = arith.constant dense<0.000000e+00> : vector<9x16xf32>
    %191 = tpu.matmul %188, %190, %cst_96 {dimension_numbers = #tpu.dot_dimension_numbers<[1], [0], [0], [1], [0, 0, 1, 1], [], []>} : vector<9x64xf32>, vector<64x16xf32>, vector<9x16xf32> -> vector<9x16xf32>
    %192 = arith.addf %115, %191 : vector<9x16xf32>
    %c0_97 = arith.constant 0 : index
    %c0_98 = arith.constant 0 : index
    %c0_99 = arith.constant 0 : index
    %193 = vector.load %arg19[%c0_97, %c0_98, %c0_99] : memref<1x1x16xf32, #tpu.memory_space<vmem>>, vector<1x1x16xf32>
    %194 = vector.shape_cast %193 : vector<1x1x16xf32> to vector<1x16xf32>
    %195 = vector.broadcast %194 : vector<1x16xf32> to vector<9x16xf32>
    %196 = arith.addf %192, %195 : vector<9x16xf32>
    %c0_100 = arith.constant 0 : index
    %c0_101 = arith.constant 0 : index
    %197 = vector.load %arg20[%c0_100, %c0_101] : memref<1x16xf32, #tpu.memory_space<vmem>>, vector<1x16xf32>
    %c0_102 = arith.constant 0 : index
    %c0_103 = arith.constant 0 : index
    %198 = vector.load %arg21[%c0_102, %c0_103] : memref<1x16xf32, #tpu.memory_space<vmem>>, vector<1x16xf32>
    %cst_104 = arith.constant dense<0.000000e+00> : vector<9xf32>
    %199 = vector.multi_reduction <add>, %196, %cst_104 [1] : vector<9x16xf32> to vector<9xf32>
    %200 = vector.shape_cast %199 : vector<9xf32> to vector<9x1xf32>
    %cst_105 = arith.constant 1.600000e+01 : f32
    %201 = vector.broadcast %cst_105 : f32 to vector<9x1xf32>
    %202 = arith.divf %200, %201 : vector<9x1xf32>
    %203 = vector.broadcast %202 : vector<9x1xf32> to vector<9x16xf32>
    %204 = arith.subf %196, %203 : vector<9x16xf32>
    %205 = arith.mulf %204, %204 : vector<9x16xf32>
    %cst_106 = arith.constant dense<0.000000e+00> : vector<9xf32>
    %206 = vector.multi_reduction <add>, %205, %cst_106 [1] : vector<9x16xf32> to vector<9xf32>
    %207 = vector.shape_cast %206 : vector<9xf32> to vector<9x1xf32>
    %cst_107 = arith.constant 1.600000e+01 : f32
    %208 = vector.broadcast %cst_107 : f32 to vector<9x1xf32>
    %209 = arith.divf %207, %208 : vector<9x1xf32>
    %210 = vector.broadcast %202 : vector<9x1xf32> to vector<9x16xf32>
    %211 = arith.subf %196, %210 : vector<9x16xf32>
    %cst_108 = arith.constant 9.99999974E-6 : f32
    %212 = vector.broadcast %cst_108 : f32 to vector<9x1xf32>
    %213 = arith.addf %209, %212 : vector<9x1xf32>
    %214 = math.rsqrt %213 : vector<9x1xf32>
    %215 = vector.broadcast %214 : vector<9x1xf32> to vector<9x16xf32>
    %216 = arith.mulf %211, %215 : vector<9x16xf32>
    %217 = vector.broadcast %197 : vector<1x16xf32> to vector<9x16xf32>
    %218 = arith.mulf %216, %217 : vector<9x16xf32>
    %219 = vector.broadcast %198 : vector<1x16xf32> to vector<9x16xf32>
    %220 = arith.addf %218, %219 : vector<9x16xf32>
    %c0_109 = arith.constant 0 : index
    %c0_110 = arith.constant 0 : index
    %221 = vector.load %arg22[%c0_109, %c0_110] : memref<16x16xf32, #tpu.memory_space<vmem>>, vector<16x16xf32>
    %cst_111 = arith.constant dense<0.000000e+00> : vector<9x16xf32>
    %222 = tpu.matmul %220, %221, %cst_111 {dimension_numbers = #tpu.dot_dimension_numbers<[1], [0], [0], [1], [0, 0, 1, 1], [], []>} : vector<9x16xf32>, vector<16x16xf32>, vector<9x16xf32> -> vector<9x16xf32>
    %c0_112 = arith.constant 0 : index
    %c0_113 = arith.constant 0 : index
    %223 = vector.load %arg23[%c0_112, %c0_113] : memref<1x16xf32, #tpu.memory_space<vmem>>, vector<1x16xf32>
    %224 = vector.broadcast %223 : vector<1x16xf32> to vector<9x16xf32>
    %225 = arith.addf %222, %224 : vector<9x16xf32>
    %226 = vector.extract_strided_slice %225 {offsets = [1, 0], sizes = [8, 16], strides = [1, 1]} : vector<9x16xf32> to vector<8x16xf32>
    %c0_114 = arith.constant 0 : index
    %c0_115 = arith.constant 0 : index
    %c0_116 = arith.constant 0 : index
    %227 = vector.load %arg24[%c0_114, %c0_115, %c0_116] : memref<1x8x16xf32, #tpu.memory_space<vmem>>, vector<1x8x16xf32>
    %228 = vector.shape_cast %227 : vector<1x8x16xf32> to vector<8x16xf32>
    %229 = vector.shape_cast %226 : vector<8x16xf32> to vector<1x8x16xf32>
    tpu.vector_store %arg24[%c0_114, %c0_115, %c0_116], %229 {strides = array<i32>} : memref<1x8x16xf32, #tpu.memory_space<vmem>>, vector<1x8x16xf32>,
    %c0_117 = arith.constant 0 : index
    %c0_118 = arith.constant 0 : index
    %c0_119 = arith.constant 0 : index
    %230 = vector.load %arg3[%c0_117, %c0_118, %c0_119] : memref<1x8x16xf32, #tpu.memory_space<vmem>>, vector<1x8x16xf32>
    %231 = vector.shape_cast %230 : vector<1x8x16xf32> to vector<8x16xf32>
    %232 = arith.subf %226, %231 : vector<8x16xf32>
    %233 = arith.mulf %232, %232 : vector<8x16xf32>
    %cst_120 = arith.constant dense<0.000000e+00> : vector<16xf32>
    %234 = vector.multi_reduction <add>, %233, %cst_120 [0] : vector<8x16xf32> to vector<16xf32>
    %235 = vector.shape_cast %234 : vector<16xf32> to vector<1x16xf32>
    %c0_121 = arith.constant 0 : index
    %c0_122 = arith.constant 0 : index
    %c0_123 = arith.constant 0 : index
    %236 = vector.load %arg25[%c0_121, %c0_122, %c0_123] : memref<1x1x16xf32, #tpu.memory_space<vmem>>, vector<1x1x16xf32>
    %237 = vector.shape_cast %236 : vector<1x1x16xf32> to vector<1x16xf32>
    %238 = vector.shape_cast %235 : vector<1x16xf32> to vector<1x1x16xf32>
    tpu.vector_store %arg25[%c0_121, %c0_122, %c0_123], %238 {strides = array<i32>} : memref<1x1x16xf32, #tpu.memory_space<vmem>>, vector<1x1x16xf32>,
    return
  }
  func.func @transform_0(%arg0: i32) -> (i32, i32, i32) {
    %c0_i32 = arith.constant 0 : i32
    %c0_i32_0 = arith.constant 0 : i32
    %c0_i32_1 = arith.constant 0 : i32
    return %arg0, %c0_i32, %c0_i32_0 : i32, i32, i32
  }
  func.func @transform_1(%arg0: i32) -> (i32, i32, i32) {
    %c0_i32 = arith.constant 0 : i32
    %c0_i32_0 = arith.constant 0 : i32
    %c0_i32_1 = arith.constant 0 : i32
    return %arg0, %c0_i32, %c0_i32_0 : i32, i32, i32
  }
  func.func @transform_2(%arg0: i32) -> (i32, i32, i32) {
    %c0_i32 = arith.constant 0 : i32
    %c0_i32_0 = arith.constant 0 : i32
    %c0_i32_1 = arith.constant 0 : i32
    return %arg0, %c0_i32, %c0_i32_0 : i32, i32, i32
  }
  func.func @transform_3(%arg0: i32) -> (i32, i32, i32) {
    %c0_i32 = arith.constant 0 : i32
    %c0_i32_0 = arith.constant 0 : i32
    %c0_i32_1 = arith.constant 0 : i32
    %c0_i32_2 = arith.constant 0 : i32
    return %c0_i32, %c0_i32_0, %c0_i32_1 : i32, i32, i32
  }
  func.func @transform_4(%arg0: i32) -> (i32, i32, i32) {
    %c0_i32 = arith.constant 0 : i32
    %c0_i32_0 = arith.constant 0 : i32
    %c0_i32_1 = arith.constant 0 : i32
    %c0_i32_2 = arith.constant 0 : i32
    return %c0_i32, %c0_i32_0, %c0_i32_1 : i32, i32, i32
  }
  func.func @transform_5(%arg0: i32) -> (i32, i32, i32) {
    %c0_i32 = arith.constant 0 : i32
    %c0_i32_0 = arith.constant 0 : i32
    %c0_i32_1 = arith.constant 0 : i32
    %c0_i32_2 = arith.constant 0 : i32
    return %c0_i32, %c0_i32_0, %c0_i32_1 : i32, i32, i32
  }
  func.func @transform_6(%arg0: i32) -> (i32, i32, i32) {
    %c0_i32 = arith.constant 0 : i32
    %c0_i32_0 = arith.constant 0 : i32
    %c0_i32_1 = arith.constant 0 : i32
    %c0_i32_2 = arith.constant 0 : i32
    return %c0_i32, %c0_i32_0, %c0_i32_1 : i32, i32, i32
  }
  func.func @transform_7(%arg0: i32) -> (i32, i32, i32) {
    %c0_i32 = arith.constant 0 : i32
    %c0_i32_0 = arith.constant 0 : i32
    %c0_i32_1 = arith.constant 0 : i32
    %c0_i32_2 = arith.constant 0 : i32
    return %c0_i32, %c0_i32_0, %c0_i32_1 : i32, i32, i32
  }
  func.func @transform_8(%arg0: i32) -> (i32, i32, i32) {
    %c0_i32 = arith.constant 0 : i32
    %c0_i32_0 = arith.constant 0 : i32
    %c0_i32_1 = arith.constant 0 : i32
    %c0_i32_2 = arith.constant 0 : i32
    return %c0_i32, %c0_i32_0, %c0_i32_1 : i32, i32, i32
  }
  func.func @transform_9(%arg0: i32) -> (i32, i32, i32) {
    %c0_i32 = arith.constant 0 : i32
    %c0_i32_0 = arith.constant 0 : i32
    %c0_i32_1 = arith.constant 0 : i32
    %c0_i32_2 = arith.constant 0 : i32
    return %c0_i32, %c0_i32_0, %c0_i32_1 : i32, i32, i32
  }
  func.func @transform_10(%arg0: i32) -> (i32, i32, i32) {
    %c0_i32 = arith.constant 0 : i32
    %c0_i32_0 = arith.constant 0 : i32
    %c0_i32_1 = arith.constant 0 : i32
    %c0_i32_2 = arith.constant 0 : i32
    return %c0_i32, %c0_i32_0, %c0_i32_1 : i32, i32, i32
  }
  func.func @transform_11(%arg0: i32) -> (i32, i32, i32) {
    %c0_i32 = arith.constant 0 : i32
    %c0_i32_0 = arith.constant 0 : i32
    %c0_i32_1 = arith.constant 0 : i32
    %c0_i32_2 = arith.constant 0 : i32
    return %c0_i32, %c0_i32_0, %c0_i32_1 : i32, i32, i32
  }
  func.func @transform_12(%arg0: i32) -> (i32, i32, i32) {
    %c0_i32 = arith.constant 0 : i32
    %c0_i32_0 = arith.constant 0 : i32
    %c0_i32_1 = arith.constant 0 : i32
    %c0_i32_2 = arith.constant 0 : i32
    return %c0_i32, %c0_i32_0, %c0_i32_1 : i32, i32, i32
  }
  func.func @transform_13(%arg0: i32) -> (i32, i32, i32) {
    %c0_i32 = arith.constant 0 : i32
    %c0_i32_0 = arith.constant 0 : i32
    %c0_i32_1 = arith.constant 0 : i32
    %c0_i32_2 = arith.constant 0 : i32
    return %c0_i32, %c0_i32_0, %c0_i32_1 : i32, i32, i32
  }
  func.func @transform_14(%arg0: i32) -> (i32, i32, i32) {
    %c0_i32 = arith.constant 0 : i32
    %c0_i32_0 = arith.constant 0 : i32
    %c0_i32_1 = arith.constant 0 : i32
    %c0_i32_2 = arith.constant 0 : i32
    return %c0_i32, %c0_i32_0, %c0_i32_1 : i32, i32, i32
  }
  func.func @transform_15(%arg0: i32) -> (i32, i32, i32) {
    %c0_i32 = arith.constant 0 : i32
    %c0_i32_0 = arith.constant 0 : i32
    %c0_i32_1 = arith.constant 0 : i32
    %c0_i32_2 = arith.constant 0 : i32
    return %c0_i32, %c0_i32_0, %c0_i32_1 : i32, i32, i32
  }
  func.func @transform_16(%arg0: i32) -> (i32, i32, i32) {
    %c0_i32 = arith.constant 0 : i32
    %c0_i32_0 = arith.constant 0 : i32
    %c0_i32_1 = arith.constant 0 : i32
    %c0_i32_2 = arith.constant 0 : i32
    return %c0_i32, %c0_i32_0, %c0_i32_1 : i32, i32, i32
  }
  func.func @transform_17(%arg0: i32) -> (i32, i32, i32) {
    %c0_i32 = arith.constant 0 : i32
    %c0_i32_0 = arith.constant 0 : i32
    %c0_i32_1 = arith.constant 0 : i32
    %c0_i32_2 = arith.constant 0 : i32
    return %c0_i32, %c0_i32_0, %c0_i32_1 : i32, i32, i32
  }
  func.func @transform_18(%arg0: i32) -> (i32, i32, i32) {
    %c0_i32 = arith.constant 0 : i32
    %c0_i32_0 = arith.constant 0 : i32
    %c0_i32_1 = arith.constant 0 : i32
    %c0_i32_2 = arith.constant 0 : i32
    return %c0_i32, %c0_i32_0, %c0_i32_1 : i32, i32, i32
  }
  func.func @transform_19(%arg0: i32) -> (i32, i32) {
    %c0_i32 = arith.constant 0 : i32
    %c0_i32_0 = arith.constant 0 : i32
    %c0_i32_1 = arith.constant 0 : i32
    return %c0_i32, %c0_i32_0 : i32, i32
  }
  func.func @transform_20(%arg0: i32) -> (i32, i32) {
    %c0_i32 = arith.constant 0 : i32
    %c0_i32_0 = arith.constant 0 : i32
    %c0_i32_1 = arith.constant 0 : i32
    return %c0_i32, %c0_i32_0 : i32, i32
  }
  func.func @transform_21(%arg0: i32) -> (i32, i32) {
    %c0_i32 = arith.constant 0 : i32
    %c0_i32_0 = arith.constant 0 : i32
    %c0_i32_1 = arith.constant 0 : i32
    return %c0_i32, %c0_i32_0 : i32, i32
  }
  func.func @transform_22(%arg0: i32) -> (i32, i32) {
    %c0_i32 = arith.constant 0 : i32
    %c0_i32_0 = arith.constant 0 : i32
    %c0_i32_1 = arith.constant 0 : i32
    return %c0_i32, %c0_i32_0 : i32, i32
  }
  func.func @transform_23(%arg0: i32) -> (i32, i32, i32) {
    %c0_i32 = arith.constant 0 : i32
    %c0_i32_0 = arith.constant 0 : i32
    %c0_i32_1 = arith.constant 0 : i32
    return %arg0, %c0_i32, %c0_i32_0 : i32, i32, i32
  }
  func.func @transform_24(%arg0: i32) -> (i32, i32, i32) {
    %c0_i32 = arith.constant 0 : i32
    %c0_i32_0 = arith.constant 0 : i32
    %c0_i32_1 = arith.constant 0 : i32
    return %arg0, %c0_i32, %c0_i32_0 : i32, i32, i32
  }
}

</mosaic_0001>

<bundles_post_ra>
// kernel: cinema_forward.3
= control target key start
LH: loop header
LB: loop body
LE: loop exit
PB: predicated region body
PF: predicated region fallthrough
CT: control target
= control target key end

     0   :  { %s2936_s0 = inlined_call_operand.vmem [shape: f32[2,9,16], index: 0, kind: input, shape index: {}]   ;;  %s2937_s1 = inlined_call_operand.vmem [shape: f32[2,8,16], index: 1, kind: input, shape index: {}]   ;;  %s2938_s2 = inlined_call_operand.vmem [shape: f32[2,8,16], index: 2, kind: input, shape index: {}]   ;;  %s2939_s3 = inlined_call_operand.vmem [shape: f32[1,1,16], index: 3, kind: input, shape index: {}]   ;;  %s2940_s4 = inlined_call_operand.vmem [shape: f32[1,1,16], index: 4, kind: input, shape index: {}]   ;;  %s2941_s5 = inlined_call_operand.vmem [shape: f32[1,1,16], index: 5, kind: input, shape index: {}]   ;;  %s2942_s6 = inlined_call_operand.vmem [shape: f32[1,1,16], index: 6, kind: input, shape index: {}]   ;;  %s2943_s7 = inlined_call_operand.vmem [shape: f32[1,16,16], index: 7, kind: input, shape index: {}]   ;;  %s2944_s8 = inlined_call_operand.vmem [shape: f32[1,1,16], index: 8, kind: input, shape index: {}]   ;;  %s2945_s9 = inlined_call_operand.vmem [shape: f32[1,16,32], index: 9, kind: input, shape index: {}]   ;;  %s2946_s10 = inlined_call_operand.vmem [shape: f32[1,1,32], index: 10, kind: input, shape index: {}]   ;;  %s2947_s11 = inlined_call_operand.vmem [shape: f32[2,8,16], index: 11, kind: input, shape index: {}]   ;;  %s2948_s12 = inlined_call_operand.vmem [shape: f32[1,1,16], index: 12, kind: input, shape index: {}]   ;;  %s2949_s13 = inlined_call_operand.vmem [shape: f32[1,1,16], index: 13, kind: input, shape index: {}]   ;;  %s2950_s14 = inlined_call_operand.vmem [shape: f32[1,1,16], index: 14, kind: input, shape index: {}]   ;;  %s2951_s15 = inlined_call_operand.vmem [shape: f32[1,16,64], index: 15, kind: input, shape index: {}]   ;;  %s2952_s16 = inlined_call_operand.vmem [shape: f32[1,1,64], index: 16, kind: input, shape index: {}]   ;;  %s2953_s17 = inlined_call_operand.vmem [shape: f32[1,64,16], index: 17, kind: input, shape index: {}]   ;;  %s2954_s18 = inlined_call_operand.vmem [shape: f32[1,1,16], index: 18, kind: input, shape index: {}]   ;;  %s2955_s19 = inlined_call_operand.vmem [shape: f32[1,16], index: 19, kind: input, shape index: {}]   ;;  %s2956_s20 = inlined_call_operand.vmem [shape: f32[1,16], index: 20, kind: input, shape index: {}]   ;;  %s2957_s21 = inlined_call_operand.vmem [shape: f32[16,16], index: 21, kind: input, shape index: {}]   ;;  %s2958_s22 = inlined_call_operand.vmem [shape: f32[1,16], index: 22, kind: input, shape index: {}]   ;;  %s2959_s23 = inlined_call_operand.hbm [shape: f32[2,8,16], index: 23, kind: output, shape index: {0}]   ;;  %s2960_s24 = inlined_call_operand.vmem [shape: f32[2,1,16], index: 24, kind: output, shape index: {1}]  }
   0x1   :  { %2969 = sst [smem:[#allocation10_spill]] %s2936_s0 }
   0x2   :  { %2970 = sst [smem:[#allocation11_spill]] %s2937_s1 }
   0x3   :  { %2971 = sst [smem:[#allocation12_spill]] %s2938_s2 }
   0x4   :  { %2972 = sst [smem:[#allocation13_spill]] %s2939_s3 }
   0x5   :  { %2973 = sst [smem:[#allocation14_spill]] %s2940_s4 }
   0x6   :  { %2974 = sst [smem:[#allocation15_spill]] %s2941_s5 }
   0x7   :  { %2975 = sst [smem:[#allocation16_spill]] %s2942_s6 }
   0x8   :  { %2976 = sst [smem:[#allocation17_spill]] %s2943_s7 }
   0x9   :  { %2977 = sst [smem:[#allocation18_spill]] %s2944_s8 }
   0xa   :  { %2978 = sst [smem:[#allocation19_spill]] %s2945_s9 }
   0xb   :  { %2979 = sst [smem:[#allocation20_spill]] %s2946_s10 }
   0xc   :  { %2980 = sst [smem:[#allocation21_spill]] %s2947_s11 }
   0xd   :  { %2981 = sst [smem:[#allocation22_spill]] %s2948_s12 }
   0xe   :  { %30 = vsyncpa [#allocation3], 0 }
   0xf   :  { %32 = vsyncpa [#allocation3 + $0x1], 0  ;;  %s2654_s5 = smov 0   ;;  %s2656_s26 = smov 0  }
  0x10   :  { %s2658_s27 = smov 0   ;;  %s2660_s28 = smov 0  }
  0x11 LB: > { %2982 = sst [smem:[#allocation5_spill]] %s2508_s5  ;;  %s2675_s6 = sadd.s32 4294967295, %s2520_s28   ;;  %s2520_s28 = sphi %s2660_s28, %s3005_s28   ;;  %s2516_s27 = sphi %s2658_s27, %s3007_s27   ;;  %s2512_s26 = sphi %s2656_s26, %s3009_s26   ;;  %s2508_s5 = sphi %s2654_s5, %s3008_s5  }
  0x12   : > { %2983 = sst [smem:[#allocation6_spill]] %s2516_s27  ;;  %s2166_s2 = sadd.s32 4294967294, %s2520_s28  }
  0x13   : > { %s2679_s29 = sadd.s32 1, %s2520_s28   ;;  %s543_s0 = sadd.s32 1, %s2516_s27 }
  0x14   : > { %2984 = sst [smem:[#allocation7_spill]] %s2679_s29  ;;  %s540_s7 = ssub.s32 %s2520_s28, %s2679_s29 }
  0x15   : > { %p553_p0 = scmp.ne.s32.totalorder %s2516_s27, %s2512_s26  ;;  %p541_p1 = scmp.eq.s32.totalorder %s540_s7, 0 }
  0x16   : > { %p554_p2 = scmp.eq.s32.totalorder %s2675_s6, 1  ;;  %p559_p3 = scmp.ne.s32.totalorder %s2512_s26, %s2508_s5 }
  0x17   : > { %p560_p4 = scmp.eq.s32.totalorder %s2166_s2, 1  ;;  %p2169_p7 = scmp.ge.s32.totalorder %s2520_s28, 1 }
  0x18   : > { %s2690_s30 = scalar_select %p541_p1, %s2516_s27, %s543_s0  }
  0x19   : > { %p2692_p5 = por %p554_p2, %p553_p0  ;;  %p2696_p6 = por %p560_p4, %p559_p3 }
  0x1a   : > { %2985 = sst [smem:[#allocation8_spill]] %s2690_s30  ;;  %p686_p8 = scmp.lt.s32.totalorder %s2520_s28, 3 }
  0x1b   : > { %s2987_s25 = scalar_select %p2696_p6, 1, 0 }
  0x1c   : > { %p687_p9 = pnand %p2169_p7, %p686_p8 }
  0x1d   : > { %2988 = sst [smem:[#allocation9_spill]] %s2987_s25  ;;  %p763_p10 = scmp.lt.s32.totalorder (!%p687_p9), %s2675_s6, 1  ;;  %vm784_vm0 = vcmask (!%p687_p9), 130048   ;;  %vm788_vm1 = vcmask (!%p687_p9), 122880   ;;  %v2522_v24 = vmov (!%p687_p9), 0.0|0.0   ;;  %vm2523_vm2 = vmmov (!%p687_p9), 0  }
  0x1e   : > { %690 = sbr.rel (%p687_p9) target bundleno = 3026 (0xbd2), region = 112  ;;  %s2989_s0 = sld [smem:[#allocation10_spill]] (!%p687_p9)  ;;  %v2524_v52 = vmov (!%p687_p9), 0.0   ;;  %vm1030_vm3 = vcmask (!%p687_p9), 64512   ;;  %vm1120_vm4 = vcmask (!%p687_p9), 57344   ;;  %vm1791_vm7 = vcmask (!%p687_p9), 523264  }
  0x1f   : > { %s2990_s25 = sld [smem:[#allocation11_spill]] (!%p687_p9)  ;;  %s2991_s29 = sld [smem:[#allocation17_spill]] (!%p687_p9)  ;;  %vm2018_vm8 = vcmask (!%p687_p9), 130049  }
  0x20   : > { %s2993_s27 = sld [smem:[#allocation14_spill]] (!%p687_p9)  ;;  %s2994_s9 = sld [smem:[#allocation19_spill]] (!%p687_p9) }
  0x21   : > { %s2998_s10 = sld [smem:[#allocation20_spill]] (!%p687_p9)  ;;  %s2525_s2 = smov (!%p687_p9), 120  }
  0x22   : > { %s2999_s11 = sld [smem:[#allocation21_spill]] (!%p687_p9)  ;;  %s3000_s12 = sld [smem:[#allocation22_spill]] (!%p687_p9) }
  0x23   : > { %s3002_s1 = sld [smem:[#allocation12_spill]] (!%p687_p9) }
  0x25   : > { %s2704_s8 = scalar_select %p763_p10, %s2675_s6, 1  ;;  %v858_v21 = vld [vmem:[%s2991_s29] sm:$0xff]  ;;  %v859_v22 = vld [vmem:[%s2991_s29 + $0x8] sm:$0xff] }
  0x26   : > { %v2342_v23 = vpack.c.bf16 %v859_v22, %v858_v21  ;;  %v2176_v37 = vld [vmem:[%s2993_s27] ss:$0 sm:$0xff]  ;;  %v949_v45 = vld [vmem:[%s2994_s9 + $0x8] sm:$0xff]  ;;  %s2996_s27 = sld [smem:[#allocation16_spill]] }
  0x27   : > { %s2221_s4 = sshll.u32 %s2704_s8, 4  ;;  %s2967_s30 = sshll.u32 %s2704_s8, 3  ;;  %v948_v44 = vld [vmem:[%s2994_s9] sm:$0xff] }
  0x28   : > { %s767_s7 = scalar_lea.vmem %s2989_s0, %s2221_s4  ;;  %s771_s5 = scalar_lea.vmem %s2990_s25, %s2967_s30  ;;  %2343 = vmatprep.subr.bf16.mxu0 %v2342_v23  ;;  %v2347_v48 = vpack.c.bf16 %v949_v45, %v948_v44  ;;  %v2182_v58 = vld [vmem:[%s2998_s10] ss:$0 sm:$0xff] }
  0x29   : > { %v2711_v0 = vld [vmem:[%s767_s7] sm:$0xff]  ;;  %v2718_v1 = vld [vmem:[%s767_s7 + $0x8] sm:$0x1]  ;;  %2345 = vmatpush3.bf16.msra.mxu0 %v2342_v23  ;;  %s2992_s0 = sld [smem:[#allocation13_spill]]  ;;  %s2997_s25 = sld [smem:[#allocation18_spill]] }
  0x2a   : > { %v785_v2 = vsel %vm784_vm0, %v2711_v0, 0.0  ;;  %v781_v3 = vld [vmem:[%s771_s5] sm:$0xff]  ;;  %v789_v5 = vsel %vm788_vm1, %v2718_v1, 0.0  ;;  %2346 = vmatprep.subr.bf16.mxu0 %v2522_v24  ;;  %s2527_s7 = smov 104   ;;  %s755_s30 = sand.u32 1, %s2512_s26  }
  0x2b   : > { %786 = vadd.xlane.f32.xlu0 %v785_v2  ;;  %v831_v4 = vsel %vm784_vm0, %v781_v3, 0.0  ;;  %s3001_s29 = sshll.u32 %s2704_s8, 3  ;;  %s2218_s5 = sshll.u32 %s2675_s6, 7 }
  0x2c   : > { %832 = vadd.xlane.f32.xlu1 %v831_v4  ;;  %v2178_v51 = vld [vmem:[%s2996_s27] ss:$0 sm:$0xff]  ;;  %s2045_s9 = scalar_lea.sflag [#allocation3], %s755_s30 }
  0x2f   : > { %790 = vadd.xlane.f32.xlu0 %v789_v5  ;;  %v2175_v35 = vld [vmem:[%s2992_s0] ss:$0 sm:$0xff]  ;;  %s2995_s0 = sld [smem:[#allocation15_spill]] }
  0x30   : > { %v2179_v54 = vld [vmem:[%s2997_s25] ss:$0 sm:$0xff] }
  0x35   : > { %v2177_v46 = vld [vmem:[%s2995_s0] ss:$0 sm:$0xff]  ;;  %s2526_s0 = smov 112  }
  0xb8   : > { %v787_v6 = vpop.xlane.xlu0 %786 }
  0xb9   : > { %v793_v7 = vmul.f32 0.0625, %v787_v6  ;;  %v833_v8 = vpop.xlane.xlu1 %832 }
  0xba   : > { %v834_v9 = vmul.f32 0.0625, %v833_v8 }
  0xbb   : > { %v795_v10 = vsub.f32 %v2711_v0, %v793_v7 }
  0xbc   : > { %v835_v11 = vsub.f32 %v781_v3, %v834_v9  ;;  %v791_v12 = vpop.xlane.xlu0 %790 }
  0xbd   : > { %v794_v13 = vmul.f32 0.0625, %v791_v12  ;;  %v797_v14 = vmul.f32 %v795_v10, %v795_v10 }
  0xbe   : > { %v836_v15 = vmul.f32 %v835_v11, %v835_v11 }
  0xbf   : > { %v796_v16 = vsub.f32 %v2718_v1, %v794_v13  ;;  %v799_v17 = vsel %vm784_vm0, %v797_v14, 0.0 }
  0xc0   : > { %800 = vadd.xlane.f32.xlu1 %v799_v17  ;;  %v837_v18 = vsel %vm784_vm0, %v836_v15, 0.0 }
  0xc1   : > { %v798_v19 = vmul.f32 %v796_v16, %v796_v16 }
  0xc3   : > { %v802_v20 = vsel %vm788_vm1, %v798_v19, 0.0 }
  0xc4   : > { %838 = vadd.xlane.f32.xlu1 %v837_v18  ;;  %803 = vadd.xlane.f32.xlu0 %v802_v20 }
 0x14d   : > { %v801_v25 = vpop.xlane.xlu1 %800 }
 0x14e   : > { %v805_v26 = vmul.f32 0.0625, %v801_v25 }
 0x150   : > { %v807_v27 = vadd.f32 1e-05, %v805_v26 }
 0x151   : > { %v839_v28 = vpop.xlane.xlu1 %838  ;;  %v804_v29 = vpop.xlane.xlu0 %803 }
 0x152   : > { %2420 = vrsqrt.f32 %v807_v27  ;;  %v840_v30 = vmul.f32 0.0625, %v839_v28  ;;  %v806_v31 = vmul.f32 0.0625, %v804_v29 }
 0x154   : > { %v841_v32 = vadd.f32 1e-05, %v840_v30  ;;  %v808_v33 = vadd.f32 1e-05, %v806_v31 }
 0x156   : > { %2422 = vrsqrt.f32 %v841_v32 }
 0x157   : > { %2424 = vrsqrt.f32 %v808_v33 }
 0x15c   : > { %v2421_v34 = vpop.eup %2420 }
 0x15d   : > { %v811_v36 = vmul.f32 %v2421_v34, %v795_v10 }
 0x15f   : > { %v819_v38 = vmul.f32 %v2175_v35, %v811_v36 }
 0x160   : > { %v2423_v39 = vpop.eup %2422 }
 0x161   : > { %v2425_v40 = vpop.eup %2424  ;;  %v827_v41 = vadd.f32 %v2176_v37, %v819_v38  ;;  %v843_v42 = vmul.f32 %v2423_v39, %v835_v11 }
 0x162   : > { %v812_v43 = vmul.f32 %v2425_v40, %v796_v16 }
 0x163   : > { %2269 = vmatprep.mubr.msk.f32.mxu0 %vm784_vm0, %v827_v41  ;;  %v850_v50 = vmul.f32 %v2177_v46, %v843_v42 }
 0x164   : > { %v820_v47 = vmul.f32 %v2175_v35, %v812_v43 }
 0x165   : > { %v857_v53 = vadd.f32 %v2178_v51, %v850_v50  ;;  %v2194_v50 = vld [vmem:[%s2999_s11 + $0x8] sm:$0xff]  ;;  %v1224_v51 = vld [vmem:[%s2999_s11] sm:$0xff]  ;;  %s2528_s11 = smov [#allocation2]  }
 0x166   : > { %v828_v49 = vadd.f32 %v2176_v37, %v820_v47 }
 0x168   : > { %2270 = vmatmul.mubr.msk.f32.vlgmr.msra.gmra.mrb[0].mxu0 %vm784_vm0, %v828_v49 }
 0x169   : > { %2348 = vmatpush3.bf16.msra.mxu0 %v2347_v48  ;;  %2276 = vmatprep.mubr.msk.f32.mxu0 %vm2523_vm2, %v2524_v52 }
 0x16c   : > { %2277 = vmatmul.mubr.msk.f32.vlgmr.msra.gmra.mrb[2].mxu0 %vm784_vm0, %v857_v53 }
 0x23b   : > { %v2271_v55 = vpop.f32.mrb[0].mxu0 }
 0x23c   : > { %v939_v56 = vpop.f32.mrb[1].mxu0  ;;  %v945_v62 = vadd.f32 %v2271_v55, %v2179_v54 }
 0x23d   : > { %v940_v57 = vadd.f32 %v2179_v54, %v939_v56 }
 0x23f   : > { %v1026_v59 = vpop.f32.mrb[2].mxu0  ;;  %1225 = vrot.lane.b32.xlu1 %v940_v57, %s2525_s2  ;;  %2281 = vmatprep.mubr.msk.f32.mxu0 %vm1030_vm3, %v940_v57  ;;  %v2199_v57 = vld [vmem:[%s3000_s12] ss:$0 sm:$0xff]  ;;  %s2462_s12 = sshll.u32 %s2528_s11, 4  ;;  %s2463_s12 = int_to_ptr.vmem [resolvable:$false] %s2462_s12 }
 0x240   : > { %v1027_v60 = vadd.f32 %v2182_v58, %v1026_v59  ;;  %v2278_v61 = vpop.f32.mrb[3].mxu0  ;;  %s2464_s25 = scalar_lea.vmem %s2463_s12, 256 }
 0x242   : > { %1229 = vrot.lane.b32.xlu0 %v1027_v60, %s2525_s2  ;;  %2279 = vmatprep.subr.msk.mxu0 %vm1030_vm3, %v1027_v60 }
 0x243   : > { %2280 = vmatpush3.xpose.msk.msra.mxu0 %vm1030_vm3, %v1027_v60  ;;  %1227 = vrot.lane.b32.xlu1 %v945_v62, %s2525_s2  ;;  %s775_s2 = scalar_lea.vmem %s3002_s1, %s3001_s29  ;;  %s2887_s29 = scalar_lea.hbm %s2959_s23, %s2218_s5 }
 0x246   : > { %2282 = vmatmul.mubr.msk.f32.vlgmr.msra.gmra.mrb[4].mxu0 %vm1030_vm3, %v945_v62 }
 0x2b1   : > { %v1226_v63 = vpop.permute.xlu1 %1225 }
 0x2b2   : > { %2291 = vmatprep.mubr.msk.f32.mxu0 %vm1030_vm3, %v1226_v63 }
 0x2b4   : > { %v1230_v2 = vpop.permute.xlu0 %1229 }
 0x2b5   : > { %2289 = vmatprep.subr.msk.mxu0 %vm1030_vm3, %v1230_v2  ;;  %v1228_v3 = vpop.permute.xlu1 %1227 }
 0x2b6   : > { %2290 = vmatpush3.xpose.msk.msra.mxu0 %vm1030_vm3, %v1230_v2 }
 0x2b7   : > { %2299 = vmatprep.subr.mxu0 %v2194_v50 }
 0x2b9   : > { %2292 = vmatmul.mubr.msk.f32.vlgmr.msra.gmra.mrb[6].mxu0 %vm1030_vm3, %v1228_v3 }
 0x2ba   : > { %2300 = vmatpush3.msra.mxu0 %v2194_v50 }
 0x2bb   : > { %2304 = vmatprep.subr.mxu0 %v1224_v51 }
 0x319   : > { %v2283_v4 = vpop.f32.mrb[4].mxu0 }
 0x31a   : > { %v1116_v5 = vmul.f32 0.35355338, %v2283_v4  ;;  %v1106_v6 = vpop.f32.mrb[5].mxu0 }
 0x31b   : > { %v1115_v7 = vmul.f32 0.35355338, %v1106_v6 }
 0x31c   : > { %v1121_v8 = vsel %vm1120_vm4, %v1116_v5, -inf }
 0x31d   : > { %1122 = vmax.xlane.f32.xlu0 %v1121_v8  ;;  %v1117_v9 = vsel %vm1030_vm3, %v1115_v7, -inf }
 0x31e   : > { %1118 = vmax.xlane.f32.xlu1 %v1117_v9 }
 0x38c   : > { %v2293_v10 = vpop.f32.mrb[6].mxu0 }
 0x38d   : > { %v1303_v11 = vpop.f32.mrb[7].mxu0  ;;  %v1313_v13 = vmul.f32 0.35355338, %v2293_v10 }
 0x38e   : > { %v1312_v12 = vmul.f32 0.35355338, %v1303_v11  ;;  %v1639_v11 = vld [vmem:[%s2951_s15] sm:$0xff] }
 0x38f   : > { %v1317_v15 = vsel %vm1120_vm4, %v1313_v13, -inf }
 0x390   : > { %v1314_v14 = vsel %vm1030_vm3, %v1312_v12, -inf }
 0x391   : > { %1315 = vmax.xlane.f32.xlu0 %v1314_v14 }
 0x395   : > { %1318 = vmax.xlane.f32.xlu0 %v1317_v15 }
 0x3aa   : > { %v1123_v16 = vpop.xlane.xlu0 %1122 }
 0x3ab   : > { %v1125_v17 = vsub.f32 %v1116_v5, %v1123_v16  ;;  %v1119_v18 = vpop.xlane.xlu1 %1118 }
 0x3ac   : > { %v1124_v19 = vsub.f32 %v1115_v7, %v1119_v18 }
 0x3ad   : > { %v1128_v20 = vmul.f32 1.442695, %v1125_v17 }
 0x3ae   : > { %v1126_v21 = vmul.f32 1.442695, %v1124_v19 }
 0x3af   : > { %2426 = vpow2.f32 %v1128_v20 }
 0x3b0   : > { %2428 = vpow2.f32 %v1126_v21  ;;  %v2200_v21 = vld [vmem:[%s2949_s13] ss:$0 sm:$0xff] }
 0x3b9   : > { %v2427_v22 = vpop.eup %2426 }
 0x3ba   : > { %v2429_v23 = vpop.eup %2428  ;;  %v1133_v24 = vsel %vm1120_vm4, %v2427_v22, 0.0 }
 0x3bb   : > { %1134 = vadd.xlane.f32.xlu0 %v1133_v24  ;;  %v1130_v25 = vsel %vm1030_vm3, %v2429_v23, 0.0 }
 0x3bc   : > { %1131 = vadd.xlane.f32.xlu1 %v1130_v25  ;;  %v2201_v25 = vld [vmem:[%s2950_s14] ss:$0 sm:$0xff] }
 0x41e   : > { %v1316_v26 = vpop.xlane.xlu0 %1315 }
 0x41f   : > { %v1320_v27 = vsub.f32 %v1312_v12, %v1316_v26  ;;  %v1640_v12 = vld [vmem:[%s2951_s15 + $0x8] sm:$0xff] }
 0x421   : > { %v1322_v28 = vmul.f32 1.442695, %v1320_v27 }
 0x422   : > { %v1319_v29 = vpop.xlane.xlu0 %1318 }
 0x423   : > { %2430 = vpow2.f32 %v1322_v28  ;;  %v1321_v30 = vsub.f32 %v1313_v13, %v1319_v29  ;;  %v2349_v13 = vpack.c.bf16 %v1640_v12, %v1639_v11 }
 0x425   : > { %v1324_v31 = vmul.f32 1.442695, %v1321_v30  ;;  %v1783_v30 = vld [vmem:[%s2953_s17] sm:$0xff] }
 0x427   : > { %2432 = vpow2.f32 %v1324_v31  ;;  %v1784_v31 = vld [vmem:[%s2953_s17 + $0x8] sm:$0xff] }
 0x42d   : > { %v2431_v32 = vpop.eup %2430 }
 0x42e   : > { %v1326_v33 = vsel %vm1030_vm3, %v2431_v32, 0.0 }
 0x42f   : > { %1327 = vadd.xlane.f32.xlu1 %v1326_v33  ;;  %v1785_v33 = vld [vmem:[%s2953_s17 + $0x10] sm:$0xff] }
 0x431   : > { %v2433_v34 = vpop.eup %2432 }
 0x432   : > { %v1329_v35 = vsel %vm1120_vm4, %v2433_v34, 0.0 }
 0x433   : > { %1330 = vadd.xlane.f32.xlu0 %v1329_v35 }
 0x440   : > { %1140 = vrot.lane.b32.xlu1 %v1027_v60, %s2526_s0  ;;  %s2170_s0 = sshll.u32 %s755_s30, 3 }
 0x441   : > { %s757_s27 = scalar_lea.vmem [#allocation2], %s2170_s0 }
 0x442   : > { %s2061_s10 = sshll.u32 %s757_s27, 4  ;;  %s2889_s10 = int_to_ptr.vmem [resolvable:$true] %s2061_s10 }
 0x443   : > { %s2458_s6 = scalar_lea.vmem %s2889_s10, 128  ;;  %p2465_p0 = scmp.lt.s32.totalorder %s2889_s10, %s2463_s12 }
 0x444   : > { %p2459_p11 = scmp.ne.s32.totalorder %s2889_s10, %s2458_s6  ;;  %p2466_p1 = scmp.lt.s32.totalorder %s2464_s25, %s2458_s6 }
 0x446   : > { %p2460_p12 = pnand %p2459_p11, %p2692_p5  ;;  %p2467_p2 = por %p2466_p1, %p2465_p0 }
 0x448   : > { %v1135_v39 = vpop.xlane.xlu0 %1134  ;;  %p2461_p13 = pneg %p2460_p12 }
 0x449   : > { %1336 = vrot.lane.b32.xlu0 %v1027_v60, %s2527_s7  ;;  %v1132_v36 = vpop.xlane.xlu1 %1131 }
 0x44a   : > { %2434 = vrcp.f32 %v1132_v36  ;;  %v1787_v36 = vld [vmem:[%s2953_s17 + $0x20] sm:$0xff]  ;;  %p2468_p3 = pnand %p2467_p2, %p2461_p13 }
 0x44b   : > { %2436 = vrcp.f32 %v1135_v39  ;;  %v1789_v39 = vld [vmem:[%s2953_s17 + $0x30] sm:$0xff] }
 0x454   : > { %v2435_v37 = vpop.eup %2434 }
 0x455   : > { %v1137_v38 = vmul.f32 %v2435_v37, %v2429_v23  ;;  %v2437_v41 = vpop.eup %2436  ;;  %v1788_v37 = vld [vmem:[%s2953_s17 + $0x28] sm:$0xff] }
 0x456   : > { %v1139_v44 = vmul.f32 %v2437_v41, %v2427_v22 }
 0x457   : > { %2286 = vmatprep.mubr.msk.f32.mxu1 %vm1030_vm3, %v1137_v38  ;;  %v2361_v38 = vpack.c.bf16 %v1788_v37, %v1787_v36  ;;  %v2211_v36 = vld [vmem:[%s2954_s18] ss:$0 sm:$0xff] }
 0x4bc   : > { %v1328_v40 = vpop.xlane.xlu1 %1327 }
 0x4bd   : > { %2438 = vrcp.f32 %v1328_v40  ;;  %v1790_v40 = vld [vmem:[%s2953_s17 + $0x38] sm:$0xff] }
 0x4be   : > { %v2365_v41 = vpack.c.bf16 %v1790_v40, %v1789_v39 }
 0x4c0   : > { %v1331_v42 = vpop.xlane.xlu0 %1330  ;;  %v1141_v43 = vpop.permute.xlu1 %1140 }
 0x4c1   : > { %2440 = vrcp.f32 %v1331_v42  ;;  %2284 = vmatprep.subr.mxu1 %v1141_v43  ;;  %v2202_v42 = vld [vmem:[%s2952_s16] ss:$0 sm:$0xff] }
 0x4c2   : > { %2285 = vmatpush3.msra.mxu1 %v1141_v43 }
 0x4c3   : > { %2287 = vmatmul.mubr.msk.f32.vlgmr.msra.gmra.mrb[0].mxu1 %vm1030_vm3, %v1139_v44 }
 0x4c4   : > { %v1337_v45 = vpop.permute.xlu0 %1336 }
 0x4c5   : > { %2294 = vmatprep.subr.mxu1 %v1337_v45 }
 0x4c6   : > { %2295 = vmatpush3.msra.mxu1 %v1337_v45 }
 0x4c7   : > { %v2439_v46 = vpop.eup %2438  ;;  %2350 = vmatprep.subr.bf16.mxu1 %v2349_v13 }
 0x4c8   : > { %v1333_v47 = vmul.f32 %v2439_v46, %v2431_v32  ;;  %v2353_v32 = vpack.c.bf16 %v1784_v31, %v1783_v30 }
 0x4ca   : > { %2296 = vmatprep.mubr.msk.f32.mxu1 %vm1030_vm3, %v1333_v47 }
 0x4cb   : > { %v2441_v48 = vpop.eup %2440 }
 0x4cc   : > { %v1335_v49 = vmul.f32 %v2441_v48, %v2433_v34  ;;  %v1786_v34 = vld [vmem:[%s2953_s17 + $0x18] sm:$0xff] }
 0x4cd   : > { %v2357_v35 = vpack.c.bf16 %v1786_v34, %v1785_v33 }
 0x4ce   : > { %2297 = vmatmul.mubr.msk.f32.vlgmr.msra.gmra.mrb[2].mxu1 %vm1030_vm3, %v1335_v49 }
 0x4cf   : > { %2352 = vmatpush3.bf16.msra.mxu1 %v2349_v13 }
 0x4d0   : > { %2354 = vmatprep.subr.bf16.mxu1 %v2353_v32 }
 0x596   : > { %v2288_v52 = vpop.f32.mrb[0].mxu1 }
 0x597   : > { %v1215_v53 = vpop.f32.mrb[1].mxu1 }
 0x5a1   : > { %v2298_v54 = vpop.f32.mrb[2].mxu1 }
 0x5a2   : > { %v1411_v55 = vpop.f32.mrb[3].mxu1 }
 0x5a3   : > { %2301 = vmatprep.mubr.msk.f32.mxu0 %vm1030_vm3, %v1411_v55 }
 0x5a4   : > { %2302 = vmatmul.mubr.msk.f32.vlgmr.msra.gmra.mrb[8].mxu0 %vm1030_vm3, %v2298_v54 }
 0x5a5   : > { %2305 = vmatpush3.msra.mxu0 %v1224_v51  ;;  %2306 = vmatprep.mubr.msk.f32.mxu0 %vm1030_vm3, %v1215_v53 }
 0x5ac   : > { %2307 = vmatmul.mubr.msk.f32.vlgmr.msra.gmra.mrb[8].mxu0 %vm1030_vm3, %v2288_v52 }
 0x67f   : > { %v2308_v56 = vpop.f32.mrb[8].mxu0 }
 0x680   : > { %v1585_v58 = vadd.f32 %v2308_v56, %v2718_v1  ;;  %v1575_v59 = vpop.f32.mrb[9].mxu0 }
 0x681   : > { %v1584_v60 = vadd.f32 %v1575_v59, %v2711_v0 }
 0x682   : > { %v2798_v61 = vadd.f32 %v2199_v57, %v1585_v58 }
 0x683   : > { %v2800_v62 = vadd.f32 %v2199_v57, %v1584_v60 }
 0x684   : > { %v1600_v63 = vsel %vm788_vm1, %v2798_v61, 0.0 }
 0x685   : > { %1601 = vadd.xlane.f32.xlu0 %v1600_v63  ;;  %v1597_v2 = vsel %vm784_vm0, %v2800_v62, 0.0 }
 0x686   : > { %1598 = vadd.xlane.f32.xlu1 %v1597_v2 }
 0x712   : > { %v1602_v3 = vpop.xlane.xlu0 %1601 }
 0x713   : > { %v1604_v4 = vmul.f32 0.0625, %v1602_v3  ;;  %v1599_v5 = vpop.xlane.xlu1 %1598 }
 0x714   : > { %v1603_v6 = vmul.f32 0.0625, %v1599_v5 }
 0x715   : > { %v1606_v1 = vsub.f32 %v2798_v61, %v1604_v4 }
 0x716   : > { %v1605_v0 = vsub.f32 %v2800_v62, %v1603_v6 }
 0x717   : > { %v1608_v7 = vmul.f32 %v1606_v1, %v1606_v1 }
 0x718   : > { %v1607_v8 = vmul.f32 %v1605_v0, %v1605_v0 }
 0x719   : > { %v1612_v9 = vsel %vm788_vm1, %v1608_v7, 0.0 }
 0x71a   : > { %1613 = vadd.xlane.f32.xlu0 %v1612_v9  ;;  %v1609_v10 = vsel %vm784_vm0, %v1607_v8, 0.0 }
 0x71b   : > { %1610 = vadd.xlane.f32.xlu1 %v1609_v10 }
 0x7a7   : > { %v1614_v14 = vpop.xlane.xlu0 %1613 }
 0x7a8   : > { %v1616_v15 = vmul.f32 0.0625, %v1614_v14  ;;  %v1611_v16 = vpop.xlane.xlu1 %1610 }
 0x7a9   : > { %v1615_v17 = vmul.f32 0.0625, %v1611_v16 }
 0x7aa   : > { %v1618_v18 = vadd.f32 1e-05, %v1616_v15 }
 0x7ab   : > { %v1617_v19 = vadd.f32 1e-05, %v1615_v17 }
 0x7ac   : > { %2442 = vrsqrt.f32 %v1618_v18 }
 0x7ad   : > { %2444 = vrsqrt.f32 %v1617_v19 }
 0x7b6   : > { %v2443_v20 = vpop.eup %2442 }
 0x7b7   : > { %v2445_v22 = vpop.eup %2444  ;;  %v1622_v23 = vmul.f32 %v2443_v20, %v1606_v1 }
 0x7b8   : > { %v1621_v24 = vmul.f32 %v2445_v22, %v1605_v0 }
 0x7b9   : > { %v1630_v26 = vmul.f32 %v2200_v21, %v1622_v23 }
 0x7ba   : > { %v1629_v27 = vmul.f32 %v2200_v21, %v1621_v24 }
 0x7bb   : > { %v1638_v29 = vadd.f32 %v2201_v25, %v1630_v26 }
 0x7bc   : > { %v1637_v28 = vadd.f32 %v2201_v25, %v1629_v27 }
 0x7be   : > { %2313 = vmatprep.mubr.msk.f32.mxu1 %vm784_vm0, %v1637_v28 }
 0x7bf   : > { %2314 = vmatmul.mubr.msk.f32.vlgmr.msra.gmra.mrb[4].mxu1 %vm784_vm0, %v1638_v29 }
 0x7c0   : > { %2356 = vmatpush3.bf16.msra.mxu1 %v2353_v32 }
 0x7c1   : > { %2358 = vmatprep.subr.bf16.mxu1 %v2357_v35 }
 0x7c4   : > { %2360 = vmatpush3.bf16.msra.mxu1 %v2357_v35 }
 0x7c5   : > { %2362 = vmatprep.subr.bf16.mxu1 %v2361_v38 }
 0x7c8   : > { %2364 = vmatpush3.bf16.msra.mxu1 %v2361_v38 }
 0x7c9   : > { %2366 = vmatprep.subr.bf16.mxu1 %v2365_v41 }
 0x7cc   : > { %2368 = vmatpush3.bf16.msra.mxu1 %v2365_v41 }
 0x892   : > { %v2315_v43 = vpop.f32.mrb[4].mxu1 }
 0x893   : > { %v1726_v44 = vadd.f32 %v2315_v43, %v2202_v42  ;;  %v1720_v45 = vpop.f32.mrb[5].mxu1 }
 0x894   : > { %v1721_v46 = vadd.f32 %v2202_v42, %v1720_v45 }
 0x895   : > { %v1730_v47 = vmul.f32 0.70710677, %v1726_v44  ;;  %v1778_v32 = vmul.f32 0.5, %v1726_v44 }
 0x896   : > { %v1729_v48 = vmul.f32 0.70710677, %v1721_v46  ;;  %v1777_v30 = vmul.f32 0.5, %v1721_v46 }
 0x897   : > { %v1732_v49 = vand.u32 2147483647, %v1730_v47  ;;  %vm1772_vm5 = vcmp.lt.f32.partialorder %v1730_v47, 0.0 }
 0x898   : > { %v1731_v50 = vand.u32 2147483647, %v1729_v48  ;;  %vm1771_vm6 = vcmp.lt.f32.partialorder %v1729_v48, 0.0 }
 0x899   : > { %v1734_v51 = vmul.f32 0.3275911, %v1732_v49  ;;  %v1760_v55 = vsub.f32 0.0, %v1732_v49 }
 0x89a   : > { %v1733_v52 = vmul.f32 0.3275911, %v1731_v50  ;;  %v1759_v56 = vsub.f32 0.0, %v1731_v50 }
 0x89b   : > { %v1736_v53 = vadd.f32 1.0, %v1734_v51  ;;  %v1762_v58 = vmul.f32 %v1760_v55, %v1732_v49 }
 0x89c   : > { %v1735_v54 = vadd.f32 1.0, %v1733_v52  ;;  %v1761_v63 = vmul.f32 %v1759_v56, %v1731_v50  ;;  %v1928_v52 = vld [vmem:[%s2957_s21] sm:$0xff] }
 0x89d   : > { %2446 = vrcp.f32 %v1736_v53  ;;  %v1765_v4 = vmul.f32 1.442695, %v1762_v58  ;;  %v1929_v53 = vld [vmem:[%s2957_s21 + $0x8] sm:$0xff] }
 0x89e   : > { %2448 = vrcp.f32 %v1735_v54  ;;  %v1763_v1 = vmul.f32 1.442695, %v1761_v63  ;;  %v2369_v54 = vpack.c.bf16 %v1929_v53, %v1928_v52 }
 0x89f   : > { %2450 = vpow2.f32 %v1765_v4 }
 0x8a0   : > { %2452 = vpow2.f32 %v1763_v1  ;;  %2370 = vmatprep.subr.bf16.mxu0 %v2369_v54 }
 0x8a1   : > { %2372 = vmatpush3.bf16.msra.mxu0 %v2369_v54 }
 0x8a7   : > { %v2447_v57 = vpop.eup %2446 }
 0x8a8   : > { %v2449_v59 = vpop.eup %2448  ;;  %v1742_v60 = vmul.f32 1.0614054, %v2447_v57 }
 0x8a9   : > { %v1741_v2 = vmul.f32 1.0614054, %v2449_v59  ;;  %v2451_v18 = vpop.eup %2450 }
 0x8aa   : > { %v2206_v3 = vadd.f32 -1.4531521, %v1742_v60  ;;  %v2453_v20 = vpop.eup %2452 }
 0x8ab   : > { %v2205_v5 = vadd.f32 -1.4531521, %v1741_v2  ;;  %v2212_v2 = vld [vmem:[%s2955_s19] ss:$0 sm:$0xff] }
 0x8ac   : > { %v1746_v6 = vmul.f32 %v2447_v57, %v2206_v3 }
 0x8ad   : > { %v1745_v0 = vmul.f32 %v2449_v59, %v2205_v5 }
 0x8ae   : > { %v1748_v7 = vadd.f32 1.4214138, %v1746_v6  ;;  %v2213_v6 = vld [vmem:[%s2956_s20] ss:$0 sm:$0xff] }
 0x8af   : > { %v1747_v8 = vadd.f32 1.4214138, %v1745_v0 }
 0x8b0   : > { %v1750_v9 = vmul.f32 %v2447_v57, %v1748_v7 }
 0x8b1   : > { %v1749_v10 = vmul.f32 %v2449_v59, %v1747_v8 }
 0x8b2   : > { %v2208_v11 = vadd.f32 -0.28449672, %v1750_v9  ;;  %v2021_v9 = vld [vmem:[%s775_s2] sm:$0xff] }
 0x8b3   : > { %v2207_v12 = vadd.f32 -0.28449672, %v1749_v10  ;;  %v2214_v10 = vld [vmem:[%s2958_s22] ss:$0 sm:$0xff] }
 0x8b4   : > { %v1754_v13 = vmul.f32 %v2447_v57, %v2208_v11  ;;  %v2023_v11 = vrot.slane %v2021_v9, 7 }
 0x8b5   : > { %v1753_v14 = vmul.f32 %v2449_v59, %v2207_v12 }
 0x8b6   : > { %v1756_v15 = vadd.f32 0.2548296, %v1754_v13 }
 0x8b7   : > { %v1755_v16 = vadd.f32 0.2548296, %v1753_v14 }
 0x8b8   : > { %v1758_v17 = vmul.f32 %v2447_v57, %v1756_v15 }
 0x8b9   : > { %v1757_v19 = vmul.f32 %v2449_v59, %v1755_v16 }
 0x8ba   : > { %v1768_v21 = vmul.f32 %v2451_v18, %v1758_v17 }
 0x8bb   : > { %v1767_v22 = vmul.f32 %v2453_v20, %v1757_v19 }
 0x8bc   : > { %v1770_v23 = vsub.f32 1.0, %v1768_v21 }
 0x8bd   : > { %v1769_v24 = vsub.f32 1.0, %v1767_v22 }
 0x8be   : > { %v1774_v25 = vsub.f32 0.0, %v1770_v23 }
 0x8bf   : > { %v1773_v26 = vsub.f32 0.0, %v1769_v24 }
 0x8c0   : > { %v1776_v27 = vsel %vm1772_vm5, %v1774_v25, %v1770_v23 }
 0x8c1   : > { %v1780_v28 = vadd.f32 1.0, %v1776_v27  ;;  %v1775_v29 = vsel %vm1771_vm6, %v1773_v26, %v1769_v24 }
 0x8c2   : > { %v1779_v31 = vadd.f32 1.0, %v1775_v29 }
 0x8c3   : > { %v1782_v34 = vmul.f32 %v1780_v28, %v1778_v32 }
 0x8c4   : > { %v1781_v33 = vmul.f32 %v1779_v31, %v1777_v30 }
 0x8c6   : > { %2332 = vmatprep.mubr.msk.f32.mxu1 %vm1791_vm7, %v1781_v33 }
 0x8c7   : > { %2333 = vmatmul.mubr.msk.f32.vlgmr.msra.gmra.mrb[6].mxu1 %vm1791_vm7, %v1782_v34 }
 0x99a   : > { %v2334_v35 = vpop.f32.mrb[6].mxu1 }
 0x99b   : > { %v1874_v37 = vadd.f32 %v2334_v35, %v2798_v61  ;;  %v1864_v38 = vpop.f32.mrb[7].mxu1 }
 0x99c   : > { %v1873_v39 = vadd.f32 %v1864_v38, %v2800_v62 }
 0x99d   : > { %v1883_v40 = vadd.f32 %v2211_v36, %v1874_v37 }
 0x99e   : > { %v1882_v41 = vadd.f32 %v2211_v36, %v1873_v39 }
 0x99f   : > { %v1889_v42 = vsel %vm788_vm1, %v1883_v40, 0.0 }
 0x9a0   : > { %1890 = vadd.xlane.f32.xlu0 %v1889_v42  ;;  %v1886_v43 = vsel %vm784_vm0, %v1882_v41, 0.0 }
 0x9a1   : > { %1887 = vadd.xlane.f32.xlu1 %v1886_v43 }
 0xa2d   : > { %v1891_v44 = vpop.xlane.xlu0 %1890 }
 0xa2e   : > { %v1893_v45 = vmul.f32 0.0625, %v1891_v44  ;;  %v1888_v46 = vpop.xlane.xlu1 %1887 }
 0xa2f   : > { %v1892_v47 = vmul.f32 0.0625, %v1888_v46 }
 0xa30   : > { %v1895_v48 = vsub.f32 %v1883_v40, %v1893_v45 }
 0xa31   : > { %v1894_v49 = vsub.f32 %v1882_v41, %v1892_v47 }
 0xa32   : > { %v1897_v50 = vmul.f32 %v1895_v48, %v1895_v48 }
 0xa33   : > { %v1896_v51 = vmul.f32 %v1894_v49, %v1894_v49 }
 0xa34   : > { %v1901_v61 = vsel %vm788_vm1, %v1897_v50, 0.0 }
 0xa35   : > { %1902 = vadd.xlane.f32.xlu0 %v1901_v61  ;;  %v1898_v62 = vsel %vm784_vm0, %v1896_v51, 0.0 }
 0xa36   : > { %1899 = vadd.xlane.f32.xlu1 %v1898_v62 }
 0xac2   : > { %v1903_v55 = vpop.xlane.xlu0 %1902 }
 0xac3   : > { %v1905_v56 = vmul.f32 0.0625, %v1903_v55  ;;  %v1900_v57 = vpop.xlane.xlu1 %1899 }
 0xac4   : > { %v1904_v58 = vmul.f32 0.0625, %v1900_v57 }
 0xac5   : > { %v1907_v59 = vadd.f32 1e-05, %v1905_v56 }
 0xac6   : > { %v1906_v60 = vadd.f32 1e-05, %v1904_v58 }
 0xac7   : > { %2454 = vrsqrt.f32 %v1907_v59 }
 0xac8   : > { %2456 = vrsqrt.f32 %v1906_v60 }
 0xad1   : > { %v2455_v63 = vpop.eup %2454 }
 0xad2   : > { %v2457_v3 = vpop.eup %2456  ;;  %v1911_v4 = vmul.f32 %v2455_v63, %v1895_v48 }
 0xad3   : > { %v1910_v5 = vmul.f32 %v2457_v3, %v1894_v49 }
 0xad4   : > { %v1919_v1 = vmul.f32 %v2212_v2, %v1911_v4 }
 0xad5   : > { %v1918_v0 = vmul.f32 %v2212_v2, %v1910_v5 }
 0xad6   : > { %v1927_v8 = vadd.f32 %v2213_v6, %v1919_v1 }
 0xad7   : > { %v1926_v7 = vadd.f32 %v2213_v6, %v1918_v0 }
 0xad9   : > { %2339 = vmatprep.mubr.msk.f32.mxu0 %vm784_vm0, %v1926_v7 }
 0xada   : > { %2340 = vmatmul.mubr.msk.f32.vlgmr.msra.gmra.mrb[10].mxu0 %vm784_vm0, %v1927_v8 }
 0xbad   : > { %v2341_v12 = vpop.f32.mrb[10].mxu0 }
 0xbae   : > { %v2015_v13 = vadd.f32 %v2341_v12, %v2214_v10  ;;  %v2009_v14 = vpop.f32.mrb[11].mxu0 }
 0xbaf   : > { %v2010_v15 = vadd.f32 %v2214_v10, %v2009_v14 }
 0xbb0   : > { %2020 = vst.msk [vmem:[%s757_s27 + $0x7] sm:$0x1] %vm788_vm1, %v2015_v13  ;;  %v2026_v16 = vsub.f32 %v2015_v13, %v2023_v11 }
 0xbb1   : > { %2019 = vst.msk [vmem:[%s757_s27 - $0x1] sm:$0xfe] %vm2018_vm8, %v2010_v15  ;;  %v2025_v17 = vsub.f32 %v2010_v15, %v2023_v11 }
 0xbb2   : > { %v2028_v18 = vmul.f32 %v2026_v16, %v2026_v16 }
 0xbb3   : > { %2471 = shalt.err (!%p2468_p3)
}
 0xbb4   : > { %s2472_s30 = scalar_lea.hbm %s2887_s29, 128  ;;  %s2476_s2 = scalar_lea.hbm %s2959_s23, 256 }
 0xbb5   : > { %p2473_p4 = scmp.ne.s32.totalorder %s2887_s29, %s2472_s30  ;;  %p2477_p9 = scmp.lt.u32.totalorder %s2887_s29, %s2959_s23 }
 0xbb6   : > { %p2478_p10 = scmp.lt.u32.totalorder %s2476_s2, %s2472_s30  ;;  %p2480_p12 = scmp.lt.u32.totalorder %s2472_s30, %s2887_s29 }
 0xbb7   : > { %p2474_p7 = pnand %p2473_p4, %p2692_p5 }
 0xbb8   : > { %p2479_p11 = por %p2478_p10, %p2477_p9 }
 0xbb9   : > { %p2475_p8 = pneg %p2474_p7 }
 0xbba   : > { %p2481_p13 = por %p2480_p12, %p2479_p11 }
 0xbbc   : > { %p2482_p0 = pnand %p2481_p13, %p2475_p8 }
 0xbbe   : > { %2485 = shalt.err (!%p2482_p0)
}
 0xbbf   : > { %2375 = dma.vmem_to_hbm [thread:$0]  (%p2692_p5), %s2889_s10, 128, %s2887_s29, %s2045_s9   ;;  %v2027_v19 = vmul.f32 %v2025_v17, %v2025_v17  ;;  %v2033_v20 = vrot.slane %v2028_v18, 1  ;;  %vm2031_vm9 = vcmask 1046528  }
 0xbc0   : > { %s778_s3 = scalar_lea.vmem %s2960_s24, %s2704_s8 }
 0xbc1   : > { %v2032_v21 = vrot.slane %v2027_v19, 1 }
 0xbc3   : > { %v2034_v22 = vsel %vm2031_vm9, %v2032_v21, %v2033_v20 }
 0xbc4   : > { %v2036_v23 = vsel %vm784_vm0, %v2034_v22, 0.0 }
 0xbc5   : > { %v2037_v24 = vrot.slane %v2036_v23, 4 }
 0xbc7   : > { %v2038_v25 = vadd.f32 %v2037_v24, %v2036_v23 }
 0xbc9   : > { %v2039_v26 = vrot.slane %v2038_v25, 2 }
 0xbcb   : > { %v2040_v27 = vadd.f32 %v2039_v26, %v2038_v25 }
 0xbcd   : > { %v2041_v28 = vrot.slane %v2040_v27, 1 }
 0xbcf   : > { %v2042_v29 = vadd.f32 %v2041_v28, %v2040_v27 }
 0xbd1   : > { %2043 = vst.msk [vmem:[%s778_s3] sm:$0x1] %vm788_vm1, %v2042_v29 }
 0xbd2 PF: > { %s3003_s10 = sld [smem:[#allocation5_spill]]  ;;  %p2381_p5 = scmp.ge.s32.totalorder %s2520_s28, 2 }
 0xbd4   : > { %p2378_p1 = pnand %p2381_p5, %p2696_p6 }
 0xbd8   : > { %s2076_s9 = sand.u32 1, %s3003_s10  }
 0xbd9   : > { %s2077_s6 = scalar_lea.sflag [#allocation3], %s2076_s9 }
 0xbda   : > { %2503 = dma.done.wait (!%p2378_p1), %s2077_s6, 128  }
 0xbdb   : > { %2505 = vsyncadd (!%p2378_p1), %s2077_s6, 4294967168  ;;  %s3005_s28 = sld [smem:[#allocation7_spill]]  ;;  %s3006_s11 = sld [smem:[#allocation6_spill]] }
 0xbdc   : > { %s3007_s27 = sld [smem:[#allocation8_spill]]  ;;  %s3008_s5 = smov %s2512_s26 }
 0xbe1   : > { %p35_p2 = scmp.ge.s32.totalorder %s3005_s28, 4   ;;  %s3009_s26 = smov %s3006_s11 }
 0xbe3   :  { %37 = sbr.rel (!%p35_p2) target bundleno = 17 (0x11), region = 166 }
 0xbea   :  { %2088 = vsyncpa [#allocation3], 1 }
 0xbeb   :  { %2090 = vsyncpa [#allocation3 + $0x1], 1 }

// kernel: cinema_forward.2
= control target key start
LH: loop header
LB: loop body
LE: loop exit
PB: predicated region body
PF: predicated region fallthrough
CT: control target
= control target key end

     0   :  { %s5960_s0 = inlined_call_operand.vmem [shape: f32[2,9,16], index: 0, kind: input, shape index: {}]   ;;  %s5961_s1 = inlined_call_operand.vmem [shape: f32[2,9,32], index: 1, kind: input, shape index: {}]   ;;  %s5962_s2 = inlined_call_operand.vmem [shape: f32[16,32], index: 2, kind: input, shape index: {}]   ;;  %s5963_s3 = inlined_call_operand.vmem [shape: f32[2,1,32], index: 3, kind: input, shape index: {}]   ;;  %s5964_s4 = inlined_call_operand.vmem [shape: f32[2,1,32], index: 4, kind: input, shape index: {}]   ;;  %s5965_s5 = inlined_call_operand.vmem [shape: f32[2,32,96], index: 5, kind: input, shape index: {}]   ;;  %s5966_s6 = inlined_call_operand.vmem [shape: f32[2,1,96], index: 6, kind: input, shape index: {}]   ;;  %s5967_s7 = inlined_call_operand.vmem [shape: f32[8,8,32], index: 7, kind: input, shape index: {}]   ;;  %s5968_s8 = inlined_call_operand.vmem [shape: f32[2,1,32], index: 8, kind: input, shape index: {}]   ;;  %s5969_s9 = inlined_call_operand.vmem [shape: f32[2,1,32], index: 9, kind: input, shape index: {}]   ;;  %s5970_s10 = inlined_call_operand.vmem [shape: f32[2,1,32], index: 10, kind: input, shape index: {}]   ;;  %s5971_s11 = inlined_call_operand.vmem [shape: f32[2,32,128], index: 11, kind: input, shape index: {}]   ;;  %s5972_s12 = inlined_call_operand.vmem [shape: f32[2,1,128], index: 12, kind: input, shape index: {}]   ;;  %s5973_s13 = inlined_call_operand.vmem [shape: f32[2,128,32], index: 13, kind: input, shape index: {}]   ;;  %s5974_s14 = inlined_call_operand.vmem [shape: f32[2,1,32], index: 14, kind: input, shape index: {}]   ;;  %s5975_s15 = inlined_call_operand.vmem [shape: f32[1,32], index: 15, kind: input, shape index: {}]   ;;  %s5976_s16 = inlined_call_operand.vmem [shape: f32[1,32], index: 16, kind: input, shape index: {}]   ;;  %s5977_s17 = inlined_call_operand.vmem [shape: f32[1,32], index: 17, kind: input, shape index: {}]   ;;  %s5978_s18 = inlined_call_operand.vmem [shape: f32[1,32], index: 18, kind: input, shape index: {}]   ;;  %s5979_s19 = inlined_call_operand.vmem [shape: f32[32,16], index: 19, kind: input, shape index: {}]   ;;  %s5980_s20 = inlined_call_operand.vmem [shape: f32[1,16], index: 20, kind: input, shape index: {}]   ;;  %s5981_s21 = inlined_call_operand.vmem [shape: f32[2,9,16], index: 21, kind: output, shape index: {}]  }
   0x1   :  { %5999 = sst [smem:[#allocation2_spill]] %s5960_s0 }
   0x2   :  { %6000 = sst [smem:[#allocation3_spill]] %s5961_s1 }
   0x3   :  { %6001 = sst [smem:[#allocation4_spill]] %s5962_s2  ;;  %s5373_s2 = smov 0  }
   0x4   :  { %6002 = sst [smem:[#allocation5_spill]] %s5963_s3 }
   0x5   :  { %6003 = sst [smem:[#allocation6_spill]] %s5964_s4 }
   0x6   :  { %6004 = sst [smem:[#allocation7_spill]] %s5965_s5 }
   0x7 LB: > { %s4213_s25 = sadd.s32 4294967295, %s5249_s2   ;;  %p4217_p0 = scmp.ge.s32.totalorder %s5249_s2, 1  ;;  %s5249_s2 = sphi %s5373_s2, %s31_s2  }
   0x8   : > { %p597_p1 = scmp.lt.s32.totalorder %s5249_s2, 3 }
   0xa   : > { %p598_p2 = pnand %p4217_p0, %p597_p1 }
   0xb   : > { %s6005_s3 = sld [smem:[#allocation4_spill]] (!%p598_p2)  ;;  %p662_p3 = scmp.lt.s32.totalorder (!%p598_p2), %s4213_s25, 1  ;;  %vm683_vm0 = vcmask (!%p598_p2), 130048   ;;  %vm767_vm1 = vcmask (!%p598_p2), 261120   ;;  %vm771_vm2 = vcmask (!%p598_p2), 253952   ;;  %vm910_vm3 = vcmask (!%p598_p2), 64512  }
   0xc   : > { %601 = sbr.rel (%p598_p2) target bundleno = 7790 (0x1e6e), region = 104  ;;  %s6006_s5 = sld [smem:[#allocation2_spill]] (!%p598_p2)  ;;  %v4228_v45 = vld [vmem:[%s5966_s6] ss:$0 sm:$0xff] (!%p598_p2)  ;;  %vm5460_vm4 = vmpackc.low (!%p598_p2), %vm910_vm3, %vm910_vm3  ;;  %vm1000_vm5 = vcmask (!%p598_p2), 65536   ;;  %vm996_vm6 = vcmask (!%p598_p2), 72704  }
   0xd   : > { %s6007_s24 = sld [smem:[#allocation3_spill]] (!%p598_p2)  ;;  %s6008_s28 = sld [smem:[#allocation7_spill]] (!%p598_p2)  ;;  %vm1031_vm7 = vcmask (!%p598_p2), 1040384   ;;  %vm5260_vm8 = vmmov (!%p598_p2), 1   ;;  %vm4144_vm15 = vcmask (!%p598_p2), 122880  }
   0xe   : > { %s6010_s29 = sld [smem:[#allocation6_spill]] (!%p598_p2)  ;;  %s5996_s23 = smov (!%p598_p2), 120   ;;  %vm5503_vm9 = vmpackc.low (!%p598_p2), %vm1031_vm7, %vm5260_vm8 }
   0xf   : > { %s5986_s1 = smov (!%p598_p2), 80   ;;  %s5989_s27 = smov (!%p598_p2), 72  }
  0x10   : > { %s5987_s4 = smov (!%p598_p2), 104   ;;  %s5992_s30 = smov (!%p598_p2), 56  }
  0x11   : > { %v679_v0 = vld [vmem:[%s6005_s3] sm:$0xff] (!%p598_p2)  ;;  %v680_v1 = vld [vmem:[%s6005_s3 + $0x8] sm:$0xff] (!%p598_p2) }
  0x12   : > { %v4823_v2 = vpack.c.bf16 (!%p598_p2), %v680_v1, %v679_v0 }
  0x13   : > { %s6026_s25 = smov (!%p662_p3, %s4213_s25), 1  ;;  %v812_v23 = vld [vmem:[%s6008_s28] sm:$0xff]  ;;  %v813_v24 = vld [vmem:[%s6008_s28 + $0x8] sm:$0xff]  ;;  %v814_v26 = vld [vmem:[%s6008_s28 + $0x10] sm:$0xff] }
  0x14   : > { %4824 = vmatprep.subr.bf16.mxu0 %v4823_v2  ;;  %s5387_s0 = sshll.u32 %s6026_s25, 4  ;;  %v4827_v25 = vpack.c.bf16 %v813_v24, %v812_v23  ;;  %v815_v27 = vld [vmem:[%s6008_s28 + $0x18] sm:$0xff]  ;;  %v4227_v38 = vld [vmem:[%s6010_s29] ss:$0 sm:$0xff]  ;;  %s5995_s25 = smov 64  }
  0x15   : > { %4826 = vmatpush3.bf16.msra.mxu0 %v4823_v2  ;;  %s666_s22 = scalar_lea.vmem %s6006_s5, %s5387_s0  ;;  %s671_s26 = scalar_lea.vmem %s6007_s24, %s5387_s0  ;;  %v4831_v28 = vpack.c.bf16 %v815_v27, %v814_v26 }
  0x16   : > { %v677_v3 = vld [vmem:[%s666_s22] sm:$0xff]  ;;  %v678_v4 = vld [vmem:[%s666_s22 + $0x8] sm:$0x1]  ;;  %4828 = vmatprep.subr.bf16.mxu0 %v4827_v25  ;;  %s5998_s5 = smov 88   ;;  %s5252_s22 = smov 96  }
  0x17   : > { %4543 = vmatprep.mubr.msk.f32.mxu0 %vm683_vm0, %v677_v3  ;;  %v682_v5 = vld [vmem:[%s671_s26 + $0x8] sm:$0x1]  ;;  %v681_v6 = vld [vmem:[%s671_s26] sm:$0xff]  ;;  %s6009_s26 = sld [smem:[#allocation5_spill]]  ;;  %s5990_s24 = smov 112  }
  0x18   : > { %4544 = vmatmul.mubr.msk.f32.vlgmr.msra.gmra.mrb[0].mxu0 %vm683_vm0, %v678_v4 }
  0x19   : > { %4830 = vmatpush3.bf16.msra.mxu0 %v4827_v25 }
  0x1a   : > { %4832 = vmatprep.subr.bf16.mxu0 %v4831_v28 }
  0x1d   : > { %4834 = vmatpush3.bf16.msra.mxu0 %v4831_v28  ;;  %v4226_v36 = vld [vmem:[%s6009_s26] ss:$0 sm:$0xff] }
  0xeb   : > { %v4545_v7 = vpop.f32.mrb[0].mxu0 }
  0xec   : > { %v5399_v8 = vadd.f32 %v4545_v7, %v682_v5  ;;  %v756_v9 = vpop.f32.mrb[1].mxu0 }
  0xed   : > { %v5401_v10 = vadd.f32 %v756_v9, %v681_v6 }
  0xee   : > { %v772_v12 = vsel %vm771_vm2, %v5399_v8, 0.0 }
  0xef   : > { %v768_v11 = vsel %vm767_vm1, %v5401_v10, 0.0 }
  0xf0   : > { %769 = vadd.xlane.f32.xlu0 %v768_v11 }
  0xf4   : > { %773 = vadd.xlane.f32.xlu0 %v772_v12 }
 0x17d   : > { %v770_v13 = vpop.xlane.xlu0 %769 }
 0x17e   : > { %v776_v14 = vmul.f32 0.03125, %v770_v13 }
 0x180   : > { %v778_v15 = vsub.f32 %v5401_v10, %v776_v14 }
 0x181   : > { %v774_v16 = vpop.xlane.xlu0 %773 }
 0x182   : > { %v777_v17 = vmul.f32 0.03125, %v774_v16  ;;  %v780_v18 = vmul.f32 %v778_v15, %v778_v15 }
 0x184   : > { %v779_v19 = vsub.f32 %v5399_v8, %v777_v17  ;;  %v782_v20 = vsel %vm767_vm1, %v780_v18, 0.0 }
 0x185   : > { %783 = vadd.xlane.f32.xlu1 %v782_v20 }
 0x186   : > { %v781_v21 = vmul.f32 %v779_v19, %v779_v19 }
 0x188   : > { %v785_v22 = vsel %vm771_vm2, %v781_v21, 0.0 }
 0x189   : > { %786 = vadd.xlane.f32.xlu1 %v785_v22 }
 0x212   : > { %v784_v29 = vpop.xlane.xlu1 %783 }
 0x213   : > { %v788_v30 = vmul.f32 0.03125, %v784_v29 }
 0x215   : > { %v790_v31 = vadd.f32 1e-05, %v788_v30 }
 0x216   : > { %v787_v32 = vpop.xlane.xlu1 %786 }
 0x217   : > { %5139 = vrsqrt.f32 %v790_v31  ;;  %v789_v33 = vmul.f32 0.03125, %v787_v32 }
 0x219   : > { %v791_v34 = vadd.f32 1e-05, %v789_v33 }
 0x21b   : > { %5141 = vrsqrt.f32 %v791_v34 }
 0x221   : > { %v5140_v35 = vpop.eup %5139 }
 0x222   : > { %v794_v37 = vmul.f32 %v5140_v35, %v778_v15 }
 0x224   : > { %v802_v39 = vmul.f32 %v4226_v36, %v794_v37 }
 0x225   : > { %v5142_v40 = vpop.eup %5141 }
 0x226   : > { %v795_v41 = vmul.f32 %v5142_v40, %v779_v19  ;;  %v810_v42 = vadd.f32 %v4227_v38, %v802_v39 }
 0x228   : > { %v803_v43 = vmul.f32 %v4226_v36, %v795_v41  ;;  %4554 = vmatprep.mubr.msk.f32.mxu0 %vm767_vm1, %v810_v42 }
 0x22a   : > { %v811_v44 = vadd.f32 %v4227_v38, %v803_v43 }
 0x22c   : > { %4555 = vmatmul.mubr.msk.f32.vlgmr.msra.gmra.mrb[2].mxu0 %vm767_vm1, %v811_v44 }
 0x2ff   : > { %v4556_v46 = vpop.f32.mrb[2].mxu0 }
 0x300   : > { %v5434_v47 = vadd.f32 %v4556_v46, %v4228_v45  ;;  %v895_v48 = vpop.f32.mrb[3].mxu0 }
 0x301   : > { %v5436_v49 = vadd.f32 %v4228_v45, %v895_v48 }
 0x303   : > { %4561 = vmatprep.mubr.msk.f32.mxu0 %vm910_vm3, %v5436_v49  ;;  %v5442_v50 = vpack.i.bf16 %v5434_v47, %v5436_v49 }
 0x305   : > { %5065 = vrot.lane.b32.xlu1 %v5442_v50, %s5998_s5  ;;  %5060 = vrot.lane.b32.xlu0 %v5442_v50, %s5252_s22  ;;  %s6021_s5 = smov 104  }
 0x309   : > { %1110 = vrot.lane.b32.xlu1 %v5436_v49, %s5996_s23  ;;  %5070 = vrot.lane.b32.xlu0 %v5442_v50, %s5986_s1  ;;  %s6019_s1 = smov 112  }
 0x30d   : > { %1112 = vrot.lane.b32.xlu1 %v5434_v47, %s5996_s23  ;;  %1479 = vrot.lane.b32.xlu0 %v5434_v47, %s5990_s24  ;;  %s6022_s23 = smov 80  }
 0x311   : > { %1477 = vrot.lane.b32.xlu1 %v5436_v49, %s5990_s24  ;;  %s6015_s24 = smov 88  }
 0x377   : > { %v5066_v51 = vpop.permute.xlu1 %5065  ;;  %v5061_v52 = vpop.permute.xlu0 %5060 }
 0x378   : > { %v5068_v53 = vunpack.i.h.bf16 %v5066_v51  ;;  %v5067_v54 = vunpack.i.l.bf16 %v5066_v51  ;;  %v5063_v55 = vunpack.i.h.bf16 %v5061_v52  ;;  %v5062_v56 = vunpack.i.l.bf16 %v5061_v52 }
 0x37a   : > { %v4835_v58 = vpack.c.bf16 %v5063_v55, %v5062_v56  ;;  %v4847_v59 = vpack.c.bf16 %v5068_v53, %v5067_v54 }
 0x37b   : > { %v5071_v60 = vpop.permute.xlu0 %5070  ;;  %v1111_v61 = vpop.permute.xlu1 %1110 }
 0x37c   : > { %4837 = vmatprep.subr.msk.bf16.mxu0 %vm5460_vm4, %v4835_v58  ;;  %v5073_v62 = vunpack.i.h.bf16 %v5071_v60  ;;  %v5072_v63 = vunpack.i.l.bf16 %v5071_v60 }
 0x37d   : > { %4840 = vmatpush3.bf16.xpose.msk.msra.mxu0 %vm5460_vm4, %v4835_v58 }
 0x37e   : > { %4849 = vmatprep.subr.msk.bf16.mxu0 %vm5460_vm4, %v4847_v59  ;;  %v4859_v0 = vpack.c.bf16 %v5073_v62, %v5072_v63 }
 0x37f   : > { %v1113_v1 = vpop.permute.xlu1 %1112  ;;  %v1480_v3 = vpop.permute.xlu0 %1479 }
 0x383   : > { %v1478_v2 = vpop.permute.xlu1 %1477 }
 0x384   : > { %4562 = vmatmul.mubr.msk.f32.vlgmr.msra.gmra.mrb[4].mxu0 %vm910_vm3, %v5434_v47 }
 0x385   : > { %4852 = vmatpush3.bf16.xpose.msk.msra.mxu0 %vm5460_vm4, %v4847_v59  ;;  %4575 = vmatprep.mubr.msk.f32.mxu0 %vm910_vm3, %v1111_v61 }
 0x386   : > { %4861 = vmatprep.subr.msk.bf16.mxu0 %vm5460_vm4, %v4859_v0 }
 0x38c   : > { %4576 = vmatmul.mubr.msk.f32.vlgmr.msra.gmra.mrb[6].mxu0 %vm910_vm3, %v1113_v1 }
 0x38d   : > { %4864 = vmatpush3.bf16.xpose.msk.msra.mxu0 %vm5460_vm4, %v4859_v0  ;;  %4599 = vmatprep.mubr.msk.f32.mxu0 %vm910_vm3, %v1478_v2 }
 0x394   : > { %4600 = vmatmul.mubr.msk.f32.vlgmr.msra.gmra.mrb[8].mxu0 %vm910_vm3, %v1480_v3 }
 0x457   : > { %v4563_v4 = vpop.f32.mrb[4].mxu0 }
 0x458   : > { %v995_v5 = vmul.f32 0.35355338, %v4563_v4  ;;  %v985_v6 = vpop.f32.mrb[5].mxu0 }
 0x459   : > { %v994_v7 = vmul.f32 0.35355338, %v985_v6 }
 0x45a   : > { %v1001_v9 = vsel %vm1000_vm5, %v995_v5, -inf }
 0x45b   : > { %1002 = vmax.xlane.f32.xlu0 %v1001_v9  ;;  %v997_v11 = vsel %vm996_vm6, %v994_v7, -inf }
 0x45c   : > { %998 = vmax.xlane.f32.xlu1 %v997_v11 }
 0x45f   : > { %v4577_v12 = vpop.f32.mrb[6].mxu0 }
 0x460   : > { %v1192_v13 = vpop.f32.mrb[7].mxu0  ;;  %v1202_v15 = vmul.f32 0.35355338, %v4577_v12 }
 0x461   : > { %v1201_v14 = vmul.f32 0.35355338, %v1192_v13 }
 0x462   : > { %v1206_v18 = vsel %vm1000_vm5, %v1202_v15, -inf }
 0x463   : > { %v1203_v16 = vsel %vm996_vm6, %v1201_v14, -inf }
 0x464   : > { %1204 = vmax.xlane.f32.xlu0 %v1203_v16 }
 0x467   : > { %v4601_v17 = vpop.f32.mrb[8].mxu0 }
 0x468   : > { %v1559_v19 = vpop.f32.mrb[9].mxu0  ;;  %1207 = vmax.xlane.f32.xlu0 %v1206_v18  ;;  %v1569_v42 = vmul.f32 0.35355338, %v4601_v17 }
 0x469   : > { %v1568_v40 = vmul.f32 0.35355338, %v1559_v19 }
 0x46a   : > { %v1573_v43 = vsel %vm1000_vm5, %v1569_v42, -inf }
 0x46b   : > { %v1570_v41 = vsel %vm996_vm6, %v1568_v40, -inf }
 0x4e8   : > { %v1003_v20 = vpop.xlane.xlu0 %1002 }
 0x4e9   : > { %v1005_v21 = vsub.f32 %v995_v5, %v1003_v20  ;;  %v999_v22 = vpop.xlane.xlu1 %998 }
 0x4ea   : > { %v1004_v23 = vsub.f32 %v994_v7, %v999_v22  ;;  %v1109_v22 = vld [vmem:[%s5967_s7] sm:$0xff] }
 0x4eb   : > { %v1008_v24 = vmul.f32 1.442695, %v1005_v21  ;;  %v4245_v21 = vld [vmem:[%s5967_s7 + $0x8] sm:$0xff] }
 0x4ec   : > { %v1006_v25 = vmul.f32 1.442695, %v1004_v23 }
 0x4ed   : > { %5143 = vpow2.f32 %v1008_v24 }
 0x4ee   : > { %5145 = vpow2.f32 %v1006_v25 }
 0x4f1   : > { %v1205_v26 = vpop.xlane.xlu0 %1204 }
 0x4f2   : > { %v1209_v27 = vsub.f32 %v1201_v14, %v1205_v26 }
 0x4f4   : > { %v1211_v28 = vmul.f32 1.442695, %v1209_v27 }
 0x4f5   : > { %v1208_v29 = vpop.xlane.xlu0 %1207 }
 0x4f6   : > { %5147 = vpow2.f32 %v1211_v28  ;;  %v1210_v30 = vsub.f32 %v1202_v15, %v1208_v29 }
 0x4f7   : > { %v5144_v31 = vpop.eup %5143 }
 0x4f8   : > { %v5146_v32 = vpop.eup %5145  ;;  %v1213_v33 = vmul.f32 1.442695, %v1210_v30  ;;  %v1013_v34 = vsel %vm1000_vm5, %v5144_v31, 0.0 }
 0x4f9   : > { %1014 = vadd.xlane.f32.xlu0 %v1013_v34  ;;  %v1010_v35 = vsel %vm996_vm6, %v5146_v32, 0.0 }
 0x4fa   : > { %5149 = vpow2.f32 %v1213_v33  ;;  %1011 = vadd.xlane.f32.xlu1 %v1010_v35 }
 0x500   : > { %v5148_v36 = vpop.eup %5147 }
 0x501   : > { %v1215_v37 = vsel %vm996_vm6, %v5148_v36, 0.0 }
 0x502   : > { %1216 = vadd.xlane.f32.xlu1 %v1215_v37 }
 0x504   : > { %v5150_v38 = vpop.eup %5149 }
 0x505   : > { %v1218_v39 = vsel %vm1000_vm5, %v5150_v38, 0.0 }
 0x506   : > { %1219 = vadd.xlane.f32.xlu0 %v1218_v39 }
 0x513   : > { %5075 = vrot.lane.b32.xlu1 %v5442_v50, %s5995_s25  ;;  %s6020_s25 = smov 72  }
 0x517   : > { %5085 = vrot.lane.b32.xlu1 %v5442_v50, %s5989_s27  ;;  %s5993_s27 = smov 40  }
 0x51b   : > { %1765 = vrot.lane.b32.xlu1 %v5436_v49, %s5987_s4 }
 0x51c   : > { %5080 = vrot.lane.b32.xlu0 %v5442_v50, %s5992_s30  ;;  %s5994_s30 = smov 48  }
 0x51f   : > { %1767 = vrot.lane.b32.xlu1 %v5434_v47, %s5987_s4  ;;  %s6016_s4 = smov 120  }
 0x53b   : > { %1571 = vmax.xlane.f32.xlu0 %v1570_v41 }
 0x543   : > { %1574 = vmax.xlane.f32.xlu1 %v1573_v43  ;;  %v4257_v43 = vld [vmem:[%s5967_s7 + $0x10] sm:$0xff] }
 0x586   : > { %v1015_v45 = vpop.xlane.xlu0 %1014 }
 0x587   : > { %v1012_v44 = vpop.xlane.xlu1 %1011 }
 0x588   : > { %5151 = vrcp.f32 %v1012_v44 }
 0x589   : > { %5153 = vrcp.f32 %v1015_v45 }
 0x58f   : > { %v1217_v46 = vpop.xlane.xlu1 %1216 }
 0x590   : > { %5155 = vrcp.f32 %v1217_v46 }
 0x592   : > { %v5152_v48 = vpop.eup %5151 }
 0x593   : > { %v1220_v49 = vpop.xlane.xlu0 %1219  ;;  %v5076_v51 = vpop.permute.xlu1 %5075  ;;  %v1017_v52 = vmul.f32 %v5152_v48, %v5146_v32 }
 0x594   : > { %5157 = vrcp.f32 %v1220_v49  ;;  %v5078_v47 = vunpack.i.h.bf16 %v5076_v51  ;;  %v5077_v53 = vunpack.i.l.bf16 %v5076_v51  ;;  %v5154_v56 = vpop.eup %5153 }
 0x595   : > { %4568 = vmatprep.mubr.msk.f32.mxu1 %vm996_vm6, %v1017_v52  ;;  %v1019_v3 = vmul.f32 %v5154_v56, %v5144_v31 }
 0x596   : > { %v4841_v55 = vpack.c.bf16 %v5078_v47, %v5077_v53 }
 0x597   : > { %v5081_v58 = vpop.permute.xlu0 %5080  ;;  %v5086_v59 = vpop.permute.xlu1 %5085 }
 0x598   : > { %v5083_v60 = vunpack.i.h.bf16 %v5081_v58  ;;  %v5082_v61 = vunpack.i.l.bf16 %v5081_v58  ;;  %v5088_v62 = vunpack.i.h.bf16 %v5086_v59  ;;  %v5087_v63 = vunpack.i.l.bf16 %v5086_v59  ;;  %4843 = vmatprep.subr.msk.bf16.mxu1 %vm5503_vm9, %v4841_v55 }
 0x599   : > { %4846 = vmatpush3.bf16.msk.msra.mxu1 %vm5503_vm9, %v4841_v55 }
 0x59a   : > { %v5156_v0 = vpop.eup %5155  ;;  %v4853_v1 = vpack.c.bf16 %v5083_v60, %v5082_v61  ;;  %v4871_v2 = vpack.c.bf16 %v5088_v62, %v5087_v63 }
 0x59b   : > { %v1766_v4 = vpop.permute.xlu1 %1765  ;;  %v1222_v5 = vmul.f32 %v5156_v0, %v5148_v36 }
 0x59c   : > { %4569 = vmatmul.mubr.msk.f32.vlgmr.msra.gmra.mrb[0].mxu1 %vm996_vm6, %v1019_v3  ;;  %4855 = vmatprep.subr.msk.bf16.mxu1 %vm5503_vm9, %v4853_v1 }
 0x59d   : > { %4873 = vmatprep.subr.msk.bf16.mxu0 %vm5460_vm4, %v4871_v2  ;;  %4618 = vmatprep.mubr.msk.f32.mxu0 %vm910_vm3, %v1766_v4 }
 0x59e   : > { %v5158_v6 = vpop.eup %5157  ;;  %4858 = vmatpush3.bf16.msk.msra.mxu1 %vm5503_vm9, %v4853_v1  ;;  %4582 = vmatprep.mubr.msk.f32.mxu1 %vm996_vm6, %v1222_v5  ;;  %v4267_v1 = vld [vmem:[%s5967_s7 + $0x18] sm:$0xff] }
 0x59f   : > { %v1224_v7 = vmul.f32 %v5158_v6, %v5150_v38  ;;  %4876 = vmatpush3.bf16.xpose.msk.msra.mxu0 %vm5460_vm4, %v4871_v2  ;;  %v1768_v9 = vpop.permute.xlu1 %1767  ;;  %4585 = vmatprep.subr.mxu1 %v4245_v21 }
 0x5a1   : > { %4583 = vmatmul.mubr.msk.f32.vlgmr.msra.gmra.mrb[2].mxu1 %vm996_vm6, %v1224_v7 }
 0x5a2   : > { %4586 = vmatpush3.msra.mxu1 %v4245_v21 }
 0x5a3   : > { %4590 = vmatprep.subr.mxu1 %v1109_v22 }
 0x5a6   : > { %4619 = vmatmul.mubr.msk.f32.vlgmr.msra.gmra.mrb[10].mxu0 %vm910_vm3, %v1768_v9  ;;  %v4270_v9 = vld [vmem:[%s5968_s8] ss:$0 sm:$0xff] }
 0x5c8   : > { %v1572_v11 = vpop.xlane.xlu0 %1571 }
 0x5c9   : > { %v1576_v12 = vsub.f32 %v1568_v40, %v1572_v11 }
 0x5cb   : > { %v1578_v15 = vmul.f32 1.442695, %v1576_v12 }
 0x5d0   : > { %v1575_v13 = vpop.xlane.xlu1 %1574 }
 0x5d1   : > { %v1577_v14 = vsub.f32 %v1569_v42, %v1575_v13 }
 0x5d3   : > { %v1580_v16 = vmul.f32 1.442695, %v1577_v14 }
 0x5d5   : > { %5159 = vpow2.f32 %v1580_v16 }
 0x5d6   : > { %5161 = vpow2.f32 %v1578_v15 }
 0x5df   : > { %v5160_v17 = vpop.eup %5159 }
 0x5e0   : > { %v1585_v18 = vsel %vm1000_vm5, %v5160_v17, 0.0  ;;  %v5162_v19 = vpop.eup %5161 }
 0x5e1   : > { %1586 = vadd.xlane.f32.xlu0 %v1585_v18  ;;  %v1582_v20 = vsel %vm996_vm6, %v5162_v19, 0.0 }
 0x5e5   : > { %1583 = vadd.xlane.f32.xlu0 %v1582_v20 }
 0x5fb   : > { %5090 = vrot.lane.b32.xlu0 %v5442_v50, %s5994_s30 }
 0x66e   : > { %v1587_v23 = vpop.xlane.xlu0 %1586 }
 0x66f   : > { %v4570_v24 = vpop.f32.mrb[0].mxu1 }
 0x670   : > { %v1100_v25 = vpop.f32.mrb[1].mxu1 }
 0x672   : > { %v1584_v26 = vpop.xlane.xlu0 %1583 }
 0x673   : > { %5163 = vrcp.f32 %v1584_v26  ;;  %v2108_v26 = vld [vmem:[%s5971_s11] sm:$0xff] }
 0x674   : > { %5165 = vrcp.f32 %v1587_v23  ;;  %v4584_v27 = vpop.f32.mrb[2].mxu1 }
 0x675   : > { %v1304_v28 = vpop.f32.mrb[3].mxu1 }
 0x676   : > { %v5091_v29 = vpop.permute.xlu0 %5090  ;;  %4587 = vmatprep.mubr.msk.f32.mxu1 %vm910_vm3, %v1304_v28 }
 0x677   : > { %v5093_v30 = vunpack.i.h.bf16 %v5091_v29  ;;  %v5092_v31 = vunpack.i.l.bf16 %v5091_v29  ;;  %4588 = vmatmul.mubr.msk.f32.vlgmr.msra.gmra.mrb[4].mxu1 %vm910_vm3, %v4584_v27  ;;  %v2109_v27 = vld [vmem:[%s5971_s11 + $0x8] sm:$0xff]  ;;  %v2110_v29 = vld [vmem:[%s5971_s11 + $0x10] sm:$0xff] }
 0x678   : > { %4592 = vmatprep.mubr.msk.f32.mxu1 %vm910_vm3, %v1100_v25  ;;  %4591 = vmatpush3.msra.mxu1 %v1109_v22  ;;  %v4883_v28 = vpack.c.bf16 %v2109_v27, %v2108_v26 }
 0x679   : > { %v4865_v32 = vpack.c.bf16 %v5093_v30, %v5092_v31  ;;  %v4620_v33 = vpop.f32.mrb[10].mxu0  ;;  %v2111_v30 = vld [vmem:[%s5971_s11 + $0x18] sm:$0xff] }
 0x67a   : > { %v1847_v34 = vpop.f32.mrb[11].mxu0  ;;  %v1857_v37 = vmul.f32 0.35355338, %v4620_v33  ;;  %4884 = vmatprep.subr.bf16.mxu0 %v4883_v28  ;;  %v4887_v31 = vpack.c.bf16 %v2111_v30, %v2110_v29 }
 0x67b   : > { %v1856_v35 = vmul.f32 0.35355338, %v1847_v34  ;;  %4867 = vmatprep.subr.msk.bf16.mxu1 %vm5503_vm9, %v4865_v32  ;;  %4886 = vmatpush3.bf16.msra.mxu0 %v4883_v28 }
 0x67c   : > { %v1861_v42 = vsel %vm1000_vm5, %v1857_v37, -inf  ;;  %4888 = vmatprep.subr.bf16.mxu0 %v4887_v31 }
 0x67d   : > { %v5164_v36 = vpop.eup %5163  ;;  %v1858_v38 = vsel %vm996_vm6, %v1856_v35, -inf }
 0x67e   : > { %v5166_v39 = vpop.eup %5165  ;;  %1859 = vmax.xlane.f32.xlu1 %v1858_v38  ;;  %v1589_v40 = vmul.f32 %v5164_v36, %v5162_v19 }
 0x67f   : > { %4593 = vmatmul.mubr.msk.f32.vlgmr.msra.gmra.mrb[4].mxu1 %vm910_vm3, %v4570_v24  ;;  %v1591_v41 = vmul.f32 %v5166_v39, %v5160_v17  ;;  %4890 = vmatpush3.bf16.msra.mxu0 %v4887_v31  ;;  %v4271_v39 = vld [vmem:[%s5969_s9] ss:$0 sm:$0xff] }
 0x680   : > { %4870 = vmatpush3.bf16.msk.msra.mxu1 %vm5503_vm9, %v4865_v32  ;;  %4606 = vmatprep.mubr.msk.f32.mxu1 %vm996_vm6, %v1589_v40 }
 0x681   : > { %4609 = vmatprep.subr.mxu1 %v4257_v43 }
 0x682   : > { %1862 = vmax.xlane.f32.xlu1 %v1861_v42 }
 0x683   : > { %4607 = vmatmul.mubr.msk.f32.vlgmr.msra.gmra.mrb[6].mxu1 %vm996_vm6, %v1591_v41  ;;  %v4272_v41 = vld [vmem:[%s5970_s10] ss:$0 sm:$0xff] }
 0x684   : > { %4610 = vmatpush3.msra.mxu1 %v4257_v43 }
 0x70b   : > { %v1860_v44 = vpop.xlane.xlu1 %1859 }
 0x70c   : > { %v1864_v45 = vsub.f32 %v1856_v35, %v1860_v44 }
 0x70e   : > { %v1866_v49 = vmul.f32 1.442695, %v1864_v45 }
 0x70f   : > { %v1863_v46 = vpop.xlane.xlu1 %1862 }
 0x710   : > { %v1865_v48 = vsub.f32 %v1857_v37, %v1863_v46 }
 0x712   : > { %v1868_v51 = vmul.f32 1.442695, %v1865_v48 }
 0x714   : > { %5167 = vpow2.f32 %v1868_v51  ;;  %v2255_v51 = vld [vmem:[%s5973_s13 + $0x8] sm:$0xff] }
 0x715   : > { %5169 = vpow2.f32 %v1866_v49  ;;  %v2254_v49 = vld [vmem:[%s5973_s13] sm:$0xff] }
 0x71e   : > { %v5168_v52 = vpop.eup %5167 }
 0x71f   : > { %v1873_v47 = vsel %vm1000_vm5, %v5168_v52, 0.0  ;;  %v5170_v53 = vpop.eup %5169 }
 0x720   : > { %1874 = vadd.xlane.f32.xlu1 %v1873_v47  ;;  %v1870_v55 = vsel %vm996_vm6, %v5170_v53, 0.0  ;;  %v2256_v47 = vld [vmem:[%s5973_s13 + $0x10] sm:$0xff] }
 0x724   : > { %1871 = vadd.xlane.f32.xlu1 %v1870_v55 }
 0x735   : > { %5095 = vrot.lane.b32.xlu1 %v5442_v50, %s5993_s27  ;;  %s6018_s27 = smov 56  }
 0x756   : > { %v4608_v56 = vpop.f32.mrb[6].mxu1 }
 0x757   : > { %v1671_v58 = vpop.f32.mrb[7].mxu1 }
 0x758   : > { %4611 = vmatprep.mubr.msk.f32.mxu1 %vm910_vm3, %v1671_v58  ;;  %v2259_v58 = vld [vmem:[%s5973_s13 + $0x28] sm:$0xff] }
 0x759   : > { %4612 = vmatmul.mubr.msk.f32.vlgmr.msra.gmra.mrb[4].mxu1 %vm910_vm3, %v4608_v56  ;;  %v2258_v56 = vld [vmem:[%s5973_s13 + $0x20] sm:$0xff] }
 0x7ad   : > { %v1875_v59 = vpop.xlane.xlu1 %1874 }
 0x7ae   : > { %5171 = vrcp.f32 %v1875_v59  ;;  %v4899_v59 = vpack.c.bf16 %v2259_v58, %v2258_v56 }
 0x7b1   : > { %v1872_v60 = vpop.xlane.xlu1 %1871 }
 0x7b2   : > { %5173 = vrcp.f32 %v1872_v60  ;;  %v2260_v60 = vld [vmem:[%s5973_s13 + $0x30] sm:$0xff] }
 0x7b5   : > { %v5096_v61 = vpop.permute.xlu1 %5095 }
 0x7b6   : > { %v5098_v62 = vunpack.i.h.bf16 %v5096_v61  ;;  %v5097_v63 = vunpack.i.l.bf16 %v5096_v61  ;;  %v2261_v61 = vld [vmem:[%s5973_s13 + $0x38] sm:$0xff] }
 0x7b8   : > { %v4877_v0 = vpack.c.bf16 %v5098_v62, %v5097_v63  ;;  %v5172_v50 = vpop.eup %5171  ;;  %v4903_v62 = vpack.c.bf16 %v2261_v61, %v2260_v60  ;;  %v2262_v63 = vld [vmem:[%s5973_s13 + $0x40] sm:$0xff] }
 0x7b9   : > { %v1879_v4 = vmul.f32 %v5172_v50, %v5168_v52  ;;  %v4891_v52 = vpack.c.bf16 %v2255_v51, %v2254_v49  ;;  %v2264_v50 = vld [vmem:[%s5973_s13 + $0x50] sm:$0xff] }
 0x7ba   : > { %4879 = vmatprep.subr.msk.bf16.mxu1 %vm5503_vm9, %v4877_v0 }
 0x7bb   : > { %4882 = vmatpush3.bf16.msk.msra.mxu1 %vm5503_vm9, %v4877_v0  ;;  %v2263_v0 = vld [vmem:[%s5973_s13 + $0x48] sm:$0xff] }
 0x7bc   : > { %v5174_v2 = vpop.eup %5173  ;;  %4628 = vmatprep.subr.mxu1 %v4267_v1 }
 0x7bd   : > { %v1877_v3 = vmul.f32 %v5174_v2, %v5170_v53  ;;  %v2257_v53 = vld [vmem:[%s5973_s13 + $0x18] sm:$0xff] }
 0x7be   : > { %v4895_v55 = vpack.c.bf16 %v2257_v53, %v2256_v47  ;;  %v2265_v2 = vld [vmem:[%s5973_s13 + $0x58] sm:$0xff] }
 0x7bf   : > { %4625 = vmatprep.mubr.msk.f32.mxu1 %vm996_vm6, %v1877_v3  ;;  %v4911_v3 = vpack.c.bf16 %v2265_v2, %v2264_v50 }
 0x7c0   : > { %4626 = vmatmul.mubr.msk.f32.vlgmr.msra.gmra.mrb[8].mxu1 %vm996_vm6, %v1879_v4  ;;  %v2266_v4 = vld [vmem:[%s5973_s13 + $0x60] sm:$0xff] }
 0x7c1   : > { %4629 = vmatpush3.msra.mxu1 %v4267_v1  ;;  %v4907_v1 = vpack.c.bf16 %v2263_v0, %v2262_v63 }
 0x7c2   : > { %4892 = vmatprep.subr.bf16.mxu1 %v4891_v52 }
 0x893   : > { %v4627_v5 = vpop.f32.mrb[8].mxu1 }
 0x894   : > { %v1959_v6 = vpop.f32.mrb[9].mxu1 }
 0x895   : > { %4630 = vmatprep.mubr.msk.f32.mxu1 %vm910_vm3, %v1959_v6 }
 0x896   : > { %4631 = vmatmul.mubr.msk.f32.vlgmr.msra.gmra.mrb[4].mxu1 %vm910_vm3, %v4627_v5  ;;  %v2267_v5 = vld [vmem:[%s5973_s13 + $0x68] sm:$0xff] }
 0x897   : > { %4894 = vmatpush3.bf16.msra.mxu1 %v4891_v52  ;;  %v4915_v6 = vpack.c.bf16 %v2267_v5, %v2266_v4 }
 0x898   : > { %4896 = vmatprep.subr.bf16.mxu1 %v4895_v55 }
 0x89b   : > { %4898 = vmatpush3.bf16.msra.mxu1 %v4895_v55 }
 0x89c   : > { %4900 = vmatprep.subr.bf16.mxu1 %v4899_v59 }
 0x89f   : > { %4902 = vmatpush3.bf16.msra.mxu1 %v4899_v59 }
 0x8a0   : > { %4904 = vmatprep.subr.bf16.mxu1 %v4903_v62 }
 0x8a3   : > { %4906 = vmatpush3.bf16.msra.mxu1 %v4903_v62 }
 0x8a4   : > { %4908 = vmatprep.subr.bf16.mxu1 %v4907_v1 }
 0x8a7   : > { %4910 = vmatpush3.bf16.msra.mxu1 %v4907_v1 }
 0x8a8   : > { %4912 = vmatprep.subr.bf16.mxu1 %v4911_v3 }
 0x8ab   : > { %4914 = vmatpush3.bf16.msra.mxu1 %v4911_v3 }
 0x8ac   : > { %4916 = vmatprep.subr.bf16.mxu1 %v4915_v6 }
 0x8af   : > { %4918 = vmatpush3.bf16.msra.mxu1 %v4915_v6  ;;  %v4280_v6 = vld [vmem:[%s5974_s14] ss:$0 sm:$0xff] }
 0x969   : > { %v4632_v7 = vpop.f32.mrb[4].mxu1 }
 0x96a   : > { %v2054_v11 = vadd.f32 %v4632_v7, %v5399_v8  ;;  %v2042_v12 = vpop.f32.mrb[5].mxu1  ;;  %v2268_v7 = vld [vmem:[%s5973_s13 + $0x70] sm:$0xff] }
 0x96b   : > { %v2053_v13 = vadd.f32 %v2042_v12, %v5401_v10  ;;  %v4273_v12 = vld [vmem:[%s5972_s12] ss:$0 sm:$0xff] }
 0x96c   : > { %v5571_v14 = vadd.f32 %v4270_v9, %v2054_v11 }
 0x96d   : > { %v5573_v15 = vadd.f32 %v4270_v9, %v2053_v13  ;;  %v2269_v9 = vld [vmem:[%s5973_s13 + $0x78] sm:$0xff] }
 0x96e   : > { %v2069_v16 = vsel %vm771_vm2, %v5571_v14, 0.0  ;;  %v4919_v11 = vpack.c.bf16 %v2269_v9, %v2268_v7 }
 0x96f   : > { %2070 = vadd.xlane.f32.xlu1 %v2069_v16  ;;  %v2066_v17 = vsel %vm767_vm1, %v5573_v15, 0.0 }
 0x970   : > { %2067 = vadd.xlane.f32.xlu0 %v2066_v17  ;;  %4920 = vmatprep.subr.bf16.mxu1 %v4919_v11 }
 0x971   : > { %4922 = vmatpush3.bf16.msra.mxu1 %v4919_v11 }
 0x9fc   : > { %v2071_v18 = vpop.xlane.xlu1 %2070 }
 0x9fd   : > { %v2073_v19 = vmul.f32 0.03125, %v2071_v18  ;;  %v2068_v20 = vpop.xlane.xlu0 %2067 }
 0x9fe   : > { %v2072_v21 = vmul.f32 0.03125, %v2068_v20 }
 0x9ff   : > { %v2075_v8 = vsub.f32 %v5571_v14, %v2073_v19 }
 0xa00   : > { %v2074_v10 = vsub.f32 %v5573_v15, %v2072_v21 }
 0xa01   : > { %v2077_v24 = vmul.f32 %v2075_v8, %v2075_v8 }
 0xa02   : > { %v2076_v22 = vmul.f32 %v2074_v10, %v2074_v10 }
 0xa03   : > { %v2081_v25 = vsel %vm771_vm2, %v2077_v24, 0.0 }
 0xa04   : > { %v2078_v23 = vsel %vm767_vm1, %v2076_v22, 0.0 }
 0xa05   : > { %2079 = vadd.xlane.f32.xlu0 %v2078_v23 }
 0xa09   : > { %2082 = vadd.xlane.f32.xlu0 %v2081_v25 }
 0xa92   : > { %v2080_v32 = vpop.xlane.xlu0 %2079 }
 0xa93   : > { %v2084_v33 = vmul.f32 0.03125, %v2080_v32 }
 0xa95   : > { %v2086_v34 = vadd.f32 1e-05, %v2084_v33 }
 0xa96   : > { %v2083_v35 = vpop.xlane.xlu0 %2082 }
 0xa97   : > { %5175 = vrsqrt.f32 %v2086_v34  ;;  %v2085_v36 = vmul.f32 0.03125, %v2083_v35 }
 0xa99   : > { %v2087_v37 = vadd.f32 1e-05, %v2085_v36 }
 0xa9b   : > { %5177 = vrsqrt.f32 %v2087_v37 }
 0xaa1   : > { %v5176_v38 = vpop.eup %5175 }
 0xaa2   : > { %v2090_v40 = vmul.f32 %v5176_v38, %v2074_v10 }
 0xaa4   : > { %v2098_v42 = vmul.f32 %v4271_v39, %v2090_v40 }
 0xaa5   : > { %v5178_v43 = vpop.eup %5177 }
 0xaa6   : > { %v2091_v44 = vmul.f32 %v5178_v43, %v2075_v8  ;;  %v2106_v45 = vadd.f32 %v4272_v41, %v2098_v42 }
 0xaa8   : > { %v2099_v46 = vmul.f32 %v4271_v39, %v2091_v44  ;;  %4641 = vmatprep.mubr.msk.f32.mxu0 %vm767_vm1, %v2106_v45 }
 0xaaa   : > { %v2107_v48 = vadd.f32 %v4272_v41, %v2099_v46 }
 0xaac   : > { %4642 = vmatmul.mubr.msk.f32.vlgmr.msra.gmra.mrb[12].mxu0 %vm767_vm1, %v2107_v48 }
 0xb7f   : > { %v4643_v13 = vpop.f32.mrb[12].mxu0 }
 0xb80   : > { %v2197_v16 = vadd.f32 %v4643_v13, %v4273_v12  ;;  %v2191_v17 = vpop.f32.mrb[13].mxu0 }
 0xb81   : > { %v2192_v18 = vadd.f32 %v4273_v12, %v2191_v17 }
 0xb82   : > { %v2201_v19 = vmul.f32 0.70710677, %v2197_v16  ;;  %v2249_v2 = vmul.f32 0.5, %v2197_v16 }
 0xb83   : > { %v2200_v20 = vmul.f32 0.70710677, %v2192_v18  ;;  %v2248_v1 = vmul.f32 0.5, %v2192_v18 }
 0xb84   : > { %v2203_v21 = vand.u32 2147483647, %v2201_v19  ;;  %vm2243_vm10 = vcmp.lt.f32.partialorder %v2201_v19, 0.0 }
 0xb85   : > { %v2202_v8 = vand.u32 2147483647, %v2200_v20  ;;  %vm2242_vm11 = vcmp.lt.f32.partialorder %v2200_v20, 0.0 }
 0xb86   : > { %v2205_v10 = vmul.f32 0.3275911, %v2203_v21  ;;  %v2231_v25 = vsub.f32 0.0, %v2203_v21 }
 0xb87   : > { %v2204_v22 = vmul.f32 0.3275911, %v2202_v8  ;;  %v2230_v26 = vsub.f32 0.0, %v2202_v8 }
 0xb88   : > { %v2207_v23 = vadd.f32 1.0, %v2205_v10  ;;  %v2233_v28 = vmul.f32 %v2231_v25, %v2203_v21  ;;  %v4286_v25 = vld [vmem:[%s6008_s28 + $0x28] sm:$0xff] }
 0xb89   : > { %v2206_v24 = vadd.f32 1.0, %v2204_v22  ;;  %v2232_v31 = vmul.f32 %v2230_v26, %v2202_v8 }
 0xb8a   : > { %5179 = vrcp.f32 %v2207_v23  ;;  %v2236_v34 = vmul.f32 1.442695, %v2233_v28  ;;  %v4288_v28 = vld [vmem:[%s6008_s28 + $0x38] sm:$0xff] }
 0xb8b   : > { %5181 = vrcp.f32 %v2206_v24  ;;  %v2234_v37 = vmul.f32 1.442695, %v2232_v31  ;;  %v4285_v24 = vld [vmem:[%s6008_s28 + $0x20] sm:$0xff] }
 0xb8c   : > { %5183 = vpow2.f32 %v2236_v34  ;;  %v4923_v26 = vpack.c.bf16 %v4286_v25, %v4285_v24 }
 0xb8d   : > { %5185 = vpow2.f32 %v2234_v37  ;;  %v4283_v37 = vld [vmem:[%s6009_s26 + $0x1] ss:$0 sm:$0xff] }
 0xb8e   : > { %4924 = vmatprep.subr.bf16.mxu0 %v4923_v26 }
 0xb8f   : > { %4926 = vmatpush3.bf16.msra.mxu0 %v4923_v26 }
 0xb94   : > { %v5180_v27 = vpop.eup %5179 }
 0xb95   : > { %v5182_v29 = vpop.eup %5181  ;;  %v2213_v30 = vmul.f32 1.0614054, %v5180_v27 }
 0xb96   : > { %v2212_v32 = vmul.f32 1.0614054, %v5182_v29  ;;  %v5184_v52 = vpop.eup %5183 }
 0xb97   : > { %v4277_v33 = vadd.f32 -1.4531521, %v2213_v30  ;;  %v5186_v53 = vpop.eup %5185 }
 0xb98   : > { %v4276_v35 = vadd.f32 -1.4531521, %v2212_v32 }
 0xb99   : > { %v2217_v36 = vmul.f32 %v5180_v27, %v4277_v33 }
 0xb9a   : > { %v2216_v38 = vmul.f32 %v5182_v29, %v4276_v35 }
 0xb9b   : > { %v2219_v39 = vadd.f32 1.4214138, %v2217_v36 }
 0xb9c   : > { %v2218_v40 = vadd.f32 1.4214138, %v2216_v38 }
 0xb9d   : > { %v2221_v41 = vmul.f32 %v5180_v27, %v2219_v39  ;;  %v4284_v39 = vld [vmem:[%s6010_s29 + $0x1] ss:$0 sm:$0xff] }
 0xb9e   : > { %v2220_v42 = vmul.f32 %v5182_v29, %v2218_v40 }
 0xb9f   : > { %v4279_v43 = vadd.f32 -0.28449672, %v2221_v41 }
 0xba0   : > { %v4278_v44 = vadd.f32 -0.28449672, %v2220_v42 }
 0xba1   : > { %v2225_v45 = vmul.f32 %v5180_v27, %v4279_v43 }
 0xba2   : > { %v2224_v46 = vmul.f32 %v5182_v29, %v4278_v44 }
 0xba3   : > { %v2227_v48 = vadd.f32 0.2548296, %v2225_v45 }
 0xba4   : > { %v2226_v49 = vadd.f32 0.2548296, %v2224_v46  ;;  %v4290_v46 = vld [vmem:[%s5966_s6 + $0x1] ss:$0 sm:$0xff] }
 0xba5   : > { %v2229_v51 = vmul.f32 %v5180_v27, %v2227_v48  ;;  %v4287_v27 = vld [vmem:[%s6008_s28 + $0x30] sm:$0xff] }
 0xba6   : > { %v2228_v47 = vmul.f32 %v5182_v29, %v2226_v49  ;;  %v4927_v29 = vpack.c.bf16 %v4288_v28, %v4287_v27 }
 0xba7   : > { %v2239_v55 = vmul.f32 %v5184_v52, %v2229_v51 }
 0xba8   : > { %v2238_v56 = vmul.f32 %v5186_v53, %v2228_v47  ;;  %4928 = vmatprep.subr.bf16.mxu0 %v4927_v29 }
 0xba9   : > { %v2241_v58 = vsub.f32 1.0, %v2239_v55  ;;  %4930 = vmatpush3.bf16.msra.mxu0 %v4927_v29 }
 0xbaa   : > { %v2240_v59 = vsub.f32 1.0, %v2238_v56 }
 0xbab   : > { %v2245_v60 = vsub.f32 0.0, %v2241_v58 }
 0xbac   : > { %v2244_v61 = vsub.f32 0.0, %v2240_v59 }
 0xbad   : > { %v2247_v62 = vsel %vm2243_vm10, %v2245_v60, %v2241_v58 }
 0xbae   : > { %v2251_v63 = vadd.f32 1.0, %v2247_v62  ;;  %v2246_v0 = vsel %vm2242_vm11, %v2244_v61, %v2240_v59 }
 0xbaf   : > { %v2250_v50 = vadd.f32 1.0, %v2246_v0 }
 0xbb0   : > { %v2253_v4 = vmul.f32 %v2251_v63, %v2249_v2 }
 0xbb1   : > { %v2252_v3 = vmul.f32 %v2250_v50, %v2248_v1 }
 0xbb3   : > { %4676 = vmatprep.mubr.f32.mxu1 %v2252_v3 }
 0xbb4   : > { %4677 = vmatmul.mubr.f32.vlgmr.msra.gmra.mrb[10].mxu1 %v2253_v4 }
 0xc87   : > { %v4678_v5 = vpop.f32.mrb[10].mxu1 }
 0xc88   : > { %v2336_v7 = vpop.f32.mrb[11].mxu1  ;;  %v2346_v9 = vadd.f32 %v4678_v5, %v5571_v14 }
 0xc89   : > { %v2345_v11 = vadd.f32 %v2336_v7, %v5573_v15 }
 0xc8a   : > { %v5661_v13 = vadd.f32 %v4280_v6, %v2346_v9 }
 0xc8b   : > { %v5659_v12 = vadd.f32 %v4280_v6, %v2345_v11 }
 0xc8c   : > { %v2363_v17 = vsel %vm771_vm2, %v5661_v13, 0.0 }
 0xc8d   : > { %v2360_v16 = vsel %vm767_vm1, %v5659_v12, 0.0 }
 0xc8e   : > { %2361 = vadd.xlane.f32.xlu0 %v2360_v16 }
 0xc92   : > { %2364 = vadd.xlane.f32.xlu0 %v2363_v17 }
 0xd1b   : > { %v2362_v18 = vpop.xlane.xlu0 %2361 }
 0xd1c   : > { %v2366_v19 = vmul.f32 0.03125, %v2362_v18 }
 0xd1e   : > { %v2368_v20 = vsub.f32 %v5659_v12, %v2366_v19 }
 0xd1f   : > { %v2365_v21 = vpop.xlane.xlu0 %2364 }
 0xd20   : > { %v2367_v14 = vmul.f32 0.03125, %v2365_v21  ;;  %v2370_v8 = vmul.f32 %v2368_v20, %v2368_v20 }
 0xd22   : > { %v2369_v15 = vsub.f32 %v5661_v13, %v2367_v14  ;;  %v2372_v10 = vsel %vm767_vm1, %v2370_v8, 0.0 }
 0xd23   : > { %2373 = vadd.xlane.f32.xlu0 %v2372_v10 }
 0xd24   : > { %v2371_v22 = vmul.f32 %v2369_v15, %v2369_v15 }
 0xd26   : > { %v2375_v23 = vsel %vm771_vm2, %v2371_v22, 0.0 }
 0xd27   : > { %2376 = vadd.xlane.f32.xlu1 %v2375_v23 }
 0xdb0   : > { %v2374_v30 = vpop.xlane.xlu0 %2373 }
 0xdb1   : > { %v2378_v31 = vmul.f32 0.03125, %v2374_v30 }
 0xdb3   : > { %v2380_v32 = vadd.f32 1e-05, %v2378_v31 }
 0xdb4   : > { %v2377_v33 = vpop.xlane.xlu1 %2376 }
 0xdb5   : > { %5187 = vrsqrt.f32 %v2380_v32  ;;  %v2379_v34 = vmul.f32 0.03125, %v2377_v33 }
 0xdb7   : > { %v2381_v35 = vadd.f32 1e-05, %v2379_v34 }
 0xdb9   : > { %5189 = vrsqrt.f32 %v2381_v35 }
 0xdbf   : > { %v5188_v36 = vpop.eup %5187 }
 0xdc0   : > { %v2384_v38 = vmul.f32 %v5188_v36, %v2368_v20 }
 0xdc2   : > { %v2392_v40 = vmul.f32 %v4283_v37, %v2384_v38 }
 0xdc3   : > { %v5190_v41 = vpop.eup %5189 }
 0xdc4   : > { %v2385_v42 = vmul.f32 %v5190_v41, %v2369_v15  ;;  %v2400_v43 = vadd.f32 %v4284_v39, %v2392_v40 }
 0xdc6   : > { %v2393_v44 = vmul.f32 %v4283_v37, %v2385_v42  ;;  %4687 = vmatprep.mubr.msk.f32.mxu0 %vm767_vm1, %v2400_v43 }
 0xdc8   : > { %v2401_v45 = vadd.f32 %v4284_v39, %v2393_v44 }
 0xdca   : > { %4688 = vmatmul.mubr.msk.f32.vlgmr.msra.gmra.mrb[14].mxu0 %vm767_vm1, %v2401_v45 }
 0xe9d   : > { %v4689_v48 = vpop.f32.mrb[14].mxu0 }
 0xe9e   : > { %v5694_v49 = vadd.f32 %v4689_v48, %v4290_v46  ;;  %v2487_v51 = vpop.f32.mrb[15].mxu0 }
 0xe9f   : > { %v5696_v52 = vadd.f32 %v4290_v46, %v2487_v51 }
 0xea1   : > { %4694 = vmatprep.mubr.msk.f32.mxu0 %vm910_vm3, %v5696_v52  ;;  %v5702_v47 = vpack.i.bf16 %v5694_v49, %v5696_v52 }
 0xea3   : > { %5100 = vrot.lane.b32.xlu0 %v5702_v47, %s5252_s22  ;;  %s6017_s22 = smov 64  }
 0xea7   : > { %5110 = vrot.lane.b32.xlu0 %v5702_v47, %s6015_s24 }
 0xeab   : > { %2699 = vrot.lane.b32.xlu0 %v5696_v52, %s6016_s4 }
 0xeaf   : > { %2701 = vrot.lane.b32.xlu0 %v5694_v49, %s6016_s4 }
 0xf15   : > { %v5101_v53 = vpop.permute.xlu0 %5100 }
 0xf16   : > { %v5103_v55 = vunpack.i.h.bf16 %v5101_v53  ;;  %v5102_v56 = vunpack.i.l.bf16 %v5101_v53 }
 0xf18   : > { %v4931_v58 = vpack.c.bf16 %v5103_v55, %v5102_v56 }
 0xf19   : > { %v5111_v18 = vpop.permute.xlu0 %5110 }
 0xf1a   : > { %4933 = vmatprep.subr.msk.bf16.mxu0 %vm5460_vm4, %v4931_v58  ;;  %v5113_v20 = vunpack.i.h.bf16 %v5111_v18  ;;  %v5112_v21 = vunpack.i.l.bf16 %v5111_v18 }
 0xf1b   : > { %4936 = vmatpush3.bf16.xpose.msk.msra.mxu0 %vm5460_vm4, %v4931_v58 }
 0xf1c   : > { %v4943_v10 = vpack.c.bf16 %v5113_v20, %v5112_v21 }
 0xf1d   : > { %v2700_v26 = vpop.permute.xlu0 %2699 }
 0xf21   : > { %v2702_v27 = vpop.permute.xlu0 %2701 }
 0xf22   : > { %4695 = vmatmul.mubr.msk.f32.vlgmr.msra.gmra.mrb[16].mxu0 %vm910_vm3, %v5694_v49 }
 0xff5   : > { %v4696_v59 = vpop.f32.mrb[16].mxu0 }
 0xff6   : > { %v2576_v60 = vpop.f32.mrb[17].mxu0  ;;  %v2586_v62 = vmul.f32 0.35355338, %v4696_v59 }
 0xff7   : > { %v2585_v61 = vmul.f32 0.35355338, %v2576_v60 }
 0xff8   : > { %v2590_v0 = vsel %vm1000_vm5, %v2586_v62, -inf }
 0xff9   : > { %v2587_v63 = vsel %vm996_vm6, %v2585_v61, -inf }
 0xffa   : > { %2588 = vmax.xlane.f32.xlu1 %v2587_v63 }
 0xffe   : > { %2591 = vmax.xlane.f32.xlu1 %v2590_v0 }
0x1087   : > { %v2589_v1 = vpop.xlane.xlu1 %2588 }
0x1088   : > { %v2593_v50 = vsub.f32 %v2585_v61, %v2589_v1 }
0x108a   : > { %v2595_v4 = vmul.f32 1.442695, %v2593_v50 }
0x108b   : > { %v2592_v2 = vpop.xlane.xlu1 %2591 }
0x108c   : > { %v2594_v3 = vsub.f32 %v2586_v62, %v2592_v2 }
0x108e   : > { %v2597_v5 = vmul.f32 1.442695, %v2594_v3 }
0x1090   : > { %5191 = vpow2.f32 %v2597_v5 }
0x1091   : > { %5193 = vpow2.f32 %v2595_v4 }
0x109a   : > { %v5192_v6 = vpop.eup %5191 }
0x109b   : > { %v2602_v7 = vsel %vm1000_vm5, %v5192_v6, 0.0  ;;  %v5194_v9 = vpop.eup %5193 }
0x109c   : > { %2603 = vadd.xlane.f32.xlu1 %v2602_v7  ;;  %v2599_v11 = vsel %vm996_vm6, %v5194_v9, 0.0  ;;  %v4308_v7 = vld [vmem:[%s5967_s7 + $0x28] sm:$0xff] }
0x109d   : > { %4718 = vmatprep.subr.mxu1 %v4308_v7 }
0x109e   : > { %4719 = vmatpush3.msra.mxu1 %v4308_v7 }
0x10a0   : > { %2600 = vadd.xlane.f32.xlu1 %v2599_v11 }
0x10b1   : > { %5105 = vrot.lane.b32.xlu1 %v5702_v47, %s6017_s22 }
0x1129   : > { %v2604_v16 = vpop.xlane.xlu1 %2603 }
0x112a   : > { %5195 = vrcp.f32 %v2604_v16 }
0x112d   : > { %v2601_v17 = vpop.xlane.xlu1 %2600 }
0x112e   : > { %5197 = vrcp.f32 %v2601_v17 }
0x1131   : > { %v5106_v19 = vpop.permute.xlu1 %5105 }
0x1132   : > { %v5108_v14 = vunpack.i.h.bf16 %v5106_v19  ;;  %v5107_v8 = vunpack.i.l.bf16 %v5106_v19 }
0x1134   : > { %v4937_v15 = vpack.c.bf16 %v5108_v14, %v5107_v8  ;;  %v5196_v22 = vpop.eup %5195 }
0x1135   : > { %v2608_v25 = vmul.f32 %v5196_v22, %v5192_v6 }
0x1136   : > { %4939 = vmatprep.subr.msk.bf16.mxu0 %vm5503_vm9, %v4937_v15 }
0x1137   : > { %4942 = vmatpush3.bf16.msk.msra.mxu0 %vm5503_vm9, %v4937_v15 }
0x1138   : > { %v5198_v23 = vpop.eup %5197  ;;  %4945 = vmatprep.subr.msk.bf16.mxu0 %vm5460_vm4, %v4943_v10 }
0x1139   : > { %v2606_v24 = vmul.f32 %v5198_v23, %v5194_v9  ;;  %v4300_v9 = vld [vmem:[%s5967_s7 + $0x20] sm:$0xff] }
0x113a   : > { %4723 = vmatprep.subr.mxu1 %v4300_v9 }
0x113b   : > { %4701 = vmatprep.mubr.msk.f32.mxu0 %vm996_vm6, %v2606_v24 }
0x113c   : > { %4702 = vmatmul.mubr.msk.f32.vlgmr.msra.gmra.mrb[18].mxu0 %vm996_vm6, %v2608_v25 }
0x113d   : > { %4708 = vmatprep.mubr.msk.f32.mxu0 %vm910_vm3, %v2700_v26 }
0x1140   : > { %4948 = vmatpush3.bf16.xpose.msk.msra.mxu0 %vm5460_vm4, %v4943_v10 }
0x1147   : > { %4709 = vmatmul.mubr.msk.f32.vlgmr.msra.gmra.mrb[20].mxu0 %vm910_vm3, %v2702_v27 }
0x120f   : > { %v5736_v28 = vpop.f32.mrb[18].mxu0 }
0x1210   : > { %v5738_v29 = vpop.f32.mrb[19].mxu0 }
0x121a   : > { %v4710_v30 = vpop.f32.mrb[20].mxu0 }
0x121b   : > { %v2791_v31 = vmul.f32 0.35355338, %v4710_v30  ;;  %v2781_v32 = vpop.f32.mrb[21].mxu0 }
0x121c   : > { %v2790_v33 = vmul.f32 0.35355338, %v2781_v32 }
0x121d   : > { %v2795_v34 = vsel %vm1000_vm5, %v2791_v31, -inf }
0x121e   : > { %2796 = vmax.xlane.f32.xlu0 %v2795_v34  ;;  %v2792_v35 = vsel %vm996_vm6, %v2790_v33, -inf }
0x121f   : > { %2793 = vmax.xlane.f32.xlu1 %v2792_v35 }
0x1230   : > { %5115 = vrot.lane.b32.xlu1 %v5702_v47, %s6018_s27  ;;  %s6023_s27 = smov 48  }
0x1234   : > { %3066 = vrot.lane.b32.xlu1 %v5696_v52, %s6019_s1 }
0x1238   : > { %3068 = vrot.lane.b32.xlu1 %v5694_v49, %s6019_s1  ;;  %s6024_s1 = smov 40  }
0x123c   : > { %5125 = vrot.lane.b32.xlu1 %v5702_v47, %s6020_s25 }
0x1240   : > { %3356 = vrot.lane.b32.xlu1 %v5694_v49, %s6021_s5 }
0x12ab   : > { %v2797_v36 = vpop.xlane.xlu0 %2796 }
0x12ac   : > { %v2799_v37 = vsub.f32 %v2791_v31, %v2797_v36  ;;  %v2794_v38 = vpop.xlane.xlu1 %2793 }
0x12ad   : > { %v2798_v39 = vsub.f32 %v2790_v33, %v2794_v38 }
0x12ae   : > { %v2802_v40 = vmul.f32 1.442695, %v2799_v37 }
0x12af   : > { %v2800_v41 = vmul.f32 1.442695, %v2798_v39 }
0x12b0   : > { %5199 = vpow2.f32 %v2802_v40  ;;  %v5116_v42 = vpop.permute.xlu1 %5115 }
0x12b1   : > { %v5118_v43 = vunpack.i.h.bf16 %v5116_v42  ;;  %v5117_v44 = vunpack.i.l.bf16 %v5116_v42  ;;  %5201 = vpow2.f32 %v2800_v41 }
0x12b3   : > { %v4949_v45 = vpack.c.bf16 %v5118_v43, %v5117_v44 }
0x12b4   : > { %v3067_v53 = vpop.permute.xlu1 %3066 }
0x12b5   : > { %4951 = vmatprep.subr.msk.bf16.mxu0 %vm5503_vm9, %v4949_v45 }
0x12b6   : > { %4954 = vmatpush3.bf16.msk.msra.mxu0 %vm5503_vm9, %v4949_v45 }
0x12b8   : > { %v3069_v58 = vpop.permute.xlu1 %3068 }
0x12ba   : > { %v5200_v46 = vpop.eup %5199 }
0x12bb   : > { %v2807_v48 = vsel %vm1000_vm5, %v5200_v46, 0.0  ;;  %v5202_v49 = vpop.eup %5201 }
0x12bc   : > { %2808 = vadd.xlane.f32.xlu0 %v2807_v48  ;;  %v2804_v51 = vsel %vm996_vm6, %v5202_v49, 0.0  ;;  %v5126_v63 = vpop.permute.xlu1 %5125 }
0x12bd   : > { %v5128_v50 = vunpack.i.h.bf16 %v5126_v63  ;;  %v5127_v2 = vunpack.i.l.bf16 %v5126_v63 }
0x12bf   : > { %v4967_v4 = vpack.c.bf16 %v5128_v50, %v5127_v2 }
0x12c0   : > { %2805 = vadd.xlane.f32.xlu0 %v2804_v51  ;;  %v3357_v6 = vpop.permute.xlu1 %3356 }
0x12d6   : > { %5120 = vrot.lane.b32.xlu0 %v5702_v47, %s6022_s23  ;;  %s676_s23 = scalar_lea.vmem %s5981_s21, %s5387_s0 }
0x12da   : > { %3354 = vrot.lane.b32.xlu0 %v5696_v52, %s6021_s5 }
0x1349   : > { %v2809_v55 = vpop.xlane.xlu0 %2808 }
0x134a   : > { %5203 = vrcp.f32 %v2809_v55 }
0x134d   : > { %v2806_v56 = vpop.xlane.xlu0 %2805 }
0x134e   : > { %5205 = vrcp.f32 %v2806_v56 }
0x1351   : > { %v5121_v59 = vpop.permute.xlu0 %5120 }
0x1352   : > { %v5123_v60 = vunpack.i.h.bf16 %v5121_v59  ;;  %v5122_v61 = vunpack.i.l.bf16 %v5121_v59 }
0x1354   : > { %v4955_v62 = vpack.c.bf16 %v5123_v60, %v5122_v61  ;;  %v5204_v0 = vpop.eup %5203 }
0x1355   : > { %v2813_v52 = vmul.f32 %v5204_v0, %v5200_v46  ;;  %v3355_v5 = vpop.permute.xlu0 %3354 }
0x1356   : > { %4957 = vmatprep.subr.msk.bf16.mxu0 %vm5460_vm4, %v4955_v62 }
0x1358   : > { %v5206_v1 = vpop.eup %5205 }
0x1359   : > { %v2811_v3 = vmul.f32 %v5206_v1, %v5202_v49 }
0x135b   : > { %4715 = vmatprep.mubr.msk.f32.mxu0 %vm996_vm6, %v2811_v3 }
0x135c   : > { %4716 = vmatmul.mubr.msk.f32.vlgmr.msra.gmra.mrb[22].mxu0 %vm996_vm6, %v2813_v52 }
0x135d   : > { %4960 = vmatpush3.bf16.xpose.msk.msra.mxu0 %vm5460_vm4, %v4955_v62  ;;  %4732 = vmatprep.mubr.msk.f32.mxu0 %vm910_vm3, %v3067_v53  ;;  %v4320_v53 = vld [vmem:[%s5967_s7 + $0x30] sm:$0xff] }
0x135e   : > { %4969 = vmatprep.subr.msk.bf16.mxu0 %vm5460_vm4, %v4967_v4 }
0x1364   : > { %4733 = vmatmul.mubr.msk.f32.vlgmr.msra.gmra.mrb[24].mxu0 %vm910_vm3, %v3069_v58 }
0x1365   : > { %4972 = vmatpush3.bf16.xpose.msk.msra.mxu0 %vm5460_vm4, %v4967_v4  ;;  %4751 = vmatprep.mubr.msk.f32.mxu0 %vm910_vm3, %v3355_v5  ;;  %v4330_v4 = vld [vmem:[%s5967_s7 + $0x38] sm:$0xff] }
0x136c   : > { %4752 = vmatmul.mubr.msk.f32.vlgmr.msra.gmra.mrb[26].mxu0 %vm910_vm3, %v3357_v6 }
0x142f   : > { %v4717_v11 = vpop.f32.mrb[22].mxu0 }
0x1430   : > { %v2893_v16 = vpop.f32.mrb[23].mxu0 }
0x1431   : > { %4720 = vmatprep.mubr.msk.f32.mxu1 %vm910_vm3, %v2893_v16 }
0x1432   : > { %4721 = vmatmul.mubr.msk.f32.vlgmr.msra.gmra.mrb[12].mxu1 %vm910_vm3, %v4717_v11  ;;  %v4334_v11 = vld [vmem:[%s5968_s8 + $0x1] ss:$0 sm:$0xff] }
0x1433   : > { %4725 = vmatprep.mubr.msk.f32.mxu1 %vm910_vm3, %v5738_v29  ;;  %4724 = vmatpush3.msra.mxu1 %v4300_v9 }
0x1437   : > { %v4734_v57 = vpop.f32.mrb[24].mxu0 }
0x1438   : > { %v3158_v17 = vmul.f32 0.35355338, %v4734_v57  ;;  %v3148_v18 = vpop.f32.mrb[25].mxu0 }
0x1439   : > { %v3157_v19 = vmul.f32 0.35355338, %v3148_v18 }
0x143a   : > { %v3162_v20 = vsel %vm1000_vm5, %v3158_v17, -inf  ;;  %4726 = vmatmul.mubr.msk.f32.vlgmr.msra.gmra.mrb[12].mxu1 %vm910_vm3, %v5736_v28 }
0x143b   : > { %3163 = vmax.xlane.f32.xlu1 %v3162_v20  ;;  %v3159_v21 = vsel %vm996_vm6, %v3157_v19, -inf }
0x143c   : > { %3160 = vmax.xlane.f32.xlu0 %v3159_v21 }
0x143f   : > { %v4753_v14 = vpop.f32.mrb[26].mxu0 }
0x1440   : > { %v3436_v8 = vpop.f32.mrb[27].mxu0  ;;  %v3446_v10 = vmul.f32 0.35355338, %v4753_v14 }
0x1441   : > { %v3445_v15 = vmul.f32 0.35355338, %v3436_v8 }
0x1442   : > { %v3450_v23 = vsel %vm1000_vm5, %v3446_v10, -inf }
0x1443   : > { %v3447_v22 = vsel %vm996_vm6, %v3445_v15, -inf }
0x1444   : > { %3448 = vmax.xlane.f32.xlu1 %v3447_v22 }
0x1448   : > { %3451 = vmax.xlane.f32.xlu1 %v3450_v23 }
0x14c8   : > { %v3164_v24 = vpop.xlane.xlu1 %3163 }
0x14c9   : > { %v3166_v25 = vsub.f32 %v3158_v17, %v3164_v24  ;;  %v3161_v26 = vpop.xlane.xlu0 %3160 }
0x14ca   : > { %v3165_v27 = vsub.f32 %v3157_v19, %v3161_v26  ;;  %v4340_v26 = vld [vmem:[%s5971_s11 + $0x28] sm:$0xff] }
0x14cb   : > { %v3169_v29 = vmul.f32 1.442695, %v3166_v25  ;;  %v4339_v25 = vld [vmem:[%s5971_s11 + $0x20] sm:$0xff] }
0x14cc   : > { %v3167_v28 = vmul.f32 1.442695, %v3165_v27  ;;  %v4979_v27 = vpack.c.bf16 %v4340_v26, %v4339_v25 }
0x14cd   : > { %5207 = vpow2.f32 %v3169_v29  ;;  %v4341_v29 = vld [vmem:[%s5971_s11 + $0x30] sm:$0xff] }
0x14ce   : > { %5209 = vpow2.f32 %v3167_v28  ;;  %4980 = vmatprep.subr.bf16.mxu0 %v4979_v27  ;;  %v4342_v28 = vld [vmem:[%s5971_s11 + $0x38] sm:$0xff] }
0x14cf   : > { %4982 = vmatpush3.bf16.msra.mxu0 %v4979_v27 }
0x14d1   : > { %v3449_v30 = vpop.xlane.xlu1 %3448 }
0x14d2   : > { %v3453_v31 = vsub.f32 %v3445_v15, %v3449_v30  ;;  %v4983_v30 = vpack.c.bf16 %v4342_v28, %v4341_v29 }
0x14d4   : > { %v3455_v35 = vmul.f32 1.442695, %v3453_v31  ;;  %4984 = vmatprep.subr.bf16.mxu0 %v4983_v30 }
0x14d5   : > { %v3452_v32 = vpop.xlane.xlu1 %3451  ;;  %4986 = vmatpush3.bf16.msra.mxu0 %v4983_v30 }
0x14d6   : > { %v3454_v33 = vsub.f32 %v3446_v10, %v3452_v32 }
0x14d7   : > { %v5208_v34 = vpop.eup %5207 }
0x14d8   : > { %v3457_v36 = vmul.f32 1.442695, %v3454_v33  ;;  %v3174_v37 = vsel %vm1000_vm5, %v5208_v34, 0.0  ;;  %v5210_v38 = vpop.eup %5209 }
0x14d9   : > { %3175 = vadd.xlane.f32.xlu0 %v3174_v37  ;;  %v3171_v39 = vsel %vm996_vm6, %v5210_v38, 0.0 }
0x14da   : > { %5211 = vpow2.f32 %v3457_v36 }
0x14db   : > { %5213 = vpow2.f32 %v3455_v35 }
0x14dd   : > { %3172 = vadd.xlane.f32.xlu0 %v3171_v39 }
0x14e4   : > { %v5212_v40 = vpop.eup %5211 }
0x14e5   : > { %v3462_v41 = vsel %vm1000_vm5, %v5212_v40, 0.0  ;;  %v5214_v42 = vpop.eup %5213 }
0x14e6   : > { %3463 = vadd.xlane.f32.xlu1 %v3462_v41  ;;  %v3459_v43 = vsel %vm996_vm6, %v5214_v42, 0.0 }
0x14ea   : > { %3460 = vadd.xlane.f32.xlu1 %v3459_v43 }
0x14f3   : > { %5130 = vrot.lane.b32.xlu0 %v5702_v47, %s6023_s27 }
0x14fb   : > { %5135 = vrot.lane.b32.xlu1 %v5702_v47, %s6024_s1 }
0x1566   : > { %v3176_v44 = vpop.xlane.xlu0 %3175 }
0x1567   : > { %5215 = vrcp.f32 %v3176_v44 }
0x156a   : > { %v3173_v45 = vpop.xlane.xlu0 %3172 }
0x156b   : > { %5217 = vrcp.f32 %v3173_v45 }
0x156e   : > { %v5131_v46 = vpop.permute.xlu0 %5130 }
0x156f   : > { %v5133_v48 = vunpack.i.h.bf16 %v5131_v46  ;;  %v5132_v49 = vunpack.i.l.bf16 %v5131_v46 }
0x1571   : > { %v4961_v51 = vpack.c.bf16 %v5133_v48, %v5132_v49  ;;  %v5216_v56 = vpop.eup %5215  ;;  %v4351_v48 = vld [vmem:[%s5973_s13 + $0x80] sm:$0xff]  ;;  %v4352_v49 = vld [vmem:[%s5973_s13 + $0x88] sm:$0xff] }
0x1572   : > { %v3180_v59 = vmul.f32 %v5216_v56, %v5208_v34 }
0x1573   : > { %v3464_v55 = vpop.xlane.xlu1 %3463  ;;  %4963 = vmatprep.subr.msk.bf16.mxu1 %vm5503_vm9, %v4961_v51 }
0x1574   : > { %4966 = vmatpush3.bf16.msk.msra.mxu1 %vm5503_vm9, %v4961_v51  ;;  %v4987_v51 = vpack.c.bf16 %v4352_v49, %v4351_v48 }
0x1575   : > { %v5218_v47 = vpop.eup %5217  ;;  %4742 = vmatprep.subr.mxu1 %v4320_v53 }
0x1576   : > { %v3178_v58 = vmul.f32 %v5218_v47, %v5210_v38  ;;  %v4337_v38 = vld [vmem:[%s5969_s9 + $0x1] ss:$0 sm:$0xff] }
0x1577   : > { %v3461_v60 = vpop.xlane.xlu1 %3460  ;;  %v4355_v47 = vld [vmem:[%s5973_s13 + $0xa0] sm:$0xff] }
0x1578   : > { %4739 = vmatprep.mubr.msk.f32.mxu1 %vm996_vm6, %v3178_v58  ;;  %5219 = vrcp.f32 %v3461_v60  ;;  %v4356_v58 = vld [vmem:[%s5973_s13 + $0xa8] sm:$0xff]  ;;  %v4357_v60 = vld [vmem:[%s5973_s13 + $0xb0] sm:$0xff] }
0x1579   : > { %4740 = vmatmul.mubr.msk.f32.vlgmr.msra.gmra.mrb[14].mxu1 %vm996_vm6, %v3180_v59  ;;  %5221 = vrcp.f32 %v3464_v55  ;;  %v4354_v55 = vld [vmem:[%s5973_s13 + $0x98] sm:$0xff]  ;;  %v4995_v59 = vpack.c.bf16 %v4356_v58, %v4355_v47 }
0x157a   : > { %4743 = vmatpush3.msra.mxu1 %v4320_v53  ;;  %v4353_v53 = vld [vmem:[%s5973_s13 + $0x90] sm:$0xff] }
0x157b   : > { %v5136_v61 = vpop.permute.xlu1 %5135  ;;  %v4991_v56 = vpack.c.bf16 %v4354_v55, %v4353_v53 }
0x157c   : > { %v5138_v62 = vunpack.i.h.bf16 %v5136_v61  ;;  %v5137_v63 = vunpack.i.l.bf16 %v5136_v61  ;;  %v4358_v61 = vld [vmem:[%s5973_s13 + $0xb8] sm:$0xff] }
0x157e   : > { %v4973_v0 = vpack.c.bf16 %v5138_v62, %v5137_v63  ;;  %v4999_v62 = vpack.c.bf16 %v4358_v61, %v4357_v60  ;;  %v4359_v63 = vld [vmem:[%s5973_s13 + $0xc0] sm:$0xff] }
0x1580   : > { %4975 = vmatprep.subr.msk.bf16.mxu1 %vm5503_vm9, %v4973_v0 }
0x1582   : > { %v5220_v1 = vpop.eup %5219 }
0x1583   : > { %v5222_v3 = vpop.eup %5221  ;;  %v3466_v52 = vmul.f32 %v5220_v1, %v5214_v42 }
0x1584   : > { %v3468_v5 = vmul.f32 %v5222_v3, %v5212_v40  ;;  %v4338_v40 = vld [vmem:[%s5970_s10 + $0x1] ss:$0 sm:$0xff] }
0x164c   : > { %v4741_v50 = vpop.f32.mrb[14].mxu1 }
0x164d   : > { %v3260_v2 = vpop.f32.mrb[15].mxu1 }
0x164e   : > { %4744 = vmatprep.mubr.msk.f32.mxu1 %vm910_vm3, %v3260_v2  ;;  %v4362_v2 = vld [vmem:[%s5973_s13 + $0xd8] sm:$0xff] }
0x164f   : > { %4745 = vmatmul.mubr.msk.f32.vlgmr.msra.gmra.mrb[12].mxu1 %vm910_vm3, %v4741_v50  ;;  %v4361_v50 = vld [vmem:[%s5973_s13 + $0xd0] sm:$0xff] }
0x1650   : > { %4978 = vmatpush3.bf16.msk.msra.mxu1 %vm5503_vm9, %v4973_v0  ;;  %4758 = vmatprep.mubr.msk.f32.mxu1 %vm996_vm6, %v3466_v52  ;;  %v4360_v0 = vld [vmem:[%s5973_s13 + $0xc8] sm:$0xff]  ;;  %v5007_v3 = vpack.c.bf16 %v4362_v2, %v4361_v50  ;;  %v4363_v52 = vld [vmem:[%s5973_s13 + $0xe0] sm:$0xff] }
0x1651   : > { %4761 = vmatprep.subr.mxu1 %v4330_v4  ;;  %v5003_v1 = vpack.c.bf16 %v4360_v0, %v4359_v63 }
0x1653   : > { %4759 = vmatmul.mubr.msk.f32.vlgmr.msra.gmra.mrb[16].mxu1 %vm996_vm6, %v3468_v5 }
0x1654   : > { %4762 = vmatpush3.msra.mxu1 %v4330_v4  ;;  %v4364_v4 = vld [vmem:[%s5973_s13 + $0xe8] sm:$0xff] }
0x1655   : > { %4988 = vmatprep.subr.bf16.mxu1 %v4987_v51  ;;  %v5011_v5 = vpack.c.bf16 %v4364_v4, %v4363_v52  ;;  %v4368_v4 = vld [vmem:[%s5974_s14 + $0x1] ss:$0 sm:$0xff] }
0x1726   : > { %v4760_v6 = vpop.f32.mrb[16].mxu1 }
0x1727   : > { %v3548_v7 = vpop.f32.mrb[17].mxu1 }
0x1728   : > { %4763 = vmatprep.mubr.msk.f32.mxu1 %vm910_vm3, %v3548_v7  ;;  %v4366_v7 = vld [vmem:[%s5973_s13 + $0xf8] sm:$0xff] }
0x1729   : > { %4764 = vmatmul.mubr.msk.f32.vlgmr.msra.gmra.mrb[12].mxu1 %vm910_vm3, %v4760_v6  ;;  %v4365_v6 = vld [vmem:[%s5973_s13 + $0xf0] sm:$0xff] }
0x172a   : > { %4990 = vmatpush3.bf16.msra.mxu1 %v4987_v51 }
0x172b   : > { %4992 = vmatprep.subr.bf16.mxu1 %v4991_v56 }
0x172e   : > { %4994 = vmatpush3.bf16.msra.mxu1 %v4991_v56 }
0x172f   : > { %4996 = vmatprep.subr.bf16.mxu1 %v4995_v59 }
0x1732   : > { %4998 = vmatpush3.bf16.msra.mxu1 %v4995_v59 }
0x1733   : > { %5000 = vmatprep.subr.bf16.mxu1 %v4999_v62 }
0x1736   : > { %5002 = vmatpush3.bf16.msra.mxu1 %v4999_v62 }
0x1737   : > { %5004 = vmatprep.subr.bf16.mxu1 %v5003_v1 }
0x173a   : > { %5006 = vmatpush3.bf16.msra.mxu1 %v5003_v1 }
0x173b   : > { %5008 = vmatprep.subr.bf16.mxu1 %v5007_v3 }
0x173e   : > { %5010 = vmatpush3.bf16.msra.mxu1 %v5007_v3 }
0x173f   : > { %5012 = vmatprep.subr.bf16.mxu1 %v5011_v5 }
0x1742   : > { %5014 = vmatpush3.bf16.msra.mxu1 %v5011_v5 }
0x17fc   : > { %v4765_v9 = vpop.f32.mrb[12].mxu1 }
0x17fd   : > { %v3643_v54 = vadd.f32 %v4765_v9, %v5661_v13  ;;  %v3631_v16 = vpop.f32.mrb[13].mxu1  ;;  %v5015_v9 = vpack.c.bf16 %v4366_v7, %v4365_v6 }
0x17fe   : > { %v3642_v57 = vadd.f32 %v3631_v16, %v5659_v12 }
0x17ff   : > { %v5827_v17 = vadd.f32 %v4334_v11, %v3643_v54  ;;  %5016 = vmatprep.subr.bf16.mxu1 %v5015_v9 }
0x1800   : > { %v5829_v18 = vadd.f32 %v4334_v11, %v3642_v57  ;;  %5018 = vmatpush3.bf16.msra.mxu1 %v5015_v9  ;;  %v4344_v11 = vld [vmem:[%s5972_s12 + $0x1] ss:$0 sm:$0xff] }
0x1801   : > { %v3661_v19 = vsel %vm771_vm2, %v5827_v17, 0.0 }
0x1802   : > { %3662 = vadd.xlane.f32.xlu1 %v3661_v19  ;;  %v3658_v20 = vsel %vm767_vm1, %v5829_v18, 0.0 }
0x1803   : > { %3659 = vadd.xlane.f32.xlu0 %v3658_v20 }
0x188f   : > { %v3663_v21 = vpop.xlane.xlu1 %3662 }
0x1890   : > { %v3665_v14 = vmul.f32 0.03125, %v3663_v21  ;;  %v3660_v8 = vpop.xlane.xlu0 %3659 }
0x1891   : > { %v3664_v15 = vmul.f32 0.03125, %v3660_v8 }
0x1892   : > { %v3667_v13 = vsub.f32 %v5827_v17, %v3665_v14 }
0x1893   : > { %v3666_v12 = vsub.f32 %v5829_v18, %v3664_v15 }
0x1894   : > { %v3669_v23 = vmul.f32 %v3667_v13, %v3667_v13 }
0x1895   : > { %v3668_v10 = vmul.f32 %v3666_v12, %v3666_v12 }
0x1896   : > { %v3673_v24 = vsel %vm771_vm2, %v3669_v23, 0.0 }
0x1897   : > { %v3670_v22 = vsel %vm767_vm1, %v3668_v10, 0.0 }
0x1898   : > { %3671 = vadd.xlane.f32.xlu0 %v3670_v22 }
0x189c   : > { %3674 = vadd.xlane.f32.xlu0 %v3673_v24 }
0x1925   : > { %v3672_v31 = vpop.xlane.xlu0 %3671 }
0x1926   : > { %v3676_v32 = vmul.f32 0.03125, %v3672_v31 }
0x1928   : > { %v3678_v33 = vadd.f32 1e-05, %v3676_v32 }
0x1929   : > { %v3675_v34 = vpop.xlane.xlu0 %3674 }
0x192a   : > { %5223 = vrsqrt.f32 %v3678_v33  ;;  %v3677_v35 = vmul.f32 0.03125, %v3675_v34 }
0x192c   : > { %v3679_v36 = vadd.f32 1e-05, %v3677_v35 }
0x192e   : > { %5225 = vrsqrt.f32 %v3679_v36 }
0x1934   : > { %v5224_v37 = vpop.eup %5223 }
0x1935   : > { %v3682_v39 = vmul.f32 %v5224_v37, %v3666_v12 }
0x1937   : > { %v3690_v41 = vmul.f32 %v4337_v38, %v3682_v39 }
0x1938   : > { %v5226_v42 = vpop.eup %5225 }
0x1939   : > { %v3683_v43 = vmul.f32 %v5226_v42, %v3667_v13  ;;  %v3698_v44 = vadd.f32 %v4338_v40, %v3690_v41 }
0x193b   : > { %v3691_v45 = vmul.f32 %v4337_v38, %v3683_v43  ;;  %4774 = vmatprep.mubr.msk.f32.mxu0 %vm767_vm1, %v3698_v44 }
0x193d   : > { %v3699_v46 = vadd.f32 %v4338_v40, %v3691_v45 }
0x193f   : > { %4775 = vmatmul.mubr.msk.f32.vlgmr.msra.gmra.mrb[28].mxu0 %vm767_vm1, %v3699_v46 }
0x1a12   : > { %v4776_v54 = vpop.f32.mrb[28].mxu0 }
0x1a13   : > { %v3791_v16 = vadd.f32 %v4776_v54, %v4344_v11  ;;  %v3785_v57 = vpop.f32.mrb[29].mxu0 }
0x1a14   : > { %v3786_v19 = vadd.f32 %v4344_v11, %v3785_v57 }
0x1a15   : > { %v3795_v20 = vmul.f32 0.70710677, %v3791_v16  ;;  %v3843_v1 = vmul.f32 0.5, %v3791_v16 }
0x1a16   : > { %v3794_v21 = vmul.f32 0.70710677, %v3786_v19  ;;  %v3842_v63 = vmul.f32 0.5, %v3786_v19 }
0x1a17   : > { %v3797_v14 = vand.u32 2147483647, %v3795_v20  ;;  %vm3837_vm12 = vcmp.lt.f32.partialorder %v3795_v20, 0.0 }
0x1a18   : > { %v3796_v8 = vand.u32 2147483647, %v3794_v21  ;;  %vm3836_vm13 = vcmp.lt.f32.partialorder %v3794_v21, 0.0 }
0x1a19   : > { %v3799_v15 = vmul.f32 0.3275911, %v3797_v14  ;;  %v3825_v22 = vsub.f32 0.0, %v3797_v14 }
0x1a1a   : > { %v3798_v13 = vmul.f32 0.3275911, %v3796_v8  ;;  %v3824_v23 = vsub.f32 0.0, %v3796_v8 }
0x1a1b   : > { %v3801_v12 = vadd.f32 1.0, %v3799_v15  ;;  %v3827_v25 = vmul.f32 %v3825_v22, %v3797_v14 }
0x1a1c   : > { %v3800_v10 = vadd.f32 1.0, %v3798_v13  ;;  %v3826_v29 = vmul.f32 %v3824_v23, %v3796_v8 }
0x1a1d   : > { %5227 = vrcp.f32 %v3801_v12  ;;  %v3830_v31 = vmul.f32 1.442695, %v3827_v25 }
0x1a1e   : > { %5229 = vrcp.f32 %v3800_v10  ;;  %v3828_v34 = vmul.f32 1.442695, %v3826_v29  ;;  %v4370_v29 = vld [vmem:[%s5976_s16] ss:$0 sm:$0xff] }
0x1a1f   : > { %5231 = vpow2.f32 %v3830_v31 }
0x1a20   : > { %5233 = vpow2.f32 %v3828_v34 }
0x1a27   : > { %v5228_v24 = vpop.eup %5227 }
0x1a28   : > { %v5230_v26 = vpop.eup %5229  ;;  %v3807_v27 = vmul.f32 1.0614054, %v5228_v24 }
0x1a29   : > { %v3806_v28 = vmul.f32 1.0614054, %v5230_v26  ;;  %v5232_v48 = vpop.eup %5231 }
0x1a2a   : > { %v4348_v30 = vadd.f32 -1.4531521, %v3807_v27  ;;  %v5234_v51 = vpop.eup %5233 }
0x1a2b   : > { %v4347_v32 = vadd.f32 -1.4531521, %v3806_v28 }
0x1a2c   : > { %v3811_v33 = vmul.f32 %v5228_v24, %v4348_v30 }
0x1a2d   : > { %v3810_v35 = vmul.f32 %v5230_v26, %v4347_v32 }
0x1a2e   : > { %v3813_v36 = vadd.f32 1.4214138, %v3811_v33 }
0x1a2f   : > { %v3812_v37 = vadd.f32 1.4214138, %v3810_v35 }
0x1a30   : > { %v3815_v38 = vmul.f32 %v5228_v24, %v3813_v36 }
0x1a31   : > { %v3814_v39 = vmul.f32 %v5230_v26, %v3812_v37 }
0x1a32   : > { %v4350_v40 = vadd.f32 -0.28449672, %v3815_v38 }
0x1a33   : > { %v4349_v41 = vadd.f32 -0.28449672, %v3814_v39 }
0x1a34   : > { %v3819_v42 = vmul.f32 %v5228_v24, %v4350_v40 }
0x1a35   : > { %v3818_v43 = vmul.f32 %v5230_v26, %v4349_v41 }
0x1a36   : > { %v3821_v44 = vadd.f32 0.2548296, %v3819_v42 }
0x1a37   : > { %v3820_v45 = vadd.f32 0.2548296, %v3818_v43 }
0x1a38   : > { %v3823_v46 = vmul.f32 %v5228_v24, %v3821_v44 }
0x1a39   : > { %v3822_v49 = vmul.f32 %v5230_v26, %v3820_v45  ;;  %v4369_v26 = vld [vmem:[%s5975_s15] ss:$0 sm:$0xff] }
0x1a3a   : > { %v3833_v53 = vmul.f32 %v5232_v48, %v3823_v46  ;;  %v4051_v48 = vld [vmem:[%s5979_s19] sm:$0xff] }
0x1a3b   : > { %v3832_v55 = vmul.f32 %v5234_v51, %v3822_v49  ;;  %v4052_v49 = vld [vmem:[%s5979_s19 + $0x8] sm:$0xff] }
0x1a3c   : > { %v3835_v56 = vsub.f32 1.0, %v3833_v53  ;;  %v5019_v51 = vpack.c.bf16 %v4052_v49, %v4051_v48  ;;  %v4053_v53 = vld [vmem:[%s5979_s19 + $0x10] sm:$0xff] }
0x1a3d   : > { %v3834_v47 = vsub.f32 1.0, %v3832_v55  ;;  %v4054_v55 = vld [vmem:[%s5979_s19 + $0x18] sm:$0xff] }
0x1a3e   : > { %v3839_v58 = vsub.f32 0.0, %v3835_v56  ;;  %5020 = vmatprep.subr.bf16.mxu0 %v5019_v51 }
0x1a3f   : > { %v3838_v59 = vsub.f32 0.0, %v3834_v47  ;;  %5022 = vmatpush3.bf16.msra.mxu0 %v5019_v51 }
0x1a40   : > { %v3841_v60 = vsel %vm3837_vm12, %v3839_v58, %v3835_v56  ;;  %v5023_v56 = vpack.c.bf16 %v4054_v55, %v4053_v53 }
0x1a41   : > { %v3845_v61 = vadd.f32 1.0, %v3841_v60  ;;  %v3840_v62 = vsel %vm3836_vm13, %v3838_v59, %v3834_v47 }
0x1a42   : > { %v3844_v0 = vadd.f32 1.0, %v3840_v62  ;;  %5024 = vmatprep.subr.bf16.mxu0 %v5023_v56 }
0x1a43   : > { %v3847_v2 = vmul.f32 %v3845_v61, %v3843_v1  ;;  %5026 = vmatpush3.bf16.msra.mxu0 %v5023_v56  ;;  %v4371_v1 = vld [vmem:[%s5977_s17] ss:$0 sm:$0xff] }
0x1a44   : > { %v3846_v50 = vmul.f32 %v3844_v0, %v3842_v63  ;;  %v4040_v63 = vlaneseq }
0x1a46   : > { %4809 = vmatprep.mubr.f32.mxu1 %v3846_v50  ;;  %v4041_v50 = vshrl.u32 %v4040_v63, 7 }
0x1a47   : > { %4810 = vmatmul.mubr.f32.vlgmr.msra.gmra.mrb[18].mxu1 %v3847_v2 }
0x1a48   : > { %vm4043_vm14 = vcmp.eq.s32.totalorder %v4041_v50, 0 }
0x1b1a   : > { %v4811_v3 = vpop.f32.mrb[18].mxu1 }
0x1b1b   : > { %v3931_v52 = vpop.f32.mrb[19].mxu1  ;;  %v3941_v5 = vadd.f32 %v4811_v3, %v5827_v17  ;;  %v4372_v3 = vld [vmem:[%s5978_s18] ss:$0 sm:$0xff] }
0x1b1c   : > { %v3940_v6 = vadd.f32 %v3931_v52, %v5829_v18 }
0x1b1d   : > { %v3951_v11 = vadd.f32 %v4368_v4, %v3941_v5 }
0x1b1e   : > { %v3950_v7 = vadd.f32 %v4368_v4, %v3940_v6 }
0x1b1f   : > { %v3957_v54 = vsel %vm771_vm2, %v3951_v11, 0.0 }
0x1b20   : > { %v3954_v9 = vsel %vm767_vm1, %v3950_v7, 0.0 }
0x1b21   : > { %3955 = vadd.xlane.f32.xlu0 %v3954_v9 }
0x1b25   : > { %3958 = vadd.xlane.f32.xlu0 %v3957_v54  ;;  %v4373_v54 = vld [vmem:[%s5980_s20] ss:$0 sm:$0xff] }
0x1bae   : > { %v3956_v16 = vpop.xlane.xlu0 %3955 }
0x1baf   : > { %v3960_v57 = vmul.f32 0.03125, %v3956_v16 }
0x1bb1   : > { %v3962_v19 = vsub.f32 %v3950_v7, %v3960_v57 }
0x1bb2   : > { %v3959_v20 = vpop.xlane.xlu0 %3958 }
0x1bb3   : > { %v3961_v21 = vmul.f32 0.03125, %v3959_v20  ;;  %v3964_v14 = vmul.f32 %v3962_v19, %v3962_v19 }
0x1bb5   : > { %v3963_v8 = vsub.f32 %v3951_v11, %v3961_v21  ;;  %v3966_v15 = vsel %vm767_vm1, %v3964_v14, 0.0 }
0x1bb6   : > { %3967 = vadd.xlane.f32.xlu0 %v3966_v15 }
0x1bb7   : > { %v3965_v17 = vmul.f32 %v3963_v8, %v3963_v8 }
0x1bb9   : > { %v3969_v18 = vsel %vm771_vm2, %v3965_v17, 0.0 }
0x1bba   : > { %3970 = vadd.xlane.f32.xlu1 %v3969_v18 }
0x1c43   : > { %v3968_v13 = vpop.xlane.xlu0 %3967 }
0x1c44   : > { %v3972_v12 = vmul.f32 0.03125, %v3968_v13 }
0x1c46   : > { %v3974_v10 = vadd.f32 1e-05, %v3972_v12 }
0x1c47   : > { %v3971_v22 = vpop.xlane.xlu1 %3970 }
0x1c48   : > { %5235 = vrsqrt.f32 %v3974_v10  ;;  %v3973_v23 = vmul.f32 0.03125, %v3971_v22 }
0x1c4a   : > { %v3975_v24 = vadd.f32 1e-05, %v3973_v23 }
0x1c4c   : > { %5237 = vrsqrt.f32 %v3975_v24 }
0x1c52   : > { %v5236_v25 = vpop.eup %5235 }
0x1c53   : > { %v3978_v27 = vmul.f32 %v5236_v25, %v3962_v19 }
0x1c55   : > { %v3986_v28 = vmul.f32 %v4369_v26, %v3978_v27 }
0x1c56   : > { %v5238_v30 = vpop.eup %5237 }
0x1c57   : > { %v3994_v31 = vadd.f32 %v4370_v29, %v3986_v28  ;;  %v3979_v32 = vmul.f32 %v5238_v30, %v3963_v8 }
0x1c59   : > { %v3998_v33 = vsel %vm767_vm1, %v3994_v31, 0.0  ;;  %v3987_v34 = vmul.f32 %v4369_v26, %v3979_v32 }
0x1c5a   : > { %3999 = vadd.xlane.f32.xlu0 %v3998_v33 }
0x1c5b   : > { %v3995_v35 = vadd.f32 %v4370_v29, %v3987_v34 }
0x1c5d   : > { %v4001_v36 = vsel %vm771_vm2, %v3995_v35, 0.0 }
0x1c5e   : > { %4002 = vadd.xlane.f32.xlu1 %v4001_v36 }
0x1ce7   : > { %v4000_v37 = vpop.xlane.xlu0 %3999 }
0x1ce8   : > { %v4004_v38 = vmul.f32 0.03125, %v4000_v37 }
0x1cea   : > { %v4006_v39 = vsub.f32 %v3994_v31, %v4004_v38 }
0x1ceb   : > { %v4003_v40 = vpop.xlane.xlu1 %4002 }
0x1cec   : > { %v4005_v41 = vmul.f32 0.03125, %v4003_v40  ;;  %v4008_v42 = vmul.f32 %v4006_v39, %v4006_v39 }
0x1cee   : > { %v4007_v43 = vsub.f32 %v3995_v35, %v4005_v41  ;;  %v4010_v44 = vsel %vm767_vm1, %v4008_v42, 0.0 }
0x1cef   : > { %4011 = vadd.xlane.f32.xlu0 %v4010_v44 }
0x1cf0   : > { %v4009_v45 = vmul.f32 %v4007_v43, %v4007_v43 }
0x1cf2   : > { %v4013_v46 = vsel %vm771_vm2, %v4009_v45, 0.0 }
0x1cf3   : > { %4014 = vadd.xlane.f32.xlu1 %v4013_v46 }
0x1d7c   : > { %v4012_v47 = vpop.xlane.xlu0 %4011 }
0x1d7d   : > { %v4016_v58 = vmul.f32 0.03125, %v4012_v47 }
0x1d7f   : > { %v4018_v59 = vadd.f32 1e-05, %v4016_v58 }
0x1d80   : > { %v4015_v60 = vpop.xlane.xlu1 %4014 }
0x1d81   : > { %5239 = vrsqrt.f32 %v4018_v59  ;;  %v4017_v61 = vmul.f32 0.03125, %v4015_v60 }
0x1d83   : > { %v4019_v62 = vadd.f32 1e-05, %v4017_v61 }
0x1d85   : > { %5241 = vrsqrt.f32 %v4019_v62 }
0x1d8b   : > { %v5240_v0 = vpop.eup %5239 }
0x1d8c   : > { %v4022_v2 = vmul.f32 %v5240_v0, %v4006_v39 }
0x1d8e   : > { %v4030_v52 = vmul.f32 %v4371_v1, %v4022_v2 }
0x1d8f   : > { %v5242_v4 = vpop.eup %5241 }
0x1d90   : > { %v4023_v5 = vmul.f32 %v5242_v4, %v4007_v43  ;;  %v4038_v6 = vadd.f32 %v4372_v3, %v4030_v52 }
0x1d92   : > { %v4031_v7 = vmul.f32 %v4371_v1, %v4023_v5  ;;  %v4049_v9 = vsel %vm4043_vm14, %v3994_v31, %v4038_v6 }
0x1d93   : > { %4820 = vmatprep.mubr.msk.f32.mxu0 %vm767_vm1, %v4049_v9 }
0x1d94   : > { %v4039_v11 = vadd.f32 %v4372_v3, %v4031_v7 }
0x1d96   : > { %4821 = vmatmul.mubr.msk.f32.vlgmr.msra.gmra.mrb[30].mxu0 %vm767_vm1, %v4039_v11 }
0x1e69   : > { %v4822_v16 = vpop.f32.mrb[30].mxu0 }
0x1e6a   : > { %v4140_v57 = vadd.f32 %v4822_v16, %v4373_v54  ;;  %v4134_v19 = vpop.f32.mrb[31].mxu0 }
0x1e6b   : > { %v4135_v20 = vadd.f32 %v4373_v54, %v4134_v19 }
0x1e6c   : > { %4145 = vst.msk [vmem:[%s676_s23 + $0x8] sm:$0x1] %vm4144_vm15, %v4140_v57 }
0x1e6d   : > { %4143 = vst.msk [vmem:[%s676_s23] sm:$0xff] %vm683_vm0, %v4135_v20 }
0x1e6e PF: > { %s31_s2 = sadd.s32 1, %s5249_s2  }
0x1e6f   : > { %p28_p4 = scmp.ge.s32.totalorder %s31_s2, 4  }
0x1e71   :  { %30 = sbr.rel (!%p28_p4) target bundleno = 7 (0x7), region = 155 }

</bundles_post_ra>
